<compile_context>
chip_gen: v6e
topology: v6e:2x2x1
jax: 0.10.0
libtpu: 0.0.40
codegen_flags: <defaults>
</compile_context>

<pallas_src>
import numpy as np

import jax
import jax.numpy as jnp
from jax.experimental import pallas as pl
from jax.experimental.pallas import tpu as pltpu


# --------------------------------------------------------------------------
# Pallas kernels
# --------------------------------------------------------------------------
def _make_conv_kernel(nb, h, c_out, out_padded):
    """Fused 3x3 conv (3 Toeplitz matmuls) + bias + ReLU + 2x2 maxpool.

    Per grid step: nb images.  x_ref[n] is the padded image as a 2-D
    (H+2, (W+2)*Cin) tile; t_ref[kh] is the (W+2)*Cin x (W*Cout) Toeplitz
    weight for row-tap kh (columns ordered (w-parity, w//2, c)); b_ref is the
    bias tiled over w//2.  If out_padded, the pooled result is emitted already
    zero-padded as the next conv layer's input ((H/2+2, (W/2+2)*Cout)).
    """
    h2 = h // 2
    half = h2 * c_out              # W/2 * Cout  (square images: W == H)

    def kernel(x_ref, t_ref, b_ref, o_ref):
        t0 = t_ref[0]
        t1 = t_ref[1]
        t2 = t_ref[2]
        b = b_ref[...]                                        # (1, half) f32
        for n in range(nb):
            xi = x_ref[n]                                     # (H+2, (W+2)*Cin) bf16
            acc = jnp.dot(xi[0:h, :], t0, preferred_element_type=jnp.float32)
            acc = acc + jnp.dot(xi[1:h + 1, :], t1, preferred_element_type=jnp.float32)
            acc = acc + jnp.dot(xi[2:h + 2, :], t2, preferred_element_type=jnp.float32)
            # W-pool: even-w outputs live in the first lane half, odd-w in the
            # second (Toeplitz column ordering), so pooling is one max.
            wp = jnp.maximum(acc[:, :half], acc[:, half:])    # (H, half)
            # H-pool: unrolled max over static row pairs (no strided access).
            rows = [jnp.maximum(wp[2 * r:2 * r + 1, :], wp[2 * r + 1:2 * r + 2, :])
                    for r in range(h2)]
            hp = jnp.concatenate(rows, axis=0)                # (H/2, half)
            y = jnp.maximum(hp + b, 0.0)                      # bias + ReLU
            if out_padded:
                # Emit the next layer's zero-padded input directly (pad w by
                # one pixel = Cout lanes each side, plus one zero row top/bot).
                zc = jnp.zeros((h2, c_out), jnp.float32)
                y = jnp.concatenate([zc, y, zc], axis=1)
                zr = jnp.zeros((1, half + 2 * c_out), jnp.float32)
                y = jnp.concatenate([zr, y, zr], axis=0)
            o_ref[n] = y.astype(o_ref.dtype)

    return kernel


def _fc_kernel(x_ref, w1_ref, b1_ref, w2_ref, b2_ref, o_ref):
    """Fused fc1 + ReLU + fc2 (both weights stay resident in VMEM)."""
    h = jnp.dot(x_ref[...], w1_ref[...], preferred_element_type=jnp.float32)
    h = jnp.maximum(h + b1_ref[...], 0.0).astype(jnp.bfloat16)
    y = jnp.dot(h, w2_ref[...], preferred_element_type=jnp.float32)
    o_ref[...] = y + b2_ref[...]


# --------------------------------------------------------------------------
# Pallas wrappers
# --------------------------------------------------------------------------
def _pick_nb(batch):
    """Images per grid step: amortize per-step overhead but keep >=2 steps."""
    for d in (8, 4, 2):
        if batch % d == 0 and batch // d >= 2:
            return d
    return 1


def conv_pool_pallas(xp, t, b_tiled, *, h, c_out, out_padded):
    """xp: (B, H+2, (W+2)*Cin) padded bf16 input.  Returns pooled activations,
    either as the next conv's padded input (B, H/2+2, (W/2+2)*Cout) or as the
    plain pooled map (B, H/2, W/2*Cout)."""
    batch, hp, wpcin = xp.shape
    h2 = h // 2
    half = h2 * c_out
    nb = _pick_nb(batch)
    if out_padded:
        out_rows, out_cols = h2 + 2, half + 2 * c_out
    else:
        out_rows, out_cols = h2, half
    kernel = _make_conv_kernel(nb, h, c_out, out_padded)
    return pl.pallas_call(
        kernel,
        out_shape=jax.ShapeDtypeStruct((batch, out_rows, out_cols), jnp.bfloat16),
        grid=(batch // nb,),
        in_specs=[
            pl.BlockSpec((nb, hp, wpcin), lambda i: (i, 0, 0)),
            pl.BlockSpec(t.shape, lambda i: (0, 0, 0)),       # resident weights
            pl.BlockSpec((1, half), lambda i: (0, 0)),        # resident bias
        ],
        out_specs=pl.BlockSpec((nb, out_rows, out_cols), lambda i: (i, 0, 0)),
        compiler_params=pltpu.CompilerParams(dimension_semantics=("parallel",)),
    )(xp, t, b_tiled)


def fc_pallas(x, w1, b1, w2, b2):
    """Fused (x @ w1 + b1).relu() @ w2 + b2, tiled over rows of x."""
    batch, k = x.shape
    n1 = w1.shape[1]
    n2 = w2.shape[1]
    bt = batch if batch <= 512 else 512
    g = pl.cdiv(batch, bt)
    bp = g * bt
    if bp != batch:
        x = jnp.pad(x, ((0, bp - batch), (0, 0)))
    out = pl.pallas_call(
        _fc_kernel,
        out_shape=jax.ShapeDtypeStruct((bp, n2), jnp.float32),
        grid=(g,),
        in_specs=[
            pl.BlockSpec((bt, k), lambda i: (i, 0)),
            pl.BlockSpec((k, n1), lambda i: (0, 0)),
            pl.BlockSpec((1, n1), lambda i: (0, 0)),
            pl.BlockSpec((n1, n2), lambda i: (0, 0)),
            pl.BlockSpec((1, n2), lambda i: (0, 0)),
        ],
        out_specs=pl.BlockSpec((bt, n2), lambda i: (i, 0)),
        compiler_params=pltpu.CompilerParams(dimension_semantics=("parallel",)),
    )(x, w1, b1, w2, b2)
    return out[:batch]


# --------------------------------------------------------------------------
# One-time parameter preparation (outside the jitted per-step path)
# --------------------------------------------------------------------------
def prepare_params(params):
    def toeplitz(w_oihw, w_out):
        """3x3 conv weights -> per-kh Toeplitz matrices over the padded row.

        T[kh, j*Cin + ci, col(w, co)] = W[kh, j - w, ci, co] for 0 <= j-w < 3,
        with col(w, co) = (w % 2) * (W/2*Cout) + (w // 2) * Cout + co so the
        2x2 pool's W reduction is a max of two lane halves.
        """
        w = np.asarray(jax.device_get(w_oihw), np.float32)    # (Cout, Cin, 3, 3)
        c_out, c_in = w.shape[0], w.shape[1]
        wk = np.transpose(w, (2, 3, 1, 0))                    # (kh, kw, Cin, Cout)
        wp = w_out + 2
        w2 = w_out // 2
        t = np.zeros((3, wp * c_in, w_out * c_out), np.float32)
        for kh in range(3):
            for wpos in range(w_out):
                col0 = (wpos % 2) * (w2 * c_out) + (wpos // 2) * c_out
                for kw in range(3):
                    j = wpos + kw
                    t[kh, j * c_in:(j + 1) * c_in, col0:col0 + c_out] = wk[kh, kw]
        return jnp.asarray(t, jnp.bfloat16)

    # fc1 columns permuted from PyTorch NCHW flatten order to NHWC (h, w, c).
    fc1_w = params["fc1_w"].reshape(128, 64, 7, 7).transpose(0, 2, 3, 1).reshape(128, 3136)
    return {
        "t1": toeplitz(params["conv1_w"], 28),                                   # (3, 30, 896)
        "b1": jnp.tile(params["conv1_b"], 14).reshape(1, 448).astype(jnp.float32),
        "t2": toeplitz(params["conv2_w"], 14),                                   # (3, 512, 896)
        "b2": jnp.tile(params["conv2_b"], 7).reshape(1, 448).astype(jnp.float32),
        "fc1_w": fc1_w.T.astype(jnp.bfloat16),                                   # (3136, 128)
        "fc1_b": params["fc1_b"].reshape(1, 128).astype(jnp.float32),
        "fc2_w": params["fc2_w"].T.astype(jnp.bfloat16),                         # (128, 10)
        "fc2_b": params["fc2_b"].reshape(1, 10).astype(jnp.float32),
    }


# --------------------------------------------------------------------------
# Forward pass
# --------------------------------------------------------------------------
def simple_cnn_forward(prep, x_nchw):
    batch = x_nchw.shape[0]
    # conv1 input: (B,1,28,28) -> zero-padded (B,30,30) bf16 (tiny, one XLA pad).
    xp = jnp.pad(x_nchw[:, 0, :, :], ((0, 0), (1, 1), (1, 1))).astype(jnp.bfloat16)

    # conv1 + ReLU + pool, emitted directly as conv2's zero-padded input.
    y1 = conv_pool_pallas(xp, prep["t1"], prep["b1"], h=28, c_out=32,
                          out_padded=True)                      # (B, 16, 512)
    # conv2 + ReLU + pool; output columns are (w2, c) == NHWC flatten order.
    y2 = conv_pool_pallas(y1, prep["t2"], prep["b2"], h=14, c_out=64,
                          out_padded=False)                     # (B, 7, 448)

    flat = y2.reshape(batch, 7 * 448)    # contiguous -> free reshape, NHWC order
    # fc1 + ReLU + fc2 fused.  nn.Dropout(0.25) is the identity at inference.
    # TODO(synk): training-mode dropout would use pltpu.prng_seed / prng_random_bits.
    return fc_pallas(flat, prep["fc1_w"], prep["fc1_b"], prep["fc2_w"], prep["fc2_b"])


# --------------------------------------------------------------------------
# Reference / test harness
# --------------------------------------------------------------------------
def init_params(key):
    ks = jax.random.split(key, 8)

    def u(k, shape, fan_in):
        bound = float(fan_in) ** -0.5
        return jax.random.uniform(k, shape, jnp.float32, -bound, bound)

    return {
        "conv1_w": u(ks[0], (32, 1, 3, 3), 1 * 9),
        "conv1_b": u(ks[1], (32,), 1 * 9),
        "conv2_w": u(ks[2], (64, 32, 3, 3), 32 * 9),
        "conv2_b": u(ks[3], (64,), 32 * 9),
        "fc1_w":   u(ks[4], (128, 64 * 7 * 7), 64 * 7 * 7),
        "fc1_b":   u(ks[5], (128,), 64 * 7 * 7),
        "fc2_w":   u(ks[6], (10, 128), 128),
        "fc2_b":   u(ks[7], (10,), 128),
    }


def reference_forward(params, x):
    """Pure-JAX f32 reference replicating the PyTorch forward (NCHW)."""
    def conv(x, w, b):
        y = jax.lax.conv_general_dilated(
            x, w, (1, 1), "SAME", dimension_numbers=("NCHW", "OIHW", "NCHW"))
        return y + b.reshape(1, -1, 1, 1)

    def pool(x):
        return jax.lax.reduce_window(x, -jnp.inf, jax.lax.max,
                                     (1, 1, 2, 2), (1, 1, 2, 2), "VALID")

    y = pool(jax.nn.relu(conv(x, params["conv1_w"], params["conv1_b"])))
    y = pool(jax.nn.relu(conv(y, params["conv2_w"], params["conv2_b"])))
    y = y.reshape(y.shape[0], -1)
    y = jax.nn.relu(y @ params["fc1_w"].T + params["fc1_b"])
    return y @ params["fc2_w"].T + params["fc2_b"]


if __name__ == "__main__":
    key = jax.random.PRNGKey(0)
    pkey, xkey = jax.random.split(key)
    params = init_params(pkey)
    prep = prepare_params(params)          # one-time layout prep, outside jit

    # MNIST-shaped input implied by fc1 = Linear(64*7*7, 128): (B, 1, 28, 28)
    x = jax.random.normal(xkey, (2, 1, 28, 28), jnp.float32)

    fwd = jax.jit(simple_cnn_forward)
    out = jax.block_until_ready(fwd(prep, x))
    assert out.shape == (2, 10), out.shape

    ref = reference_forward(params, x)
    if not jnp.allclose(out, ref, rtol=5e-2, atol=5e-2):
        raise AssertionError(f"mismatch vs reference: max abs err "
                             f"{float(jnp.max(jnp.abs(out - ref)))}")
    print("KERNEL_OK")
</pallas_src>

<mosaic_0001>
module attributes {stable_mosaic.version = 11 : i64} {
  func.func @kernel(%arg0: i32, %arg1: memref<1x30x30xbf16, #tpu.memory_space<vmem>>, %arg2: memref<3x30x896xbf16, #tpu.memory_space<vmem>>, %arg3: memref<1x448xf32, #tpu.memory_space<vmem>>, %arg4: memref<1x16x512xbf16, #tpu.memory_space<vmem>>) attributes {dimension_semantics = [#tpu.dimension_semantics<parallel>], iteration_bounds = array<i64: 2>, scalar_prefetch = 0 : i64, scratch_operands = 0 : i64, tpu.core_type = #tpu.core_type<tc>, window_params = [{transform_indices = @transform_0, window_bounds = array<i64: 1, 30, 30>}, {pipeline_mode = #tpu.pipeline_mode<synchronous>, transform_indices = @transform_1, window_bounds = array<i64: 3, 30, 896>}, {pipeline_mode = #tpu.pipeline_mode<synchronous>, transform_indices = @transform_2, window_bounds = array<i64: 1, 448>}, {transform_indices = @transform_3, window_bounds = array<i64: 1, 16, 512>}]} {
    %c0 = arith.constant 0 : index
    %c0_0 = arith.constant 0 : index
    %c0_1 = arith.constant 0 : index
    %0 = vector.load %arg2[%c0, %c0_0, %c0_1] : memref<3x30x896xbf16, #tpu.memory_space<vmem>>, vector<1x30x896xbf16>
    %1 = vector.shape_cast %0 : vector<1x30x896xbf16> to vector<30x896xbf16>
    %c1 = arith.constant 1 : index
    %c0_2 = arith.constant 0 : index
    %c0_3 = arith.constant 0 : index
    %2 = vector.load %arg2[%c1, %c0_2, %c0_3] : memref<3x30x896xbf16, #tpu.memory_space<vmem>>, vector<1x30x896xbf16>
    %3 = vector.shape_cast %2 : vector<1x30x896xbf16> to vector<30x896xbf16>
    %c2 = arith.constant 2 : index
    %c0_4 = arith.constant 0 : index
    %c0_5 = arith.constant 0 : index
    %4 = vector.load %arg2[%c2, %c0_4, %c0_5] : memref<3x30x896xbf16, #tpu.memory_space<vmem>>, vector<1x30x896xbf16>
    %5 = vector.shape_cast %4 : vector<1x30x896xbf16> to vector<30x896xbf16>
    %c0_6 = arith.constant 0 : index
    %c0_7 = arith.constant 0 : index
    %6 = vector.load %arg3[%c0_6, %c0_7] : memref<1x448xf32, #tpu.memory_space<vmem>>, vector<1x448xf32>
    %c0_8 = arith.constant 0 : index
    %c0_9 = arith.constant 0 : index
    %c0_10 = arith.constant 0 : index
    %7 = vector.load %arg1[%c0_8, %c0_9, %c0_10] : memref<1x30x30xbf16, #tpu.memory_space<vmem>>, vector<1x30x30xbf16>
    %8 = vector.shape_cast %7 : vector<1x30x30xbf16> to vector<30x30xbf16>
    %9 = vector.extract_strided_slice %8 {offsets = [0, 0], sizes = [28, 30], strides = [1, 1]} : vector<30x30xbf16> to vector<28x30xbf16>
    %cst = arith.constant dense<0.000000e+00> : vector<28x896xf32>
    %10 = tpu.matmul %9, %1, %cst {dimension_numbers = #tpu.dot_dimension_numbers<[1], [0], [0], [1], [0, 0, 1, 1], [], []>} : vector<28x30xbf16>, vector<30x896xbf16>, vector<28x896xf32> -> vector<28x896xf32>
    %11 = vector.extract_strided_slice %8 {offsets = [1, 0], sizes = [28, 30], strides = [1, 1]} : vector<30x30xbf16> to vector<28x30xbf16>
    %cst_11 = arith.constant dense<0.000000e+00> : vector<28x896xf32>
    %12 = tpu.matmul %11, %3, %cst_11 {dimension_numbers = #tpu.dot_dimension_numbers<[1], [0], [0], [1], [0, 0, 1, 1], [], []>} : vector<28x30xbf16>, vector<30x896xbf16>, vector<28x896xf32> -> vector<28x896xf32>
    %13 = arith.addf %10, %12 : vector<28x896xf32>
    %14 = vector.extract_strided_slice %8 {offsets = [2, 0], sizes = [28, 30], strides = [1, 1]} : vector<30x30xbf16> to vector<28x30xbf16>
    %cst_12 = arith.constant dense<0.000000e+00> : vector<28x896xf32>
    %15 = tpu.matmul %14, %5, %cst_12 {dimension_numbers = #tpu.dot_dimension_numbers<[1], [0], [0], [1], [0, 0, 1, 1], [], []>} : vector<28x30xbf16>, vector<30x896xbf16>, vector<28x896xf32> -> vector<28x896xf32>
    %16 = arith.addf %13, %15 : vector<28x896xf32>
    %17 = vector.extract_strided_slice %16 {offsets = [0, 0], sizes = [28, 448], strides = [1, 1]} : vector<28x896xf32> to vector<28x448xf32>
    %18 = vector.extract_strided_slice %16 {offsets = [0, 448], sizes = [28, 448], strides = [1, 1]} : vector<28x896xf32> to vector<28x448xf32>
    %19 = arith.maximumf %17, %18 : vector<28x448xf32>
    %20 = vector.extract_strided_slice %19 {offsets = [0, 0], sizes = [1, 448], strides = [1, 1]} : vector<28x448xf32> to vector<1x448xf32>
    %21 = vector.extract_strided_slice %19 {offsets = [1, 0], sizes = [1, 448], strides = [1, 1]} : vector<28x448xf32> to vector<1x448xf32>
    %22 = arith.maximumf %20, %21 : vector<1x448xf32>
    %23 = vector.extract_strided_slice %19 {offsets = [2, 0], sizes = [1, 448], strides = [1, 1]} : vector<28x448xf32> to vector<1x448xf32>
    %24 = vector.extract_strided_slice %19 {offsets = [3, 0], sizes = [1, 448], strides = [1, 1]} : vector<28x448xf32> to vector<1x448xf32>
    %25 = arith.maximumf %23, %24 : vector<1x448xf32>
    %26 = vector.extract_strided_slice %19 {offsets = [4, 0], sizes = [1, 448], strides = [1, 1]} : vector<28x448xf32> to vector<1x448xf32>
    %27 = vector.extract_strided_slice %19 {offsets = [5, 0], sizes = [1, 448], strides = [1, 1]} : vector<28x448xf32> to vector<1x448xf32>
    %28 = arith.maximumf %26, %27 : vector<1x448xf32>
    %29 = vector.extract_strided_slice %19 {offsets = [6, 0], sizes = [1, 448], strides = [1, 1]} : vector<28x448xf32> to vector<1x448xf32>
    %30 = vector.extract_strided_slice %19 {offsets = [7, 0], sizes = [1, 448], strides = [1, 1]} : vector<28x448xf32> to vector<1x448xf32>
    %31 = arith.maximumf %29, %30 : vector<1x448xf32>
    %32 = vector.extract_strided_slice %19 {offsets = [8, 0], sizes = [1, 448], strides = [1, 1]} : vector<28x448xf32> to vector<1x448xf32>
    %33 = vector.extract_strided_slice %19 {offsets = [9, 0], sizes = [1, 448], strides = [1, 1]} : vector<28x448xf32> to vector<1x448xf32>
    %34 = arith.maximumf %32, %33 : vector<1x448xf32>
    %35 = vector.extract_strided_slice %19 {offsets = [10, 0], sizes = [1, 448], strides = [1, 1]} : vector<28x448xf32> to vector<1x448xf32>
    %36 = vector.extract_strided_slice %19 {offsets = [11, 0], sizes = [1, 448], strides = [1, 1]} : vector<28x448xf32> to vector<1x448xf32>
    %37 = arith.maximumf %35, %36 : vector<1x448xf32>
    %38 = vector.extract_strided_slice %19 {offsets = [12, 0], sizes = [1, 448], strides = [1, 1]} : vector<28x448xf32> to vector<1x448xf32>
    %39 = vector.extract_strided_slice %19 {offsets = [13, 0], sizes = [1, 448], strides = [1, 1]} : vector<28x448xf32> to vector<1x448xf32>
    %40 = arith.maximumf %38, %39 : vector<1x448xf32>
    %41 = vector.extract_strided_slice %19 {offsets = [14, 0], sizes = [1, 448], strides = [1, 1]} : vector<28x448xf32> to vector<1x448xf32>
    %42 = vector.extract_strided_slice %19 {offsets = [15, 0], sizes = [1, 448], strides = [1, 1]} : vector<28x448xf32> to vector<1x448xf32>
    %43 = arith.maximumf %41, %42 : vector<1x448xf32>
    %44 = vector.extract_strided_slice %19 {offsets = [16, 0], sizes = [1, 448], strides = [1, 1]} : vector<28x448xf32> to vector<1x448xf32>
    %45 = vector.extract_strided_slice %19 {offsets = [17, 0], sizes = [1, 448], strides = [1, 1]} : vector<28x448xf32> to vector<1x448xf32>
    %46 = arith.maximumf %44, %45 : vector<1x448xf32>
    %47 = vector.extract_strided_slice %19 {offsets = [18, 0], sizes = [1, 448], strides = [1, 1]} : vector<28x448xf32> to vector<1x448xf32>
    %48 = vector.extract_strided_slice %19 {offsets = [19, 0], sizes = [1, 448], strides = [1, 1]} : vector<28x448xf32> to vector<1x448xf32>
    %49 = arith.maximumf %47, %48 : vector<1x448xf32>
    %50 = vector.extract_strided_slice %19 {offsets = [20, 0], sizes = [1, 448], strides = [1, 1]} : vector<28x448xf32> to vector<1x448xf32>
    %51 = vector.extract_strided_slice %19 {offsets = [21, 0], sizes = [1, 448], strides = [1, 1]} : vector<28x448xf32> to vector<1x448xf32>
    %52 = arith.maximumf %50, %51 : vector<1x448xf32>
    %53 = vector.extract_strided_slice %19 {offsets = [22, 0], sizes = [1, 448], strides = [1, 1]} : vector<28x448xf32> to vector<1x448xf32>
    %54 = vector.extract_strided_slice %19 {offsets = [23, 0], sizes = [1, 448], strides = [1, 1]} : vector<28x448xf32> to vector<1x448xf32>
    %55 = arith.maximumf %53, %54 : vector<1x448xf32>
    %56 = vector.extract_strided_slice %19 {offsets = [24, 0], sizes = [1, 448], strides = [1, 1]} : vector<28x448xf32> to vector<1x448xf32>
    %57 = vector.extract_strided_slice %19 {offsets = [25, 0], sizes = [1, 448], strides = [1, 1]} : vector<28x448xf32> to vector<1x448xf32>
    %58 = arith.maximumf %56, %57 : vector<1x448xf32>
    %59 = vector.extract_strided_slice %19 {offsets = [26, 0], sizes = [1, 448], strides = [1, 1]} : vector<28x448xf32> to vector<1x448xf32>
    %60 = vector.extract_strided_slice %19 {offsets = [27, 0], sizes = [1, 448], strides = [1, 1]} : vector<28x448xf32> to vector<1x448xf32>
    %61 = arith.maximumf %59, %60 : vector<1x448xf32>
    %62 = tpu.concatenate %22, %25, %28, %31, %34, %37, %40, %43, %46, %49, %52, %55, %58, %61 in 0 : vector<1x448xf32>, vector<1x448xf32>, vector<1x448xf32>, vector<1x448xf32>, vector<1x448xf32>, vector<1x448xf32>, vector<1x448xf32>, vector<1x448xf32>, vector<1x448xf32>, vector<1x448xf32>, vector<1x448xf32>, vector<1x448xf32>, vector<1x448xf32>, vector<1x448xf32> -> vector<14x448xf32>
    %63 = vector.broadcast %6 : vector<1x448xf32> to vector<14x448xf32>
    %64 = arith.addf %62, %63 : vector<14x448xf32>
    %cst_13 = arith.constant 0.000000e+00 : f32
    %65 = vector.broadcast %cst_13 : f32 to vector<14x448xf32>
    %66 = arith.maximumf %64, %65 : vector<14x448xf32>
    %cst_14 = arith.constant 0.000000e+00 : f32
    %67 = vector.broadcast %cst_14 : f32 to vector<14x32xf32>
    %68 = tpu.concatenate %67, %66, %67 in 1 : vector<14x32xf32>, vector<14x448xf32>, vector<14x32xf32> -> vector<14x512xf32>
    %cst_15 = arith.constant 0.000000e+00 : f32
    %69 = vector.broadcast %cst_15 : f32 to vector<1x512xf32>
    %70 = tpu.concatenate %69, %68, %69 in 0 : vector<1x512xf32>, vector<14x512xf32>, vector<1x512xf32> -> vector<16x512xf32>
    %71 = arith.truncf %70 : vector<16x512xf32> to vector<16x512xbf16>
    %c0_16 = arith.constant 0 : index
    %c0_17 = arith.constant 0 : index
    %c0_18 = arith.constant 0 : index
    %72 = vector.load %arg4[%c0_16, %c0_17, %c0_18] : memref<1x16x512xbf16, #tpu.memory_space<vmem>>, vector<1x16x512xbf16>
    %73 = vector.shape_cast %72 : vector<1x16x512xbf16> to vector<16x512xbf16>
    %74 = vector.shape_cast %71 : vector<16x512xbf16> to vector<1x16x512xbf16>
    tpu.vector_store %arg4[%c0_16, %c0_17, %c0_18], %74 {strides = array<i32>} : memref<1x16x512xbf16, #tpu.memory_space<vmem>>, vector<1x16x512xbf16>,
    return
  }
  func.func @transform_0(%arg0: i32) -> (i32, i32, i32) {
    %c0_i32 = arith.constant 0 : i32
    %c0_i32_0 = arith.constant 0 : i32
    %c0_i32_1 = arith.constant 0 : i32
    return %arg0, %c0_i32, %c0_i32_0 : i32, i32, i32
  }
  func.func @transform_1(%arg0: i32) -> (i32, i32, i32) {
    %c0_i32 = arith.constant 0 : i32
    %c0_i32_0 = arith.constant 0 : i32
    %c0_i32_1 = arith.constant 0 : i32
    %c0_i32_2 = arith.constant 0 : i32
    return %c0_i32, %c0_i32_0, %c0_i32_1 : i32, i32, i32
  }
  func.func @transform_2(%arg0: i32) -> (i32, i32) {
    %c0_i32 = arith.constant 0 : i32
    %c0_i32_0 = arith.constant 0 : i32
    %c0_i32_1 = arith.constant 0 : i32
    return %c0_i32, %c0_i32_0 : i32, i32
  }
  func.func @transform_3(%arg0: i32) -> (i32, i32, i32) {
    %c0_i32 = arith.constant 0 : i32
    %c0_i32_0 = arith.constant 0 : i32
    %c0_i32_1 = arith.constant 0 : i32
    return %arg0, %c0_i32, %c0_i32_0 : i32, i32, i32
  }
}

module attributes {stable_mosaic.version = 11 : i64} {
  func.func @kernel(%arg0: i32, %arg1: memref<1x16x512xbf16, #tpu.memory_space<vmem>>, %arg2: memref<3x512x896xbf16, #tpu.memory_space<vmem>>, %arg3: memref<1x448xf32, #tpu.memory_space<vmem>>, %arg4: memref<1x7x448xbf16, #tpu.memory_space<vmem>>) attributes {dimension_semantics = [#tpu.dimension_semantics<parallel>], iteration_bounds = array<i64: 2>, scalar_prefetch = 0 : i64, scratch_operands = 0 : i64, tpu.core_type = #tpu.core_type<tc>, window_params = [{transform_indices = @transform_0, window_bounds = array<i64: 1, 16, 512>}, {pipeline_mode = #tpu.pipeline_mode<synchronous>, transform_indices = @transform_1, window_bounds = array<i64: 3, 512, 896>}, {pipeline_mode = #tpu.pipeline_mode<synchronous>, transform_indices = @transform_2, window_bounds = array<i64: 1, 448>}, {transform_indices = @transform_3, window_bounds = array<i64: 1, 7, 448>}]} {
    %c0 = arith.constant 0 : index
    %c0_0 = arith.constant 0 : index
    %c0_1 = arith.constant 0 : index
    %0 = vector.load %arg2[%c0, %c0_0, %c0_1] : memref<3x512x896xbf16, #tpu.memory_space<vmem>>, vector<1x512x896xbf16>
    %1 = vector.shape_cast %0 : vector<1x512x896xbf16> to vector<512x896xbf16>
    %c1 = arith.constant 1 : index
    %c0_2 = arith.constant 0 : index
    %c0_3 = arith.constant 0 : index
    %2 = vector.load %arg2[%c1, %c0_2, %c0_3] : memref<3x512x896xbf16, #tpu.memory_space<vmem>>, vector<1x512x896xbf16>
    %3 = vector.shape_cast %2 : vector<1x512x896xbf16> to vector<512x896xbf16>
    %c2 = arith.constant 2 : index
    %c0_4 = arith.constant 0 : index
    %c0_5 = arith.constant 0 : index
    %4 = vector.load %arg2[%c2, %c0_4, %c0_5] : memref<3x512x896xbf16, #tpu.memory_space<vmem>>, vector<1x512x896xbf16>
    %5 = vector.shape_cast %4 : vector<1x512x896xbf16> to vector<512x896xbf16>
    %c0_6 = arith.constant 0 : index
    %c0_7 = arith.constant 0 : index
    %6 = vector.load %arg3[%c0_6, %c0_7] : memref<1x448xf32, #tpu.memory_space<vmem>>, vector<1x448xf32>
    %c0_8 = arith.constant 0 : index
    %c0_9 = arith.constant 0 : index
    %c0_10 = arith.constant 0 : index
    %7 = vector.load %arg1[%c0_8, %c0_9, %c0_10] : memref<1x16x512xbf16, #tpu.memory_space<vmem>>, vector<1x16x512xbf16>
    %8 = vector.shape_cast %7 : vector<1x16x512xbf16> to vector<16x512xbf16>
    %9 = vector.extract_strided_slice %8 {offsets = [0, 0], sizes = [14, 512], strides = [1, 1]} : vector<16x512xbf16> to vector<14x512xbf16>
    %cst = arith.constant dense<0.000000e+00> : vector<14x896xf32>
    %10 = tpu.matmul %9, %1, %cst {dimension_numbers = #tpu.dot_dimension_numbers<[1], [0], [0], [1], [0, 0, 1, 1], [], []>} : vector<14x512xbf16>, vector<512x896xbf16>, vector<14x896xf32> -> vector<14x896xf32>
    %11 = vector.extract_strided_slice %8 {offsets = [1, 0], sizes = [14, 512], strides = [1, 1]} : vector<16x512xbf16> to vector<14x512xbf16>
    %cst_11 = arith.constant dense<0.000000e+00> : vector<14x896xf32>
    %12 = tpu.matmul %11, %3, %cst_11 {dimension_numbers = #tpu.dot_dimension_numbers<[1], [0], [0], [1], [0, 0, 1, 1], [], []>} : vector<14x512xbf16>, vector<512x896xbf16>, vector<14x896xf32> -> vector<14x896xf32>
    %13 = arith.addf %10, %12 : vector<14x896xf32>
    %14 = vector.extract_strided_slice %8 {offsets = [2, 0], sizes = [14, 512], strides = [1, 1]} : vector<16x512xbf16> to vector<14x512xbf16>
    %cst_12 = arith.constant dense<0.000000e+00> : vector<14x896xf32>
    %15 = tpu.matmul %14, %5, %cst_12 {dimension_numbers = #tpu.dot_dimension_numbers<[1], [0], [0], [1], [0, 0, 1, 1], [], []>} : vector<14x512xbf16>, vector<512x896xbf16>, vector<14x896xf32> -> vector<14x896xf32>
    %16 = arith.addf %13, %15 : vector<14x896xf32>
    %17 = vector.extract_strided_slice %16 {offsets = [0, 0], sizes = [14, 448], strides = [1, 1]} : vector<14x896xf32> to vector<14x448xf32>
    %18 = vector.extract_strided_slice %16 {offsets = [0, 448], sizes = [14, 448], strides = [1, 1]} : vector<14x896xf32> to vector<14x448xf32>
    %19 = arith.maximumf %17, %18 : vector<14x448xf32>
    %20 = vector.extract_strided_slice %19 {offsets = [0, 0], sizes = [1, 448], strides = [1, 1]} : vector<14x448xf32> to vector<1x448xf32>
    %21 = vector.extract_strided_slice %19 {offsets = [1, 0], sizes = [1, 448], strides = [1, 1]} : vector<14x448xf32> to vector<1x448xf32>
    %22 = arith.maximumf %20, %21 : vector<1x448xf32>
    %23 = vector.extract_strided_slice %19 {offsets = [2, 0], sizes = [1, 448], strides = [1, 1]} : vector<14x448xf32> to vector<1x448xf32>
    %24 = vector.extract_strided_slice %19 {offsets = [3, 0], sizes = [1, 448], strides = [1, 1]} : vector<14x448xf32> to vector<1x448xf32>
    %25 = arith.maximumf %23, %24 : vector<1x448xf32>
    %26 = vector.extract_strided_slice %19 {offsets = [4, 0], sizes = [1, 448], strides = [1, 1]} : vector<14x448xf32> to vector<1x448xf32>
    %27 = vector.extract_strided_slice %19 {offsets = [5, 0], sizes = [1, 448], strides = [1, 1]} : vector<14x448xf32> to vector<1x448xf32>
    %28 = arith.maximumf %26, %27 : vector<1x448xf32>
    %29 = vector.extract_strided_slice %19 {offsets = [6, 0], sizes = [1, 448], strides = [1, 1]} : vector<14x448xf32> to vector<1x448xf32>
    %30 = vector.extract_strided_slice %19 {offsets = [7, 0], sizes = [1, 448], strides = [1, 1]} : vector<14x448xf32> to vector<1x448xf32>
    %31 = arith.maximumf %29, %30 : vector<1x448xf32>
    %32 = vector.extract_strided_slice %19 {offsets = [8, 0], sizes = [1, 448], strides = [1, 1]} : vector<14x448xf32> to vector<1x448xf32>
    %33 = vector.extract_strided_slice %19 {offsets = [9, 0], sizes = [1, 448], strides = [1, 1]} : vector<14x448xf32> to vector<1x448xf32>
    %34 = arith.maximumf %32, %33 : vector<1x448xf32>
    %35 = vector.extract_strided_slice %19 {offsets = [10, 0], sizes = [1, 448], strides = [1, 1]} : vector<14x448xf32> to vector<1x448xf32>
    %36 = vector.extract_strided_slice %19 {offsets = [11, 0], sizes = [1, 448], strides = [1, 1]} : vector<14x448xf32> to vector<1x448xf32>
    %37 = arith.maximumf %35, %36 : vector<1x448xf32>
    %38 = vector.extract_strided_slice %19 {offsets = [12, 0], sizes = [1, 448], strides = [1, 1]} : vector<14x448xf32> to vector<1x448xf32>
    %39 = vector.extract_strided_slice %19 {offsets = [13, 0], sizes = [1, 448], strides = [1, 1]} : vector<14x448xf32> to vector<1x448xf32>
    %40 = arith.maximumf %38, %39 : vector<1x448xf32>
    %41 = tpu.concatenate %22, %25, %28, %31, %34, %37, %40 in 0 : vector<1x448xf32>, vector<1x448xf32>, vector<1x448xf32>, vector<1x448xf32>, vector<1x448xf32>, vector<1x448xf32>, vector<1x448xf32> -> vector<7x448xf32>
    %42 = vector.broadcast %6 : vector<1x448xf32> to vector<7x448xf32>
    %43 = arith.addf %41, %42 : vector<7x448xf32>
    %cst_13 = arith.constant 0.000000e+00 : f32
    %44 = vector.broadcast %cst_13 : f32 to vector<7x448xf32>
    %45 = arith.maximumf %43, %44 : vector<7x448xf32>
    %46 = arith.truncf %45 : vector<7x448xf32> to vector<7x448xbf16>
    %c0_14 = arith.constant 0 : index
    %c0_15 = arith.constant 0 : index
    %c0_16 = arith.constant 0 : index
    %47 = vector.load %arg4[%c0_14, %c0_15, %c0_16] : memref<1x7x448xbf16, #tpu.memory_space<vmem>>, vector<1x7x448xbf16>
    %48 = vector.shape_cast %47 : vector<1x7x448xbf16> to vector<7x448xbf16>
    %49 = vector.shape_cast %46 : vector<7x448xbf16> to vector<1x7x448xbf16>
    tpu.vector_store %arg4[%c0_14, %c0_15, %c0_16], %49 {strides = array<i32>} : memref<1x7x448xbf16, #tpu.memory_space<vmem>>, vector<1x7x448xbf16>,
    return
  }
  func.func @transform_0(%arg0: i32) -> (i32, i32, i32) {
    %c0_i32 = arith.constant 0 : i32
    %c0_i32_0 = arith.constant 0 : i32
    %c0_i32_1 = arith.constant 0 : i32
    return %arg0, %c0_i32, %c0_i32_0 : i32, i32, i32
  }
  func.func @transform_1(%arg0: i32) -> (i32, i32, i32) {
    %c0_i32 = arith.constant 0 : i32
    %c0_i32_0 = arith.constant 0 : i32
    %c0_i32_1 = arith.constant 0 : i32
    %c0_i32_2 = arith.constant 0 : i32
    return %c0_i32, %c0_i32_0, %c0_i32_1 : i32, i32, i32
  }
  func.func @transform_2(%arg0: i32) -> (i32, i32) {
    %c0_i32 = arith.constant 0 : i32
    %c0_i32_0 = arith.constant 0 : i32
    %c0_i32_1 = arith.constant 0 : i32
    return %c0_i32, %c0_i32_0 : i32, i32
  }
  func.func @transform_3(%arg0: i32) -> (i32, i32, i32) {
    %c0_i32 = arith.constant 0 : i32
    %c0_i32_0 = arith.constant 0 : i32
    %c0_i32_1 = arith.constant 0 : i32
    return %arg0, %c0_i32, %c0_i32_0 : i32, i32, i32
  }
}

module attributes {stable_mosaic.version = 11 : i64} {
  func.func @_fc_kernel(%arg0: i32, %arg1: memref<2x3136xbf16, #tpu.memory_space<vmem>>, %arg2: memref<3136x128xbf16, #tpu.memory_space<vmem>>, %arg3: memref<1x128xf32, #tpu.memory_space<vmem>>, %arg4: memref<128x10xbf16, #tpu.memory_space<vmem>>, %arg5: memref<1x10xf32, #tpu.memory_space<vmem>>, %arg6: memref<2x10xf32, #tpu.memory_space<vmem>>) attributes {dimension_semantics = [#tpu.dimension_semantics<parallel>], iteration_bounds = array<i64: 1>, scalar_prefetch = 0 : i64, scratch_operands = 0 : i64, tpu.core_type = #tpu.core_type<tc>, window_params = [{transform_indices = @transform_0, window_bounds = array<i64: 2, 3136>}, {pipeline_mode = #tpu.pipeline_mode<synchronous>, transform_indices = @transform_1, window_bounds = array<i64: 3136, 128>}, {pipeline_mode = #tpu.pipeline_mode<synchronous>, transform_indices = @transform_2, window_bounds = array<i64: 1, 128>}, {pipeline_mode = #tpu.pipeline_mode<synchronous>, transform_indices = @transform_3, window_bounds = array<i64: 128, 10>}, {pipeline_mode = #tpu.pipeline_mode<synchronous>, transform_indices = @transform_4, window_bounds = array<i64: 1, 10>}, {transform_indices = @transform_5, window_bounds = array<i64: 2, 10>}]} {
    %c0 = arith.constant 0 : index
    %c0_0 = arith.constant 0 : index
    %0 = vector.load %arg1[%c0, %c0_0] : memref<2x3136xbf16, #tpu.memory_space<vmem>>, vector<2x3136xbf16>
    %c0_1 = arith.constant 0 : index
    %c0_2 = arith.constant 0 : index
    %1 = vector.load %arg2[%c0_1, %c0_2] : memref<3136x128xbf16, #tpu.memory_space<vmem>>, vector<3136x128xbf16>
    %cst = arith.constant dense<0.000000e+00> : vector<2x128xf32>
    %2 = tpu.matmul %0, %1, %cst {dimension_numbers = #tpu.dot_dimension_numbers<[1], [0], [0], [1], [0, 0, 1, 1], [], []>} : vector<2x3136xbf16>, vector<3136x128xbf16>, vector<2x128xf32> -> vector<2x128xf32>
    %c0_3 = arith.constant 0 : index
    %c0_4 = arith.constant 0 : index
    %3 = vector.load %arg3[%c0_3, %c0_4] : memref<1x128xf32, #tpu.memory_space<vmem>>, vector<1x128xf32>
    %4 = vector.broadcast %3 : vector<1x128xf32> to vector<2x128xf32>
    %5 = arith.addf %2, %4 : vector<2x128xf32>
    %cst_5 = arith.constant 0.000000e+00 : f32
    %6 = vector.broadcast %cst_5 : f32 to vector<2x128xf32>
    %7 = arith.maximumf %5, %6 : vector<2x128xf32>
    %8 = arith.truncf %7 : vector<2x128xf32> to vector<2x128xbf16>
    %c0_6 = arith.constant 0 : index
    %c0_7 = arith.constant 0 : index
    %9 = vector.load %arg4[%c0_6, %c0_7] : memref<128x10xbf16, #tpu.memory_space<vmem>>, vector<128x10xbf16>
    %cst_8 = arith.constant dense<0.000000e+00> : vector<2x10xf32>
    %10 = tpu.matmul %8, %9, %cst_8 {dimension_numbers = #tpu.dot_dimension_numbers<[1], [0], [0], [1], [0, 0, 1, 1], [], []>} : vector<2x128xbf16>, vector<128x10xbf16>, vector<2x10xf32> -> vector<2x10xf32>
    %c0_9 = arith.constant 0 : index
    %c0_10 = arith.constant 0 : index
    %11 = vector.load %arg5[%c0_9, %c0_10] : memref<1x10xf32, #tpu.memory_space<vmem>>, vector<1x10xf32>
    %12 = vector.broadcast %11 : vector<1x10xf32> to vector<2x10xf32>
    %13 = arith.addf %10, %12 : vector<2x10xf32>
    %c0_11 = arith.constant 0 : index
    %c0_12 = arith.constant 0 : index
    %14 = vector.load %arg6[%c0_11, %c0_12] : memref<2x10xf32, #tpu.memory_space<vmem>>, vector<2x10xf32>
    tpu.vector_store %arg6[%c0_11, %c0_12], %13 {strides = array<i32>} : memref<2x10xf32, #tpu.memory_space<vmem>>, vector<2x10xf32>,
    return
  }
  func.func @transform_0(%arg0: i32) -> (i32, i32) {
    %c0_i32 = arith.constant 0 : i32
    %c0_i32_0 = arith.constant 0 : i32
    return %arg0, %c0_i32 : i32, i32
  }
  func.func @transform_1(%arg0: i32) -> (i32, i32) {
    %c0_i32 = arith.constant 0 : i32
    %c0_i32_0 = arith.constant 0 : i32
    %c0_i32_1 = arith.constant 0 : i32
    return %c0_i32, %c0_i32_0 : i32, i32
  }
  func.func @transform_2(%arg0: i32) -> (i32, i32) {
    %c0_i32 = arith.constant 0 : i32
    %c0_i32_0 = arith.constant 0 : i32
    %c0_i32_1 = arith.constant 0 : i32
    return %c0_i32, %c0_i32_0 : i32, i32
  }
  func.func @transform_3(%arg0: i32) -> (i32, i32) {
    %c0_i32 = arith.constant 0 : i32
    %c0_i32_0 = arith.constant 0 : i32
    %c0_i32_1 = arith.constant 0 : i32
    return %c0_i32, %c0_i32_0 : i32, i32
  }
  func.func @transform_4(%arg0: i32) -> (i32, i32) {
    %c0_i32 = arith.constant 0 : i32
    %c0_i32_0 = arith.constant 0 : i32
    %c0_i32_1 = arith.constant 0 : i32
    return %c0_i32, %c0_i32_0 : i32, i32
  }
  func.func @transform_5(%arg0: i32) -> (i32, i32) {
    %c0_i32 = arith.constant 0 : i32
    %c0_i32_0 = arith.constant 0 : i32
    return %arg0, %c0_i32 : i32, i32
  }
}

</mosaic_0001>

<bundles_post_ra>
// kernel: simple_cnn_forward.3
= control target key start
LH: loop header
LB: loop body
LE: loop exit
PB: predicated region body
PF: predicated region fallthrough
CT: control target
= control target key end

     0   :  { %8 = vsyncpa [#allocation3], 0  ;;  %s2589_s0 = inlined_call_operand.vmem [shape: bf16[2,30,30], index: 0, kind: input, shape index: {}]   ;;  %s2590_s1 = inlined_call_operand.hbm [shape: bf16[3,30,896], index: 1, kind: input, shape index: {}]   ;;  %s2591_s2 = inlined_call_operand.hbm [shape: f32[1,448], index: 2, kind: input, shape index: {}]   ;;  %s2592_s3 = inlined_call_operand.vmem [shape: bf16[2,16,512], index: 3, kind: output, shape index: {}]  }
   0x1   :  { %9 = vsyncpa [#allocation5], 0  ;;  %s2102_s12 = smov 0  }
   0x2 LB: > { %s2108_s13 = sadd.s32 4294967295, %s2073_s12   ;;  %p1752_p0 = scmp.ge.s32.totalorder %s2073_s12, 1  ;;  %s2073_s12 = sphi %s2102_s12, %s15_s12  }
   0x3   : > { %p114_p1 = scmp.lt.s32.totalorder %s2073_s12, 3  ;;  %s2075_s14 = smov [#allocation2]  }
   0x4   : > { %s126_s15 = sshll.u32 %s2075_s14, 4  ;;  %p1906_p3 = scmp.eq.s32.totalorder %s2108_s13, 0  ;;  %s127_s15 = int_to_ptr.vmem [resolvable:$true] %s126_s15 }
   0x5   : > { %p2112_p2 = pnand %p1752_p0, %p114_p1  ;;  %s2076_s17 = smov [#allocation4]  }
   0x6   : > { %s140_s18 = sshll.u32 %s2076_s17, 4  ;;  %s2018_s20 = scalar_lea.vmem %s127_s15, 5376  ;;  %s141_s18 = int_to_ptr.vmem [resolvable:$true] %s140_s18 }
   0x7   : > { %p1899_p4 = pneg %p2112_p2  ;;  %p2019_p7 = scmp.ne.s32.totalorder %s127_s15, %s2018_s20 }
   0x8   : > { %p2026_p10 = scmp.lt.s32.totalorder %s127_s15, %s127_s15  ;;  %p2027_p11 = scmp.lt.s32.totalorder %s2018_s20, %s2018_s20 }
   0x9   : > { %p2121_p5 = pnand %p1906_p3, %p1899_p4 }
   0xa   : > { %p2028_p12 = por %p2027_p11, %p2026_p10 }
   0xb   : > { %p2009_p6 = pneg %p2121_p5 }
   0xd   : > { %p2021_p8 = pnand %p2019_p7, %p2009_p6 }
   0xf   : > { %p2022_p9 = pneg %p2021_p8 }
  0x11   : > { %p2029_p13 = pnand %p2028_p12, %p2022_p9 }
  0x13   : > { %2032 = shalt.err (!%p2029_p13)
}
  0x14   : > { %s2077_s21 = smov 448   ;;  %s2078_s22 = smov 28  }
  0x15   : > { %1902 = dma.hbm_to_vmem [thread:$0]  (!%p2121_p5), %s2590_s1, 5376, %s127_s15, [#allocation3], %s2077_s21, %s2077_s21, %s2078_s22  }
  0x16   : > { %s2044_s25 = scalar_lea.vmem %s141_s18, 64  ;;  %p2052_p7 = scmp.lt.s32.totalorder %s141_s18, %s141_s18 }
  0x17   : > { %p2045_p0 = scmp.ne.s32.totalorder %s141_s18, %s2044_s25  ;;  %p2053_p8 = scmp.lt.s32.totalorder %s2044_s25, %s2044_s25 }
  0x19   : > { %p2047_p1 = pnand %p2045_p0, %p2009_p6  ;;  %p2054_p10 = por %p2053_p8, %p2052_p7 }
  0x1b   : > { %p2048_p4 = pneg %p2047_p1 }
  0x1d   : > { %p2055_p9 = pnand %p2054_p10, %p2048_p4 }
  0x1f   : > { %2058 = shalt.err (!%p2055_p9)
}
  0x20   : > { %1905 = dma.hbm_to_vmem [thread:$0]  (!%p2121_p5), %s2591_s2, 64, %s141_s18, [#allocation5]  }
  0x21   : > { %161 = sbr.rel (%p2112_p2) target bundleno = 616 (0x268), region = 32 }
  0x26   : > { %2064 = dma.done.wait (%p1906_p3), [#allocation3], 5376  }
  0x27   : > { %2066 = vsyncadd (%p1906_p3), [#allocation3], 4294961920 }
  0x28   : > { %2068 = dma.done.wait (%p1906_p3), [#allocation5], 64  }
  0x29   : > { %2070 = vsyncadd (%p1906_p3), [#allocation5], 4294967232  ;;  %p189_p6 = scmp.lt.s32.totalorder %s2108_s13, 1  ;;  %v2079_v0 = vmov 0   ;;  %vm353_vm0 = vcmask 1046528   ;;  %vm346_vm2 = vcmask 244736  }
  0x2a   : > { %407 = vmatprep.mubr.bf16.mxu0 %v2079_v0  ;;  %460 = vmatprep.mubr.bf16.mxu1 %v2079_v0  ;;  %v1945_v1 = vld [vmem:[#allocation2 + $0xac] ss:$28 sps:$4 sm:$0x7f]   ;;  %v1947_v2 = vld [vmem:[#allocation2 + $0xb4] ss:$28 sps:$4 sm:$0x7f]  }
  0x2b   : > { %s2596_s13 = smov (!%p189_p6, %s2108_s13), 1  ;;  %1779 = vmatprep.subr.msk.bf16.mxu0 %vm353_vm0, %v1945_v1  ;;  %v1949_v3 = vld [vmem:[#allocation2 + $0xa8] ss:$28 sps:$4 sm:$0x7f]   ;;  %1782 = vmatprep.subr.msk.bf16.mxu1 %vm353_vm0, %v1947_v2  ;;  %v1951_v5 = vld [vmem:[#allocation2 + $0x74] ss:$28 sps:$4 sm:$0xff]  }
  0x2c   : > { %s1846_s28 = sshll.u32 %s2596_s13, 4  ;;  %v1950_v4 = vld [vmem:[#allocation2 + $0xb0] ss:$28 sps:$4 sm:$0x7f]   ;;  %v355_v6 = vsel %vm353_vm0, %v1949_v3, 0  ;;  %s2080_s5 = smov 64  }
  0x2d   : > { %v361_v7 = vsel %vm353_vm0, %v1950_v4, 0  ;;  %v1953_v8 = vld [vmem:[#allocation2 + $0x7c] ss:$28 sps:$4 sm:$0xff]   ;;  %s193_s4 = scalar_lea.vmem %s2589_s0, %s1846_s28  ;;  %388 = vmatpush1.bf16.msra.mxu0 %v355_v6  ;;  %v1955_v9 = vld [vmem:[#allocation2 + $0x70] ss:$28 sps:$4 sm:$0xff]   ;;  %vm1261_vm3 = vcmask 523264  }
  0x2e   : > { %441 = vmatpush1.bf16.msra.mxu1 %v361_v7  ;;  %v1956_v10 = vld [vmem:[#allocation2 + $0x78] ss:$28 sps:$4 sm:$0xff]   ;;  %389 = vmatprep.subr.bf16.mxu0 %v1951_v5  ;;  %v2167_v11 = vld [vmem:[%s193_s4] sm:$0xff]   ;;  %v2169_v12 = vld [vmem:[%s193_s4 + $0x8] sm:$0x7f]   ;;  %vm1482_vm4 = vcmask 1040384  }
  0x2f   : > { %442 = vmatprep.subr.bf16.mxu1 %v1953_v8  ;;  %v1959_v13 = vld [vmem:[#allocation2 + $0xbc] ss:$28 sps:$4 sm:$0x7f]   ;;  %v267_v14 = vshrl.u32 %v2167_v11, 16  ;;  %v269_v15 = vshll.u32 %v2167_v11, 16  ;;  %v274_v16 = vshll.u32 %v2169_v12, 16 }
  0x30   : > { %v1961_v17 = vld [vmem:[#allocation2 + $0xb8] ss:$28 sps:$4 sm:$0x7f]   ;;  %v1962_v20 = vld [vmem:[#allocation2 + $0xc0] ss:$28 sps:$4 sm:$0x7f]  }
  0x31   : > { %390 = vmatpush1.bf16.msra.mxu0 %v1955_v9  ;;  %v271_v18 = vrot.slane %v269_v15, 1  ;;  %v276_v19 = vrot.slane %v274_v16, 1  ;;  %vm265_vm1 = vsmask.f32 7424  ;;  %v367_v22 = vsel %vm353_vm0, %v1961_v17, 0  ;;  %s2081_s6 = smov 32  }
  0x32   : > { %443 = vmatpush1.bf16.msra.mxu1 %v1956_v10  ;;  %1785 = vmatprep.subr.msk.bf16.mxu0 %vm353_vm0, %v1959_v13  ;;  %v373_v23 = vsel %vm353_vm0, %v1962_v20, 0  ;;  %v1965_v24 = vld [vmem:[#allocation2 + $0x84] ss:$28 sps:$4 sm:$0xff]   ;;  %v278_v27 = vshrl.u32 %v2169_v12, 16  ;;  %v1978_v39 = vld [vmem:[#allocation2 + $0xc] ss:$28 sps:$4 sm:$0xff]  }
  0x33   : > { %v272_v21 = vor.u32 %v271_v18, %v267_v14  ;;  %1888 = vmatprep.subr.msk.bf16.mxu1 %vm353_vm0, %v1962_v20  ;;  %v1966_v26 = vld [vmem:[#allocation2 + $0x88] ss:$28 sps:$4 sm:$0xff]   ;;  %v1963_v28 = vld [vmem:[#allocation2 + $0x80] ss:$28 sps:$4 sm:$0xff]   ;;  %v1985_v44 = vld [vmem:[#allocation2 + $0x14] ss:$28 sps:$4 sm:$0xff]  }
  0x34   : > { %v1967_v29 = vld [vmem:[#allocation2 + $0x3c] ss:$28 sps:$4 sm:$0x7f]   ;;  %v1969_v30 = vld [vmem:[#allocation2 + $0x44] ss:$28 sps:$4 sm:$0x7f]   ;;  %v280_v31 = vor.u32 %v278_v27, %v276_v19 }
  0x35   : > { %v277_v25 = vsel %vm265_vm1, %v272_v21, %v276_v19  ;;  %v1971_v32 = vld [vmem:[#allocation2 + $0x38] ss:$28 sps:$4 sm:$0x7f]   ;;  %v1972_v33 = vld [vmem:[#allocation2 + $0x40] ss:$28 sps:$4 sm:$0x7f]  }
  0x36   : > { %1780 = vmatmul.mubr.msk.bf16.vlgmr.msra.gmra.mxu0 %vm346_vm2, %v277_v25  ;;  %1783 = vmatmul.mubr.msk.bf16.vlgmr.msra.gmra.mxu1 %vm346_vm2, %v277_v25  ;;  %v1975_v34 = vld [vmem:[#allocation2 + $0x4] ss:$28 sps:$4 sm:$0xff]   ;;  %v653_v35 = vsel %vm353_vm0, %v1971_v32, 0  ;;  %v659_v36 = vsel %vm353_vm0, %v1972_v33, 0  ;;  %v1983_v45 = vld [vmem:[#allocation2 + $0x10] ss:$28 sps:$4 sm:$0xff]  }
  0x37   : > { %494 = vmatpush1.bf16.msra.mxu0 %v367_v22  ;;  %1865 = vmatpush3.bf16.msra.mxu1 %v373_v23  ;;  %v1973_v37 = vld [vmem:[#allocation2] ss:$28 sps:$4 sm:$0xff]   ;;  %v1976_v38 = vld [vmem:[#allocation2 + $0x8] ss:$28 sps:$4 sm:$0xff]   ;;  %v1986_v48 = vld [vmem:[#allocation2 + $0x18] ss:$28 sps:$4 sm:$0xff]  }
  0x38   : > { %417 = vmatprep.mubr.bf16.mxu0 %v2079_v0  ;;  %470 = vmatprep.mubr.bf16.mxu1 %v2079_v0  ;;  %v1979_v40 = vld [vmem:[#allocation2 + $0x4c] ss:$28 sps:$4 sm:$0x7f]   ;;  %v1987_v46 = vld [vmem:[#allocation2 + $0x124] ss:$28 sps:$4 sm:$0x7f]  }
  0x39   : > { %495 = vmatprep.subr.bf16.mxu0 %v1965_v24  ;;  %1866 = vmatprep.subr.bf16.mxu1 %v1966_v26  ;;  %v1981_v41 = vld [vmem:[#allocation2 + $0x48] ss:$28 sps:$4 sm:$0x7f]   ;;  %v1982_v42 = vld [vmem:[#allocation2 + $0x50] ss:$28 sps:$4 sm:$0x7f]  }
  0x3a   : > { %v665_v43 = vsel %vm353_vm0, %v1981_v41, 0  ;;  %v671_v47 = vsel %vm353_vm0, %v1982_v42, 0  ;;  %v1989_v49 = vld [vmem:[#allocation2 + $0x120] ss:$28 sps:$4 sm:$0x7f]   ;;  %v882_v59 = vrot.slane %v2167_v11, 1 }
  0x3b   : > { %496 = vmatpush1.bf16.msra.mxu0 %v1963_v28  ;;  %1867 = vmatpush3.bf16.msra.mxu1 %v1966_v26  ;;  %v1990_v50 = vld [vmem:[#allocation2 + $0x11c] ss:$28 sps:$4 sm:$0x7f]   ;;  %v963_v51 = vsel %vm353_vm0, %v1989_v49, 0  ;;  %v1998_v52 = vld [vmem:[#allocation2 + $0xec] ss:$28 sps:$4 sm:$0xff]  }
  0x3c   : > { %1804 = vmatprep.subr.msk.bf16.mxu1 %vm353_vm0, %v1967_v29  ;;  %1807 = vmatprep.subr.msk.bf16.mxu0 %vm353_vm0, %v1969_v30  ;;  %v1996_v53 = vld [vmem:[#allocation2 + $0xe8] ss:$28 sps:$4 sm:$0xff]   ;;  %v1992_v54 = vld [vmem:[#allocation2 + $0x118] ss:$28 sps:$4 sm:$0x7f]   ;;  %v883_v60 = vrot.slane %v2169_v12, 1 }
  0x3d   : > { %v2002_v55 = vld [vmem:[#allocation2 + $0x130] ss:$28 sps:$4 sm:$0x7f]   ;;  %v957_v56 = vsel %vm353_vm0, %v1992_v54, 0  ;;  %v1995_v57 = vld [vmem:[#allocation2 + $0xe4] ss:$28 sps:$4 sm:$0xff]  }
  0x3e   : > { %1781 = vmatmul.mubr.msk.bf16.gmra.mxu0 %vm346_vm2, %v280_v31  ;;  %1784 = vmatmul.mubr.msk.bf16.gmra.mxu1 %vm346_vm2, %v280_v31  ;;  %v1993_v58 = vld [vmem:[#allocation2 + $0xe0] ss:$28 sps:$4 sm:$0xff]   ;;  %v1999_v61 = vld [vmem:[#allocation2 + $0x12c] ss:$28 sps:$4 sm:$0x7f]   ;;  %v884_v63 = vsel %vm353_vm0, %v882_v59, %v883_v60  ;;  %v975_v2 = vsel %vm353_vm0, %v2002_v55, 0 }
  0x3f   : > { %513 = vmatprep.mubr.bf16.mxu0 %v2079_v0  ;;  %1868 = vmatprep.mubr.msk.bf16.mxu1 %vm346_vm2, %v277_v25  ;;  %v2001_v62 = vld [vmem:[#allocation2 + $0x128] ss:$28 sps:$4 sm:$0x7f]   ;;  %v2005_v3 = vld [vmem:[#allocation2 + $0xf4] ss:$28 sps:$4 sm:$0xff]   ;;  %vm1487_vm5 = vcmask 1041408  }
  0x40   : > { %v969_v1 = vsel %vm353_vm0, %v2001_v62, 0  ;;  %v2006_v4 = vld [vmem:[#allocation2 + $0xf8] ss:$28 sps:$4 sm:$0xff]   ;;  %v2003_v5 = vld [vmem:[#allocation2 + $0xf0] ss:$28 sps:$4 sm:$0xff]   ;;  %vm1492_vm6 = vcmask 1042432  }
  0x41   : > { %vm1497_vm7 = vcmask 1043456   ;;  %vm1502_vm8 = vcmask 1044480   ;;  %vm1507_vm9 = vcmask 1045504   ;;  %vm1597_vm10 = vcmask 261120   ;;  %s1847_s7 = sshll.u32 %s2596_s13, 5 }
  0x42   : > { %vm1610_vm11 = vcmask 785408   ;;  %s198_s10 = scalar_lea.vmem %s2592_s3, %s1847_s7 }
  0x46   : > { %1786 = vmatmul.mubr.msk.bf16.vlgmr.msra.gmra.mxu0 %vm346_vm2, %v277_v25  ;;  %1869 = vmatmul.mubr.msk.bf16.vlgmr.msra.gmra.mxu1 %vm346_vm2, %v280_v31 }
  0x47   : > { %686 = vmatpush1.bf16.msra.mxu1 %v653_v35  ;;  %739 = vmatpush1.bf16.msra.mxu0 %v659_v36 }
  0x48   : > { %687 = vmatprep.subr.bf16.mxu1 %v1975_v34  ;;  %523 = vmatprep.mubr.bf16.mxu0 %v2079_v0 }
  0x49   : > { %705 = vmatprep.mubr.bf16.mxu1 %v2079_v0  ;;  %740 = vmatprep.subr.bf16.mxu0 %v1978_v39 }
  0x4b   : > { %688 = vmatpush1.bf16.msra.mxu1 %v1973_v37  ;;  %741 = vmatpush1.bf16.msra.mxu0 %v1976_v38 }
  0x4c   : > { %1810 = vmatprep.subr.msk.bf16.mxu1 %vm353_vm0, %v1979_v40  ;;  %1889 = vmatprep.subr.msk.bf16.mxu0 %vm353_vm0, %v1982_v42 }
  0x4e   : > { %1787 = vmatmul.mubr.msk.bf16.gmra.mxu0 %vm346_vm2, %v280_v31  ;;  %1805 = vmatmul.mubr.msk.bf16.vlgmr.msra.gmra.mxu1 %vm346_vm2, %v2167_v11 }
  0x4f   : > { %792 = vmatpush1.bf16.msra.mxu1 %v665_v43  ;;  %715 = vmatprep.mubr.bf16.mxu1 %v2079_v0 }
  0x50   : > { %758 = vmatprep.mubr.bf16.mxu0 %v2079_v0  ;;  %793 = vmatprep.subr.bf16.mxu1 %v1985_v44 }
  0x53   : > { %794 = vmatpush1.bf16.msra.mxu1 %v1983_v45 }
  0x54   : > { %1832 = vmatprep.subr.msk.bf16.mxu1 %vm353_vm0, %v1987_v46 }
  0x56   : > { %1806 = vmatmul.mubr.msk.bf16.gmra.mxu1 %vm346_vm2, %v2169_v12  ;;  %1808 = vmatmul.mubr.msk.bf16.vlgmr.msra.gmra.mxu0 %vm346_vm2, %v2167_v11 }
  0x57   : > { %1873 = vmatpush3.bf16.msra.mxu0 %v671_v47  ;;  %768 = vmatprep.mubr.bf16.mxu0 %v2079_v0 }
  0x58   : > { %811 = vmatprep.mubr.bf16.mxu1 %v2079_v0  ;;  %1874 = vmatprep.subr.bf16.mxu0 %v1986_v48 }
  0x5b   : > { %1875 = vmatpush3.bf16.msra.mxu0 %v1986_v48 }
  0x5c   : > { %1829 = vmatprep.subr.msk.bf16.mxu0 %vm353_vm0, %v1990_v50 }
  0x5e   : > { %1809 = vmatmul.mubr.msk.bf16.gmra.mxu0 %vm346_vm2, %v2169_v12  ;;  %1811 = vmatmul.mubr.msk.bf16.vlgmr.msra.gmra.mxu1 %vm346_vm2, %v2167_v11 }
  0x5f   : > { %1043 = vmatpush1.bf16.msra.mxu1 %v963_v51  ;;  %821 = vmatprep.mubr.bf16.mxu1 %v2079_v0 }
  0x60   : > { %1876 = vmatprep.mubr.msk.bf16.mxu0 %vm346_vm2, %v2167_v11  ;;  %1044 = vmatprep.subr.bf16.mxu1 %v1998_v52 }
  0x63   : > { %1045 = vmatpush1.bf16.msra.mxu1 %v1996_v53 }
  0x64   : > { %1890 = vmatprep.subr.msk.bf16.mxu1 %vm353_vm0, %v2002_v55 }
  0x66   : > { %1812 = vmatmul.mubr.msk.bf16.gmra.mxu1 %vm346_vm2, %v2169_v12  ;;  %1877 = vmatmul.mubr.msk.bf16.vlgmr.msra.gmra.mxu0 %vm346_vm2, %v2169_v12 }
  0x67   : > { %990 = vmatpush1.bf16.msra.mxu0 %v957_v56  ;;  %1009 = vmatprep.mubr.bf16.mxu0 %v2079_v0 }
  0x68   : > { %991 = vmatprep.subr.bf16.mxu0 %v1995_v57  ;;  %1062 = vmatprep.mubr.bf16.mxu1 %v2079_v0 }
  0x6b   : > { %992 = vmatpush1.bf16.msra.mxu0 %v1993_v58 }
  0x6c   : > { %1835 = vmatprep.subr.msk.bf16.mxu0 %vm353_vm0, %v1999_v61 }
  0x6e   : > { %1830 = vmatmul.mubr.msk.bf16.vlgmr.msra.gmra.mxu0 %vm346_vm2, %v884_v63  ;;  %1833 = vmatmul.mubr.msk.bf16.vlgmr.msra.gmra.mxu1 %vm346_vm2, %v884_v63 }
  0x6f   : > { %1096 = vmatpush1.bf16.msra.mxu0 %v969_v1  ;;  %1881 = vmatpush3.bf16.msra.mxu1 %v975_v2 }
  0x70   : > { %1019 = vmatprep.mubr.bf16.mxu0 %v2079_v0  ;;  %1072 = vmatprep.mubr.bf16.mxu1 %v2079_v0 }
  0x71   : > { %1097 = vmatprep.subr.bf16.mxu0 %v2005_v3  ;;  %1882 = vmatprep.subr.bf16.mxu1 %v2006_v4 }
  0x73   : > { %1098 = vmatpush1.bf16.msra.mxu0 %v2003_v5  ;;  %1883 = vmatpush3.bf16.msra.mxu1 %v2006_v4 }
  0x76   : > { %1831 = vmatmul.mubr.msk.bf16.gmra.mxu0 %vm346_vm2, %v883_v60  ;;  %1834 = vmatmul.mubr.msk.bf16.gmra.mxu1 %vm346_vm2, %v883_v60 }
  0x77   : > { %1115 = vmatprep.mubr.bf16.mxu0 %v2079_v0  ;;  %1884 = vmatprep.mubr.msk.bf16.mxu1 %vm346_vm2, %v884_v63 }
  0x7e   : > { %1836 = vmatmul.mubr.msk.bf16.vlgmr.msra.gmra.mxu0 %vm346_vm2, %v884_v63  ;;  %1885 = vmatmul.mubr.msk.bf16.vlgmr.msra.gmra.mxu1 %vm346_vm2, %v883_v60 }
  0x7f   : > { %1125 = vmatprep.mubr.bf16.mxu0 %v2079_v0 }
  0x86   : > { %1837 = vmatmul.mubr.msk.bf16.gmra.mxu0 %vm346_vm2, %v883_v60 }
  0xf6   : > { %v409_v6 = vpop.f32.mrf.mxu0  ;;  %v462_v7 = vpop.f32.mrf.mxu1 }
  0xf8   : > { %v411_v8 = vpop.f32.mrf.mxu0  ;;  %v2246_v9 = vpop.f32.mrf.mxu1 }
  0xfa   : > { %v413_v10 = vpop.f32.mrf.mxu0  ;;  %v466_v11 = vpop.f32.mrf.mxu1 }
  0xfc   : > { %v415_v12 = vpop.f32.mrf.mxu0  ;;  %v2248_v13 = vpop.f32.mrf.mxu1 }
  0xfe   : > { %v419_v14 = vpop.f32.mrf.mxu0  ;;  %v472_v15 = vpop.f32.mrf.mxu1 }
 0x100   : > { %v421_v16 = vpop.f32.mrf.mxu0  ;;  %v2250_v17 = vpop.f32.mrf.mxu1 }
 0x102   : > { %v423_v18 = vpop.f32.mrf.mxu0  ;;  %v476_v19 = vpop.f32.mrf.mxu1 }
 0x104   : > { %v425_v0 = vpop.f32.mrf.mxu0  ;;  %v2252_v20 = vpop.f32.mrf.mxu1 }
 0x106   : > { %v2254_v21 = vpop.f32.mrf.mxu0  ;;  %v2256_v22 = vpop.f32.mrf.mxu1 }
 0x108   : > { %v2258_v23 = vpop.f32.mrf.mxu0  ;;  %v2260_v24 = vpop.f32.mrf.mxu1 }
 0x10a   : > { %v2262_v25 = vpop.f32.mrf.mxu0  ;;  %v2264_v26 = vpop.f32.mrf.mxu1 }
 0x10c   : > { %v2266_v27 = vpop.f32.mrf.mxu0  ;;  %v2268_v28 = vpop.f32.mrf.mxu1 }
 0x10e   : > { %v2270_v29 = vpop.f32.mrf.mxu0  ;;  %v707_v30 = vpop.f32.mrf.mxu1 }
 0x10f   : > { %v708_v31 = vadd.f32 %v707_v30, %v409_v6 }
 0x110   : > { %v2272_v32 = vpop.f32.mrf.mxu0  ;;  %v709_v33 = vpop.f32.mrf.mxu1 }
 0x111   : > { %v710_v34 = vadd.f32 %v709_v33, %v411_v8 }
 0x112   : > { %v2274_v35 = vpop.f32.mrf.mxu0  ;;  %v711_v36 = vpop.f32.mrf.mxu1 }
 0x113   : > { %v712_v37 = vadd.f32 %v711_v36, %v413_v10 }
 0x114   : > { %v2276_v38 = vpop.f32.mrf.mxu0  ;;  %v713_v39 = vpop.f32.mrf.mxu1 }
 0x115   : > { %v714_v40 = vadd.f32 %v713_v39, %v415_v12 }
 0x116   : > { %v717_v41 = vpop.f32.mrf.mxu1  ;;  %v760_v42 = vpop.f32.mrf.mxu0 }
 0x117   : > { %v718_v43 = vadd.f32 %v717_v41, %v419_v14  ;;  %v761_v44 = vadd.f32 %v760_v42, %v462_v7 }
 0x118   : > { %v719_v45 = vpop.f32.mrf.mxu1  ;;  %v762_v46 = vpop.f32.mrf.mxu0 }
 0x119   : > { %v720_v47 = vadd.f32 %v719_v45, %v421_v16  ;;  %v763_v14 = vadd.f32 %v762_v46, %v2246_v9 }
 0x11a   : > { %v721_v48 = vpop.f32.mrf.mxu1  ;;  %v764_v49 = vpop.f32.mrf.mxu0 }
 0x11b   : > { %v722_v50 = vadd.f32 %v721_v48, %v423_v18  ;;  %v765_v51 = vadd.f32 %v764_v49, %v466_v11 }
 0x11c   : > { %v723_v52 = vpop.f32.mrf.mxu1  ;;  %v766_v53 = vpop.f32.mrf.mxu0 }
 0x11d   : > { %v724_v54 = vadd.f32 %v723_v52, %v425_v0  ;;  %v767_v39 = vadd.f32 %v766_v53, %v2248_v13 }
 0x11e   : > { %v770_v55 = vpop.f32.mrf.mxu0  ;;  %v813_v56 = vpop.f32.mrf.mxu1 }
 0x11f   : > { %v771_v57 = vadd.f32 %v770_v55, %v472_v15 }
 0x120   : > { %v772_v58 = vpop.f32.mrf.mxu0  ;;  %v815_v59 = vpop.f32.mrf.mxu1 }
 0x121   : > { %v773_v48 = vadd.f32 %v772_v58, %v2250_v17 }
 0x122   : > { %v774_v60 = vpop.f32.mrf.mxu0  ;;  %v2278_v61 = vpop.f32.mrf.mxu1 }
 0x123   : > { %v775_v62 = vadd.f32 %v774_v60, %v476_v19 }
 0x124   : > { %v2280_v63 = vpop.f32.mrf.mxu0  ;;  %v2282_v1 = vpop.f32.mrf.mxu1 }
 0x126   : > { %v2284_v2 = vpop.f32.mrf.mxu1  ;;  %v1878_v3 = vpop.f32.mrf.mxu0 }
 0x128   : > { %v2286_v4 = vpop.f32.mrf.mxu1  ;;  %v866_v5 = vpop.f32.mrf.mxu0 }
 0x12a   : > { %v2288_v6 = vpop.f32.mrf.mxu1  ;;  %v2290_v7 = vpop.f32.mrf.mxu0 }
 0x12c   : > { %v2292_v8 = vpop.f32.mrf.mxu1  ;;  %v2294_v10 = vpop.f32.mrf.mxu0 }
 0x12e   : > { %v1011_v11 = vpop.f32.mrf.mxu0  ;;  %v1064_v12 = vpop.f32.mrf.mxu1 }
 0x12f   : > { %v2297_v15 = vadd.f32 %v1011_v11, %v708_v31  ;;  %v2299_v16 = vadd.f32 %v1064_v12, %v761_v44 }
 0x130   : > { %v1013_v18 = vpop.f32.mrf.mxu0  ;;  %v1066_v19 = vpop.f32.mrf.mxu1 }
 0x131   : > { %v2301_v0 = vadd.f32 %v1013_v18, %v710_v34  ;;  %v2303_v30 = vadd.f32 %v1066_v19, %v763_v14  ;;  %v816_v14 = vadd.f32 %v815_v59, %v2258_v23 }
 0x132   : > { %v1015_v33 = vpop.f32.mrf.mxu0  ;;  %v1068_v36 = vpop.f32.mrf.mxu1 }
 0x133   : > { %v2306_v41 = vadd.f32 %v1015_v33, %v712_v37  ;;  %v2308_v42 = vadd.f32 %v1068_v36, %v765_v51  ;;  %1229 = vrot.lane.b32.xlu1 %v2303_v30, %s2080_s5 }
 0x134   : > { %v1017_v9 = vpop.f32.mrf.mxu0  ;;  %v1070_v31 = vpop.f32.mrf.mxu1 }
 0x135   : > { %v2312_v44 = vadd.f32 %v1017_v9, %v714_v40  ;;  %v2314_v34 = vadd.f32 %v1070_v31, %v767_v39  ;;  %v867_v39 = vadd.f32 %v866_v5, %v2260_v24  ;;  %v878_v24 = vadd.f32 %v2290_v7, %v2264_v26 }
 0x136   : > { %v1021_v45 = vpop.f32.mrf.mxu0  ;;  %v1074_v46 = vpop.f32.mrf.mxu1  ;;  %v830_v26 = vadd.f32 %v2292_v8, %v2276_v38 }
 0x137   : > { %v2317_v49 = vadd.f32 %v1021_v45, %v718_v43  ;;  %v2319_v13 = vadd.f32 %v1074_v46, %v771_v57  ;;  %1237 = vrot.lane.b32.xlu0 %v2314_v34, %s2080_s5  ;;  %v814_v57 = vadd.f32 %v813_v56, %v2254_v21 }
 0x138   : > { %v1023_v37 = vpop.f32.mrf.mxu0  ;;  %v1076_v51 = vpop.f32.mrf.mxu1 }
 0x139   : > { %v2323_v52 = vadd.f32 %v1023_v37, %v720_v47  ;;  %v2325_v53 = vadd.f32 %v1076_v51, %v773_v48  ;;  %v777_v37 = vadd.f32 %v2280_v63, %v2252_v20 }
 0x13a   : > { %v1025_v40 = vpop.f32.mrf.mxu0  ;;  %v1078_v55 = vpop.f32.mrf.mxu1 }
 0x13b   : > { %v2327_v60 = vadd.f32 %v1025_v40, %v722_v50  ;;  %v2329_v11 = vadd.f32 %v1078_v55, %v775_v62  ;;  %1245 = vrot.lane.b32.xlu0 %v2325_v53, %s2080_s5  ;;  %v875_v50 = vadd.f32 %v1878_v3, %v2256_v22  ;;  %v820_v22 = vadd.f32 %v2282_v1, %v2266_v27 }
 0x13c   : > { %v1027_v17 = vpop.f32.mrf.mxu0  ;;  %v1080_v43 = vpop.f32.mrf.mxu1  ;;  %v870_v27 = vadd.f32 %v2294_v10, %v2268_v28  ;;  %v828_v10 = vadd.f32 %v2288_v6, %v2274_v35 }
 0x13d   : > { %v2334_v58 = vadd.f32 %v1027_v17, %v724_v54  ;;  %v818_v54 = vadd.f32 %v2278_v61, %v2262_v25  ;;  %v826_v25 = vadd.f32 %v2286_v4, %v2272_v32  ;;  %v824_v32 = vadd.f32 %v2284_v2, %v2270_v29 }
 0x13e   : > { %v1117_v12 = vpop.f32.mrf.mxu0  ;;  %v1886_v47 = vpop.f32.mrf.mxu1  ;;  %v2367_v51 = vadd.f32 %v1080_v43, %v777_v37  ;;  %v1537_v2 = vlaneseq  ;;  %v250_v43 = vld [vmem:[#allocation4] sm:$0xf] }
 0x13f   : > { %v1189_v18 = vadd.f32 %v1117_v12, %v814_v57  ;;  %v1205_v9 = vadd.f32 %v1886_v47, %v875_v50 }
 0x140   : > { %v1119_v19 = vpop.f32.mrf.mxu0  ;;  %v1170_v62 = vpop.f32.mrf.mxu1  ;;  %v1538_v20 = vshrl.u32 %v1537_v2, 7 }
 0x141   : > { %v1190_v33 = vadd.f32 %v1119_v19, %v816_v14  ;;  %1231 = vrot.lane.b32.xlu1 %v1189_v18, %s2080_s5  ;;  %v1191_v56 = vadd.f32 %v1170_v62, %v867_v39 }
 0x142   : > { %v1121_v36 = vpop.f32.mrf.mxu0  ;;  %v1887_v3 = vpop.f32.mrf.mxu1  ;;  %v1551_v6 = vsub.s32 3, %v1538_v20  ;;  %v1547_v57 = vsub.s32 2, %v1538_v20  ;;  %v1539_v12 = vsub.s32 0, %v1538_v20  ;;  %v1543_v14 = vsub.s32 1, %v1538_v20 }
 0x143   : > { %1233 = vrot.lane.b32.xlu0 %v1190_v33, %s2080_s5  ;;  %v1196_v59 = vadd.f32 %v1121_v36, %v818_v54  ;;  %v1212_v61 = vadd.f32 %v1887_v3, %v878_v24 }
 0x144   : > { %v1123_v21 = vpop.f32.mrf.mxu0  ;;  %v1173_v46 = vpop.f32.mrf.mxu1  ;;  %v2383_v62 = vrot.slane %v250_v43, %v1551_v6 }
 0x145   : > { %1251 = vrot.lane.b32.xlu1 %v1205_v9, %s2080_s5  ;;  %v1197_v5 = vadd.f32 %v1123_v21, %v820_v22  ;;  %v1198_v7 = vadd.f32 %v1173_v46, %v870_v27  ;;  %v2387_v9 = vrot.slane %v250_v43, %v1547_v57  ;;  %v2389_v21 = vrot.slane %v250_v43, %v1539_v12 }
 0x146   : > { %v1127_v23 = vpop.f32.mrf.mxu0 }
 0x147   : > { %1235 = vrot.lane.b32.xlu0 %v1191_v56, %s2080_s5  ;;  %v1203_v28 = vadd.f32 %v1127_v23, %v824_v32  ;;  %v2393_v23 = vrot.slane %v250_v43, %v1543_v14 }
 0x148   : > { %v1129_v31 = vpop.f32.mrf.mxu0 }
 0x149   : > { %1239 = vrot.lane.b32.xlu1 %v1196_v59, %s2080_s5  ;;  %v1204_v1 = vadd.f32 %v1129_v31, %v826_v25 }
 0x14a   : > { %v1131_v45 = vpop.f32.mrf.mxu0 }
 0x14b   : > { %1241 = vrot.lane.b32.xlu0 %v1197_v5, %s2080_s5  ;;  %v1210_v38 = vadd.f32 %v1131_v45, %v828_v10 }
 0x14c   : > { %v1133_v48 = vpop.f32.mrf.mxu0 }
 0x14d   : > { %1259 = vrot.lane.b32.xlu1 %v1212_v61, %s2080_s5  ;;  %v1211_v4 = vadd.f32 %v1133_v48, %v830_v26 }
 0x14f   : > { %1249 = vrot.lane.b32.xlu0 %v1204_v1, %s2080_s5 }
 0x151   : > { %1243 = vrot.lane.b32.xlu1 %v1198_v7, %s2080_s5 }
 0x153   : > { %1257 = vrot.lane.b32.xlu0 %v1211_v4, %s2080_s5 }
 0x155   : > { %1247 = vrot.lane.b32.xlu1 %v1203_v28, %s2080_s5 }
 0x157   : > { %1253 = vrot.lane.b32.xlu0 %v2367_v51, %s2080_s5 }
 0x159   : > { %1255 = vrot.lane.b32.xlu1 %v1210_v38, %s2080_s5 }
 0x1a5   : > { %v1230_v8 = vpop.permute.xlu1 %1229 }
 0x1a9   : > { %v1238_v29 = vpop.permute.xlu0 %1237 }
 0x1ad   : > { %v2373_v63 = vpop.permute.xlu0 %1245 }
 0x1b3   : > { %v1232_v40 = vpop.permute.xlu1 %1231 }
 0x1b4   : > { %v1262_v35 = vsel %vm1261_vm3, %v1230_v8, %v1232_v40 }
 0x1b5   : > { %v1290_v55 = vmax.f32 %v2297_v15, %v1262_v35  ;;  %v1234_v17 = vpop.permute.xlu0 %1233 }
 0x1b6   : > { %v1263_v47 = vsel %vm1261_vm3, %v1232_v40, %v1234_v17 }
 0x1b7   : > { %v1310_v18 = vrot.slane %v1290_v55, 1  ;;  %v1291_v19 = vmax.f32 %v2301_v0, %v1263_v47  ;;  %v2379_v50 = vpop.permute.xlu1 %1251 }
 0x1b8   : > { %v1301_v33 = vmax.f32 %v2325_v53, %v2379_v50 }
 0x1b9   : > { %v2385_v15 = vmax.f32 %v1290_v55, %v1310_v18  ;;  %v1311_v36 = vrot.slane %v1291_v19, 1  ;;  %v1236_v39 = vpop.permute.xlu0 %1235 }
 0x1ba   : > { %v1345_v54 = vrot.slane %v1301_v33, 1  ;;  %v1264_v0 = vsel %vm1261_vm3, %v1234_v17, %v1236_v39  ;;  %v1293_v56 = vmax.f32 %v2303_v30, %v1236_v39 }
 0x1bb   : > { %v1374_v22 = vrot.slane %v2385_v15, 1  ;;  %v1382_v53 = vrot.slane %v2385_v15, 2  ;;  %v1390_v59 = vrot.slane %v2385_v15, 3  ;;  %v2398_v3 = vmax.f32 %v1291_v19, %v1311_v36  ;;  %v1240_v31 = vpop.permute.xlu1 %1239 }
 0x1bc   : > { %v2400_v24 = vmax.f32 %v1301_v33, %v1345_v54  ;;  %v1292_v5 = vmax.f32 %v2299_v16, %v1264_v0  ;;  %v1313_v45 = vrot.slane %v1293_v56, 1  ;;  %v1265_v25 = vsel %vm1261_vm3, %v1238_v29, %v1240_v31 }
 0x1bd   : > { %v1483_v30 = vsel %vm1482_vm4, %v2385_v15, %v1374_v22  ;;  %v1375_v61 = vrot.slane %v2398_v3, 1  ;;  %v1383_v46 = vrot.slane %v2398_v3, 2  ;;  %v1391_v27 = vrot.slane %v2398_v3, 3  ;;  %v1242_v1 = vpop.permute.xlu0 %1241 }
 0x1be   : > { %v2410_v48 = vsel %vm1487_vm5, %v1483_v30, %v1382_v53  ;;  %v1441_v26 = vrot.slane %v2400_v24, 1  ;;  %v1449_v16 = vrot.slane %v2400_v24, 2  ;;  %v1457_v7 = vrot.slane %v2400_v24, 3 }
 0x1bf   : > { %v1484_v32 = vsel %vm1482_vm4, %v2398_v3, %v1375_v61  ;;  %v1312_v4 = vrot.slane %v1292_v5, 1  ;;  %v1321_v37 = vmax.f32 %v1293_v56, %v1313_v45  ;;  %v1294_v28 = vmax.f32 %v2306_v41, %v1265_v25  ;;  %v1260_v10 = vpop.permute.xlu1 %1259 }
 0x1c0   : > { %v2419_v38 = vsel %vm1487_vm5, %v1484_v32, %v1383_v46  ;;  %v1519_v29 = vsel %vm1482_vm4, %v2400_v24, %v1441_v26  ;;  %v1266_v2 = vsel %vm1261_vm3, %v1240_v31, %v1242_v1  ;;  %v1305_v8 = vmax.f32 %v2367_v51, %v1260_v10 }
 0x1c1   : > { %v1523_v20 = vsel %vm1487_vm5, %v1519_v29, %v1449_v16  ;;  %v2426_v40 = vmax.f32 %v1292_v5, %v1312_v4  ;;  %v1377_v35 = vrot.slane %v1321_v37, 1  ;;  %v1385_v6 = vrot.slane %v1321_v37, 2  ;;  %v1250_v55 = vpop.permute.xlu0 %1249 }
 0x1c2   : > { %v1393_v17 = vrot.slane %v1321_v37, 3  ;;  %v1326_v41 = vrot.slane %v1294_v28, 1  ;;  %v1295_v43 = vmax.f32 %v2312_v44, %v1266_v2  ;;  %v1361_v57 = vrot.slane %v1305_v8, 1 }
 0x1c3   : > { %v1376_v12 = vrot.slane %v2426_v40, 1  ;;  %v1384_v47 = vrot.slane %v2426_v40, 2  ;;  %v1392_v14 = vrot.slane %v2426_v40, 3  ;;  %v1486_v51 = vsel %vm1482_vm4, %v1321_v37, %v1377_v35  ;;  %v1244_v18 = vpop.permute.xlu1 %1243 }
 0x1c4   : > { %v1491_v19 = vsel %vm1487_vm5, %v1486_v51, %v1385_v6  ;;  %v2434_v33 = vmax.f32 %v1294_v28, %v1326_v41  ;;  %v1327_v36 = vrot.slane %v1295_v43, 1  ;;  %v2436_v39 = vmax.f32 %v1305_v8, %v1361_v57 }
 0x1c5   : > { %v1485_v44 = vsel %vm1482_vm4, %v2426_v40, %v1376_v12  ;;  %v2441_v54 = vsel %vm1492_vm6, %v1491_v19, %v1393_v17  ;;  %v1270_v0 = vsel %vm1261_vm3, %v1250_v55, %v2379_v50  ;;  %v1267_v56 = vsel %vm1261_vm3, %v1242_v1, %v1244_v18  ;;  %v1258_v22 = vpop.permute.xlu0 %1257 }
 0x1c6   : > { %v2447_v53 = vsel %vm1487_vm5, %v1485_v44, %v1384_v47  ;;  %v1402_v31 = vrot.slane %v2434_v33, 4  ;;  %v1410_v24 = vrot.slane %v2434_v33, 5  ;;  %v1418_v5 = vrot.slane %v2434_v33, 6 }
 0x1c7   : > { %v2452_v45 = vmax.f32 %v1295_v43, %v1327_v36  ;;  %v1469_v25 = vrot.slane %v2436_v39, 4  ;;  %v1477_v30 = vrot.slane %v2436_v39, 5  ;;  %v1300_v50 = vmax.f32 %v2319_v13, %v1270_v0  ;;  %v1248_v61 = vpop.permute.xlu1 %1247 }
 0x1c8   : > { %v1296_v46 = vmax.f32 %v2308_v42, %v1267_v56  ;;  %v1297_v1 = vmax.f32 %v2314_v34, %v1244_v18  ;;  %v1273_v26 = vsel %vm1261_vm3, %v1258_v22, %v1260_v10  ;;  %v1268_v16 = vsel %vm1261_vm3, %v2373_v63, %v1248_v61 }
 0x1c9   : > { %v1403_v32 = vrot.slane %v2452_v45, 4  ;;  %v1411_v4 = vrot.slane %v2452_v45, 5  ;;  %v1419_v37 = vrot.slane %v2452_v45, 6  ;;  %v1344_v28 = vrot.slane %v1300_v50, 1  ;;  %v1254_v63 = vpop.permute.xlu0 %1253 }
 0x1ca   : > { %v1328_v29 = vrot.slane %v1296_v46, 1  ;;  %v1329_v13 = vrot.slane %v1297_v1, 1  ;;  %v1304_v2 = vmax.f32 %v2329_v11, %v1273_v26  ;;  %v1269_v42 = vsel %vm1261_vm3, %v1248_v61, %v1250_v55 }
 0x1cb   : > { %v1352_v34 = vmax.f32 %v1300_v50, %v1344_v28  ;;  %v1298_v10 = vmax.f32 %v2317_v49, %v1268_v16  ;;  %v1299_v8 = vmax.f32 %v2323_v52, %v1269_v42  ;;  %v1256_v35 = vpop.permute.xlu1 %1255  ;;  %v1527_v6 = vsel %vm1492_vm6, %v1523_v20, %v1457_v7 }
 0x1cc   : > { %v2470_v17 = vmax.f32 %v1296_v46, %v1328_v29  ;;  %v2472_v41 = vmax.f32 %v1297_v1, %v1329_v13  ;;  %v1360_v43 = vrot.slane %v1304_v2, 1  ;;  %v1271_v57 = vsel %vm1261_vm3, %v1254_v63, %v1256_v35 }
 0x1cd   : > { %v1440_v11 = vrot.slane %v1352_v34, 1  ;;  %v1448_v12 = vrot.slane %v1352_v34, 2  ;;  %v1456_v55 = vrot.slane %v1352_v34, 3  ;;  %v1342_v47 = vrot.slane %v1298_v10, 1 }
 0x1ce   : > { %v1404_v49 = vrot.slane %v2470_v17, 4  ;;  %v1405_v52 = vrot.slane %v2472_v41, 4  ;;  %v1412_v51 = vrot.slane %v2470_v17, 5  ;;  %v1413_v7 = vrot.slane %v2472_v41, 5 }
 0x1cf   : > { %v1518_v20 = vsel %vm1482_vm4, %v1352_v34, %v1440_v11  ;;  %v1420_v18 = vrot.slane %v2470_v17, 6  ;;  %v1421_v19 = vrot.slane %v2472_v41, 6  ;;  %v1429_v36 = vrot.slane %v2472_v41, 7 }
 0x1d0   : > { %v1368_v44 = vmax.f32 %v1304_v2, %v1360_v43  ;;  %v1343_v0 = vrot.slane %v1299_v8, 1  ;;  %v2483_v56 = vmax.f32 %v1298_v10, %v1342_v47  ;;  %v1272_v50 = vsel %vm1261_vm3, %v1256_v35, %v1258_v22 }
 0x1d1   : > { %v1302_v61 = vmax.f32 %v2327_v60, %v1271_v57  ;;  %v1303_v46 = vmax.f32 %v2334_v58, %v1272_v50  ;;  %v1522_v1 = vsel %vm1487_vm5, %v1518_v20, %v1448_v12  ;;  %v1531_v26 = vsel %vm1497_vm7, %v1527_v6, %v1469_v25 }
 0x1d2   : > { %v1468_v16 = vrot.slane %v1368_v44, 4  ;;  %v1476_v28 = vrot.slane %v1368_v44, 5  ;;  %v1351_v29 = vmax.f32 %v1299_v8, %v1343_v0  ;;  %v1438_v13 = vrot.slane %v2483_v56, 1 }
 0x1d3   : > { %v1446_v2 = vrot.slane %v2483_v56, 2  ;;  %v1454_v42 = vrot.slane %v2483_v56, 3  ;;  %v1358_v34 = vrot.slane %v1302_v61, 1  ;;  %v1359_v22 = vrot.slane %v1303_v46, 1 }
 0x1d4   : > { %v1439_v10 = vrot.slane %v1351_v29, 1  ;;  %v1447_v60 = vrot.slane %v1351_v29, 2  ;;  %v1455_v63 = vrot.slane %v1351_v29, 3  ;;  %v1516_v58 = vsel %vm1482_vm4, %v2483_v56, %v1438_v13 }
 0x1d5   : > { %v1366_v35 = vmax.f32 %v1302_v61, %v1358_v34  ;;  %v1367_v25 = vmax.f32 %v1303_v46, %v1359_v22  ;;  %v1526_v6 = vsel %vm1492_vm6, %v1522_v1, %v1456_v55  ;;  %v1535_v8 = vsel %vm1502_vm8, %v1531_v26, %v1477_v30 }
 0x1d6   : > { %v1517_v41 = vsel %vm1482_vm4, %v1351_v29, %v1439_v10  ;;  %v1530_v43 = vsel %vm1497_vm7, %v1526_v6, %v1468_v16  ;;  %v1564_v57 = vadd.f32 %v2383_v62, %v1535_v8  ;;  %v1428_v11 = vrot.slane %v2470_v17, 7 }
 0x1d7   : > { %v1466_v12 = vrot.slane %v1366_v35, 4  ;;  %v1467_v47 = vrot.slane %v1367_v25, 4  ;;  %v1474_v20 = vrot.slane %v1366_v35, 5  ;;  %v1475_v44 = vrot.slane %v1367_v25, 5 }
 0x1d8   : > { %v1534_v0 = vsel %vm1502_vm8, %v1530_v43, %v1476_v28  ;;  %v1572_v56 = vmax.f32 %v1564_v57, 0.0  ;;  %v1495_v39 = vsel %vm1492_vm6, %v2447_v53, %v1392_v14  ;;  %v1501_v30 = vsel %vm1497_vm7, %v2441_v54, %v1405_v52 }
 0x1d9   : > { %v1563_v55 = vadd.f32 %v2387_v9, %v1534_v0  ;;  %v1500_v50 = vsel %vm1497_vm7, %v1495_v39, %v1404_v49  ;;  %v1506_v17 = vsel %vm1502_vm8, %v1501_v30, %v1413_v7  ;;  %v1426_v61 = vrot.slane %v2434_v33, 7 }
 0x1da   : > { %v1505_v46 = vsel %vm1502_vm8, %v1500_v50, %v1412_v51  ;;  %v1511_v1 = vsel %vm1507_vm9, %v1506_v17, %v1421_v19  ;;  %v1427_v40 = vrot.slane %v2452_v45, 7  ;;  %v1493_v14 = vsel %vm1492_vm6, %v2410_v48, %v1390_v59 }
 0x1db   : > { %v1571_v54 = vmax.f32 %v1563_v55, 0.0  ;;  %v1510_v53 = vsel %vm1507_vm9, %v1505_v46, %v1420_v18  ;;  %v1515_v49 = vsel %vm353_vm0, %v1511_v1, %v1429_v36  ;;  %v1494_v52 = vsel %vm1492_vm6, %v2419_v38, %v1391_v27 }
 0x1dc   : > { %v1514_v51 = vsel %vm353_vm0, %v1510_v53, %v1428_v11  ;;  %v1560_v7 = vadd.f32 %v2383_v62, %v1515_v49  ;;  %v1498_v15 = vsel %vm1497_vm7, %v1493_v14, %v1402_v31  ;;  %v1499_v59 = vsel %vm1497_vm7, %v1494_v52, %v1403_v32 }
 0x1dd   : > { %v1930_v48 = vpack.i.bf16 %v1572_v56, %v1571_v54  ;;  %v1559_v18 = vadd.f32 %v2387_v9, %v1514_v51  ;;  %v1503_v3 = vsel %vm1502_vm8, %v1498_v15, %v1410_v24  ;;  %v1504_v27 = vsel %vm1502_vm8, %v1499_v59, %v1411_v4 }
 0x1de   : > { %v1568_v62 = vmax.f32 %v1560_v7, 0.0  ;;  %v1508_v38 = vsel %vm1507_vm9, %v1503_v3, %v1418_v5  ;;  %v1509_v31 = vsel %vm1507_vm9, %v1504_v27, %v1419_v37  ;;  %v1520_v32 = vsel %vm1487_vm5, %v1516_v58, %v1446_v2 }
 0x1df   : > { %1931 = vrot.lane.b32.xlu1 %v1930_v48, %s2081_s6  ;;  %v1567_v9 = vmax.f32 %v1559_v18, 0.0  ;;  %v1512_v24 = vsel %vm353_vm0, %v1508_v38, %v1426_v61  ;;  %v1513_v19 = vsel %vm353_vm0, %v1509_v31, %v1427_v40  ;;  %v1521_v4 = vsel %vm1487_vm5, %v1517_v41, %v1447_v60 }
 0x1e0   : > { %v1557_v36 = vadd.f32 %v2389_v21, %v1512_v24  ;;  %v1558_v33 = vadd.f32 %v2393_v23, %v1513_v19  ;;  %v1524_v5 = vsel %vm1492_vm6, %v1520_v32, %v1454_v42  ;;  %v1525_v45 = vsel %vm1492_vm6, %v1521_v4, %v1455_v63 }
 0x1e1   : > { %v1925_v37 = vpack.i.bf16 %v1568_v62, %v1567_v9  ;;  %v1528_v26 = vsel %vm1497_vm7, %v1524_v5, %v1466_v12  ;;  %v1529_v16 = vsel %vm1497_vm7, %v1525_v45, %v1467_v47 }
 0x1e2   : > { %v1565_v28 = vmax.f32 %v1557_v36, 0.0  ;;  %v1566_v29 = vmax.f32 %v1558_v33, 0.0  ;;  %v1532_v13 = vsel %vm1502_vm8, %v1528_v26, %v1474_v20  ;;  %v1533_v2 = vsel %vm1502_vm8, %v1529_v16, %v1475_v44 }
 0x1e3   : > { %1926 = vrot.lane.b32.xlu0 %v1925_v37, %s2081_s6  ;;  %v1561_v34 = vadd.f32 %v2389_v21, %v1532_v13  ;;  %v1562_v22 = vadd.f32 %v2393_v23, %v1533_v2 }
 0x1e4   : > { %v1935_v10 = vpack.i.bf16 %v1566_v29, %v1565_v28 }
 0x1e5   : > { %v1569_v42 = vmax.f32 %v1561_v34, 0.0  ;;  %v1570_v60 = vmax.f32 %v1562_v22, 0.0 }
 0x1e7   : > { %1936 = vrot.lane.b32.xlu0 %v1935_v10, %s2081_s6  ;;  %v1940_v63 = vpack.i.bf16 %v1570_v60, %v1569_v42 }
 0x1e9   : > { %1941 = vrot.lane.b32.xlu1 %v1940_v63, %s2081_s6 }
 0x251   : > { %v1932_v58 = vpop.permute.xlu1 %1931 }
 0x252   : > { %v1934_v35 = vunpack.i.h.bf16 %v1932_v58  ;;  %v1933_v25 = vunpack.i.l.bf16 %v1932_v58 }
 0x254   : > { %v1603_v8 = vsel %vm1597_vm10, %v1933_v25, %v1934_v35 }
 0x255   : > { %v1927_v6 = vpop.permute.xlu0 %1926  ;;  %v1612_v23 = vsel %vm1610_vm11, %v1603_v8, 0.0 }
 0x256   : > { %v1929_v41 = vunpack.i.h.bf16 %v1927_v6  ;;  %v1928_v43 = vunpack.i.l.bf16 %v1927_v6  ;;  %v1627_v44 = vrot.slane %v1612_v23, 7 }
 0x258   : > { %v1600_v21 = vsel %vm1597_vm10, %v1928_v43, %v1929_v41 }
 0x259   : > { %v1611_v57 = vsel %vm1610_vm11, %v1600_v21, 0.0  ;;  %v1937_v11 = vpop.permute.xlu0 %1936 }
 0x25a   : > { %v1939_v12 = vunpack.i.h.bf16 %v1937_v11  ;;  %v1938_v47 = vunpack.i.l.bf16 %v1937_v11  ;;  %v1620_v20 = vrot.slane %v1611_v57, 7 }
 0x25b   : > { %v1942_v0 = vpop.permute.xlu1 %1941 }
 0x25c   : > { %v1599_v56 = vsel %vm1597_vm10, %v1939_v12, %v1928_v43  ;;  %v1598_v39 = vsel %vm1597_vm10, %v1938_v47, %v1939_v12  ;;  %v1608_v55 = vsel %vm1597_vm10, 0.0, %v1938_v47  ;;  %v1944_v61 = vunpack.i.h.bf16 %v1942_v0 }
 0x25d   : > { %v1619_v30 = vrot.slane %v1599_v56, 7  ;;  %v1618_v50 = vrot.slane %v1598_v39, 7  ;;  %v1617_v17 = vrot.slane %v1608_v55, 7  ;;  %v1943_v46 = vunpack.i.l.bf16 %v1942_v0 }
 0x25e   : > { %v1628_v1 = vsel %vm1482_vm4, %v1620_v20, %v1627_v44  ;;  %v1640_v40 = vsel %vm1482_vm4, 0.0, %v1620_v20  ;;  %v1602_v52 = vsel %vm1597_vm10, %v1944_v61, %v1933_v25 }
 0x25f   : > { %v1639_v14 = vsel %vm1482_vm4, 0.0, %v1619_v30  ;;  %v1638_v54 = vsel %vm1482_vm4, 0.0, %v1618_v50  ;;  %v1637_v49 = vsel %vm1482_vm4, 0.0, %v1617_v17  ;;  %v1601_v51 = vsel %vm1597_vm10, %v1943_v46, %v1944_v61 }
 0x260   : > { %v1849_v53 = vpack.c.bf16 %v1640_v40, %v1639_v14  ;;  %v1848_v7 = vpack.c.bf16 %v1638_v54, %v1637_v49  ;;  %v1625_v15 = vrot.slane %v1602_v52, 7  ;;  %v1609_v59 = vsel %vm1597_vm10, 0.0, %v1943_v46 }
 0x261   : > { %v1623_v48 = vrot.slane %v1601_v51, 7  ;;  %v1621_v18 = vrot.slane %v1609_v59, 7  ;;  %v1644_v62 = vsel %vm353_vm0, %v1628_v1, 0.0 }
 0x262   : > { %1670 = vst [vmem:[%s198_s10 + $0x8] sm:$0xff] %v1849_v53  ;;  %1669 = vst [vmem:[%s198_s10] sm:$0xff] %v1848_v7  ;;  %v1626_v27 = vsel %vm1482_vm4, %v1619_v30, %v1625_v15 }
 0x263   : > { %v1624_v3 = vsel %vm1482_vm4, %v1618_v50, %v1623_v48  ;;  %v1622_v38 = vsel %vm1482_vm4, %v1617_v17, %v1621_v18  ;;  %v1643_v32 = vsel %vm353_vm0, %v1626_v27, 0.0 }
 0x264   : > { %v1642_v31 = vsel %vm353_vm0, %v1624_v3, 0.0  ;;  %v1641_v9 = vsel %vm353_vm0, %v1622_v38, 0.0  ;;  %v1851_v24 = vpack.c.bf16 %v1644_v62, %v1643_v32 }
 0x265   : > { %v1850_v19 = vpack.c.bf16 %v1642_v31, %v1641_v9 }
 0x266   : > { %1672 = vst [vmem:[%s198_s10 + $0x18] sm:$0xff] %v1851_v24 }
 0x267   : > { %1671 = vst [vmem:[%s198_s10 + $0x10] sm:$0xff] %v1850_v19 }
 0x268 PF: > { %s15_s12 = sadd.s32 1, %s2073_s12  }
 0x269   : > { %p12_p2 = scmp.ge.s32.totalorder %s15_s12, 4  }
 0x26b   :  { %14 = sbr.rel (!%p12_p2) target bundleno = 2 (0x2), region = 73 }
 0x270   :  { %1694 = vsyncpa [#allocation3], 1 }
 0x271   :  { %1696 = vsyncpa [#allocation3 + $0x1], 1 }
 0x272   :  { %1697 = vsyncpa [#allocation5], 1 }

// kernel: simple_cnn_forward.5
= control target key start
LH: loop header
LB: loop body
LE: loop exit
PB: predicated region body
PF: predicated region fallthrough
CT: control target
= control target key end

     0   :  { %v433_v27 = vlaneseq  ;;  %v3194_v35 = vmov 1966171168   ;;  %s3911_s0 = inlined_call_operand.vmem [shape: bf16[2,3136], index: 0, kind: input, shape index: {}]   ;;  %s3912_s1 = inlined_call_operand.vmem [shape: bf16[3136,128], index: 1, kind: input, shape index: {}]   ;;  %s3913_s2 = inlined_call_operand.vmem [shape: f32[1,128], index: 2, kind: input, shape index: {}]   ;;  %s3914_s3 = inlined_call_operand.vmem [shape: bf16[128,10], index: 3, kind: input, shape index: {}]   ;;  %s3915_s4 = inlined_call_operand.vmem [shape: f32[1,10], index: 4, kind: input, shape index: {}]   ;;  %s3916_s5 = inlined_call_operand.hbm [shape: f32[2,10], index: 5, kind: output, shape index: {}]  }
   0x1   :  { %v2965_v0 = vld [vmem:[%s3912_s1 + $0x78] sm:$0xff]   ;;  %v2969_v4 = vld [vmem:[%s3912_s1 + $0x70] sm:$0xff]   ;;  %v2973_v8 = vld [vmem:[%s3912_s1 + $0x68] sm:$0xff]   ;;  %v431_v36 = vunpack.c.l.s4 %v3194_v35 }
   0x2   :  { %v2966_v1 = vld [vmem:[%s3912_s1 + $0x38] sm:$0xff]   ;;  %2651 = vmatprep.subr.bf16.mxu0 %v2965_v0  ;;  %v2970_v5 = vld [vmem:[%s3912_s1 + $0x30] sm:$0xff]   ;;  %v2974_v9 = vld [vmem:[%s3912_s1 + $0x28] sm:$0xff]   ;;  %v434_v32 = vshrl.u32 %v433_v27, 7 }
   0x3   :  { %v2967_v2 = vld [vmem:[%s3912_s1 + $0xf8] sm:$0xff]   ;;  %2652 = vmatpush3.bf16.msra.mxu0 %v2966_v1  ;;  %v2971_v6 = vld [vmem:[%s3912_s1 + $0xf0] sm:$0xff]   ;;  %v2975_v10 = vld [vmem:[%s3912_s1 + $0xe8] sm:$0xff]   ;;  %v432_v39 = vunpack.c.0.s8 %v431_v36 }
   0x4   :  { %v2968_v3 = vld [vmem:[%s3912_s1 + $0xb8] sm:$0xff]   ;;  %2673 = vmatprep.subr.bf16.mxu1 %v2967_v2  ;;  %2653 = vmatprep.subr.bf16.mxu0 %v2969_v4  ;;  %v2972_v7 = vld [vmem:[%s3912_s1 + $0xb0] sm:$0xff]   ;;  %v2976_v11 = vld [vmem:[%s3912_s1 + $0xa8] sm:$0xff]  }
   0x5   :  { %2674 = vmatpush3.bf16.msra.mxu1 %v2968_v3  ;;  %v2977_v12 = vld [vmem:[%s3912_s1 + $0x60] sm:$0xff]   ;;  %v2981_v16 = vld [vmem:[%s3912_s1 + $0x58] sm:$0xff]   ;;  %v2985_v20 = vld [vmem:[%s3912_s1 + $0x50] sm:$0xff]   ;;  %v3333_v41 = vsub.s32 %v432_v39, %v434_v32 }
   0x6   :  { %2675 = vmatprep.subr.bf16.mxu1 %v2971_v6  ;;  %v2978_v13 = vld [vmem:[%s3912_s1 + $0x20] sm:$0xff]   ;;  %v2982_v17 = vld [vmem:[%s3912_s1 + $0x18] sm:$0xff]   ;;  %v2986_v21 = vld [vmem:[%s3912_s1 + $0x10] sm:$0xff]  }
   0x7   :  { %2654 = vmatpush3.bf16.msra.mxu0 %v2970_v5  ;;  %v2979_v14 = vld [vmem:[%s3912_s1 + $0xe0] sm:$0xff]   ;;  %v2983_v18 = vld [vmem:[%s3912_s1 + $0xd8] sm:$0xff]   ;;  %v2987_v22 = vld [vmem:[%s3912_s1 + $0xd0] sm:$0xff]  }
   0x8   :  { %2655 = vmatprep.subr.bf16.mxu0 %v2973_v8  ;;  %v2980_v15 = vld [vmem:[%s3912_s1 + $0xa0] sm:$0xff]   ;;  %v2984_v19 = vld [vmem:[%s3912_s1 + $0x98] sm:$0xff]   ;;  %v2988_v23 = vld [vmem:[%s3912_s1 + $0x90] sm:$0xff]  }
   0x9   :  { %2676 = vmatpush3.bf16.msra.mxu1 %v2972_v7  ;;  %v2989_v24 = vld [vmem:[%s3912_s1 + $0x48] sm:$0xff]   ;;  %v2993_v29 = vld [vmem:[%s3912_s1 + $0x40] sm:$0xff]   ;;  %v2998_v37 = vld [vmem:[%s3912_s1 + $0x178] sm:$0xff]  }
   0xa   :  { %2677 = vmatprep.subr.bf16.mxu1 %v2975_v10  ;;  %v2990_v25 = vld [vmem:[%s3912_s1 + $0x8] sm:$0xff]   ;;  %v2994_v30 = vld [vmem:[%s3912_s1] sm:$0xff]   ;;  %v3000_v40 = vld [vmem:[%s3912_s1 + $0x1f8] sm:$0xff]  }
   0xb   :  { %2656 = vmatpush3.bf16.msra.mxu0 %v2974_v9  ;;  %v2991_v26 = vld [vmem:[%s3912_s1 + $0xc8] sm:$0xff]   ;;  %v2995_v31 = vld [vmem:[%s3912_s1 + $0xc0] sm:$0xff]   ;;  %v2999_v48 = vld [vmem:[%s3912_s1 + $0x138] sm:$0xff]  }
   0xc   :  { %2657 = vmatprep.subr.bf16.mxu0 %v2977_v12  ;;  %v2992_v28 = vld [vmem:[%s3912_s1 + $0x88] sm:$0xff]   ;;  %v22_v33 = vld [vmem:[%s3911_s0] sm:$0xff]  ;;  %v3002_v51 = vld [vmem:[%s3912_s1 + $0x170] sm:$0xff]  }
   0xd   :  { %2678 = vmatpush3.bf16.msra.mxu1 %v2976_v11  ;;  %v2997_v34 = vld [vmem:[%s3912_s1 + $0x80] sm:$0xff]   ;;  %v429_v38 = vcombine.high %v22_v33, %v22_v33  ;;  %v436_v42 = vrot.slane %v22_v33, %v3333_v41  ;;  %v3001_v53 = vld [vmem:[%s3912_s1 + $0x1b8] sm:$0xff]   ;;  %v3004_v54 = vld [vmem:[%s3912_s1 + $0x1f0] sm:$0xff]  }
   0xe   :  { %2679 = vmatprep.subr.bf16.mxu1 %v2979_v14  ;;  %v3003_v56 = vld [vmem:[%s3912_s1 + $0x130] sm:$0xff]   ;;  %v3006_v57 = vld [vmem:[%s3912_s1 + $0x168] sm:$0xff]   ;;  %v3010_v61 = vld [vmem:[%s3912_s1 + $0x160] sm:$0xff]  }
   0xf   :  { %2658 = vmatpush3.bf16.msra.mxu0 %v2978_v13  ;;  %v3337_v43 = vrot.slane %v429_v38, %v3333_v41  ;;  %v444_v44 = vcombine.high %v436_v42, %v436_v42  ;;  %v452_v45 = vrot.slane %v436_v42, %v3333_v41  ;;  %v3005_v58 = vld [vmem:[%s3912_s1 + $0x1b0] sm:$0xff]   ;;  %v3008_v59 = vld [vmem:[%s3912_s1 + $0x1e8] sm:$0xff]   ;;  %v3012_v63 = vld [vmem:[%s3912_s1 + $0x1e0] sm:$0xff]  }
  0x10   :  { %2659 = vmatprep.subr.bf16.mxu0 %v2981_v16  ;;  %v3007_v60 = vld [vmem:[%s3912_s1 + $0x128] sm:$0xff]   ;;  %v3011_v0 = vld [vmem:[%s3912_s1 + $0x120] sm:$0xff]   ;;  %v3014_v1 = vld [vmem:[%s3912_s1 + $0x158] sm:$0xff]  }
  0x11   :  { %2680 = vmatpush3.bf16.msra.mxu1 %v2980_v15  ;;  %v445_v46 = vcombine.high %v3337_v43, %v3337_v43  ;;  %v466_v47 = vrot.slane %v444_v44, %v3333_v41  ;;  %v474_v50 = vcombine.high %v452_v45, %v452_v45  ;;  %v3009_v62 = vld [vmem:[%s3912_s1 + $0x1a8] sm:$0xff]   ;;  %v3013_v2 = vld [vmem:[%s3912_s1 + $0x1a0] sm:$0xff]   ;;  %v3016_v3 = vld [vmem:[%s3912_s1 + $0x1d8] sm:$0xff]  }
  0x12   :  { %2681 = vmatprep.subr.bf16.mxu1 %v2983_v18  ;;  %v3015_v4 = vld [vmem:[%s3912_s1 + $0x118] sm:$0xff]   ;;  %v3018_v5 = vld [vmem:[%s3912_s1 + $0x150] sm:$0xff]   ;;  %v3022_v9 = vld [vmem:[%s3912_s1 + $0x148] sm:$0xff]  }
  0x13   :  { %2660 = vmatpush3.bf16.msra.mxu0 %v2982_v17  ;;  %v473_v49 = vrot.slane %v445_v46, %v3333_v41  ;;  %1826 = vmatprep.mubr.bf16.mxu0 %v466_v47  ;;  %v476_v52 = vcombine.high %v466_v47, %v466_v47  ;;  %v3017_v6 = vld [vmem:[%s3912_s1 + $0x198] sm:$0xff]   ;;  %v3020_v7 = vld [vmem:[%s3912_s1 + $0x1d0] sm:$0xff]   ;;  %v3024_v11 = vld [vmem:[%s3912_s1 + $0x1c8] sm:$0xff]   ;;  %v459_v17 = vrot.slane %v3337_v43, %v3333_v41 }
  0x14   :  { %2661 = vmatprep.subr.bf16.mxu0 %v2985_v20  ;;  %v3019_v8 = vld [vmem:[%s3912_s1 + $0x110] sm:$0xff]   ;;  %v3023_v12 = vld [vmem:[%s3912_s1 + $0x108] sm:$0xff]   ;;  %v3026_v13 = vld [vmem:[%s3912_s1 + $0x140] sm:$0xff]  }
  0x15   :  { %2682 = vmatpush3.bf16.msra.mxu1 %v2984_v19  ;;  %v477_v55 = vcombine.high %v473_v49, %v473_v49  ;;  %1866 = vmatprep.mubr.bf16.mxu1 %v476_v52  ;;  %v3021_v10 = vld [vmem:[%s3912_s1 + $0x190] sm:$0xff]   ;;  %v3025_v14 = vld [vmem:[%s3912_s1 + $0x188] sm:$0xff]   ;;  %v3028_v15 = vld [vmem:[%s3912_s1 + $0x1c0] sm:$0xff]  }
  0x16   :  { %2683 = vmatprep.subr.bf16.mxu1 %v2987_v22  ;;  %v3027_v16 = vld [vmem:[%s3912_s1 + $0x100] sm:$0xff]   ;;  %v3030_v18 = vld [vmem:[%s3912_s1 + $0x278] sm:$0xff]   ;;  %v475_v22 = vcombine.high %v459_v17, %v459_v17  ;;  %v3038_v27 = vld [vmem:[%s3912_s1 + $0x268] sm:$0xff]  }
  0x17   :  { %2662 = vmatpush3.bf16.msra.mxu0 %v2986_v21  ;;  %v3029_v19 = vld [vmem:[%s3912_s1 + $0x180] sm:$0xff]   ;;  %v3032_v20 = vld [vmem:[%s3912_s1 + $0x2f8] sm:$0xff]   ;;  %v3041_v32 = vld [vmem:[%s3912_s1 + $0x2a8] sm:$0xff]  }
  0x18   :  { %2663 = vmatprep.subr.bf16.mxu0 %v2989_v24  ;;  %v3031_v21 = vld [vmem:[%s3912_s1 + $0x238] sm:$0xff]   ;;  %v3044_v33 = vld [vmem:[%s3912_s1 + $0x2e0] sm:$0xff]   ;;  %v3050_v39 = vld [vmem:[%s3912_s1 + $0x250] sm:$0xff]  }
  0x19   :  { %2684 = vmatpush3.bf16.msra.mxu1 %v2988_v23  ;;  %v3034_v23 = vld [vmem:[%s3912_s1 + $0x270] sm:$0xff]   ;;  %v3033_v24 = vld [vmem:[%s3912_s1 + $0x2b8] sm:$0xff]   ;;  %v3045_v36 = vld [vmem:[%s3912_s1 + $0x2a0] sm:$0xff]  }
  0x1a   :  { %2685 = vmatprep.subr.bf16.mxu1 %v2991_v26  ;;  %v3035_v26 = vld [vmem:[%s3912_s1 + $0x230] sm:$0xff]   ;;  %v3046_v35 = vld [vmem:[%s3912_s1 + $0x258] sm:$0xff]   ;;  %v3054_v44 = vld [vmem:[%s3912_s1 + $0x248] sm:$0xff]  }
  0x1b   :  { %2664 = vmatpush3.bf16.msra.mxu0 %v2990_v25  ;;  %v3036_v25 = vld [vmem:[%s3912_s1 + $0x2f0] sm:$0xff]   ;;  %v3047_v38 = vld [vmem:[%s3912_s1 + $0x218] sm:$0xff]  }
  0x1c   :  { %2665 = vmatprep.subr.bf16.mxu0 %v2993_v29  ;;  %v3040_v29 = vld [vmem:[%s3912_s1 + $0x2e8] sm:$0xff]   ;;  %v3052_v42 = vld [vmem:[%s3912_s1 + $0x2d0] sm:$0xff]  }
  0x1d   :  { %2686 = vmatpush3.bf16.msra.mxu1 %v2992_v28  ;;  %v3037_v28 = vld [vmem:[%s3912_s1 + $0x2b0] sm:$0xff]  }
  0x1e   :  { %2687 = vmatprep.subr.bf16.mxu1 %v2995_v31  ;;  %v3042_v31 = vld [vmem:[%s3912_s1 + $0x260] sm:$0xff]   ;;  %v3051_v43 = vld [vmem:[%s3912_s1 + $0x210] sm:$0xff]  }
  0x1f   :  { %2666 = vmatpush3.bf16.msra.mxu0 %v2994_v30  ;;  %v3039_v30 = vld [vmem:[%s3912_s1 + $0x228] sm:$0xff]   ;;  %v3053_v46 = vld [vmem:[%s3912_s1 + $0x290] sm:$0xff]  }
  0x20   :  { %2695 = vmatprep.subr.bf16.mxu0 %v2998_v37  ;;  %v3048_v37 = vld [vmem:[%s3912_s1 + $0x2d8] sm:$0xff]  }
  0x21   :  { %2688 = vmatpush3.bf16.msra.mxu1 %v2997_v34  ;;  %v3043_v34 = vld [vmem:[%s3912_s1 + $0x220] sm:$0xff]  }
  0x22   :  { %2717 = vmatprep.subr.bf16.mxu1 %v3000_v40  ;;  %1827 = vmatmul.mubr.bf16.vlgmr.msra.gmra.mxu0 %v452_v45  ;;  %v3049_v40 = vld [vmem:[%s3912_s1 + $0x298] sm:$0xff]   ;;  %v23_v45 = vld [vmem:[%s3911_s0 + $0x8] sm:$0xff] }
  0x23   :  { %2696 = vmatpush3.bf16.msra.mxu0 %v2999_v48  ;;  %1906 = vmatprep.mubr.bf16.mxu0 %v473_v49  ;;  %v485_v47 = vrot.slane %v23_v45, %v3333_v41  ;;  %v478_v48 = vcombine.high %v23_v45, %v23_v45  ;;  %v3056_v49 = vld [vmem:[%s3912_s1 + $0x2c8] sm:$0xff]  }
  0x24   :  { %1867 = vmatmul.mubr.bf16.vlgmr.msra.gmra.mxu1 %v474_v50  ;;  %2697 = vmatprep.subr.bf16.mxu0 %v3002_v51  ;;  %v3055_v50 = vld [vmem:[%s3912_s1 + $0x208] sm:$0xff]  }
  0x25   :  { %2718 = vmatpush3.bf16.msra.mxu1 %v3001_v53  ;;  %1946 = vmatprep.mubr.bf16.mxu1 %v477_v55  ;;  %v493_v51 = vcombine.high %v485_v47, %v485_v47  ;;  %v3522_v52 = vrot.slane %v478_v48, %v3333_v41  ;;  %v3058_v53 = vld [vmem:[%s3912_s1 + $0x240] sm:$0xff]   ;;  %v3105_v45 = vld [vmem:[%s3912_s1 + $0x4e8] sm:$0xff]  }
  0x26   :  { %2719 = vmatprep.subr.bf16.mxu1 %v3004_v54  ;;  %v3057_v54 = vld [vmem:[%s3912_s1 + $0x288] sm:$0xff]  }
  0x27   :  { %2698 = vmatpush3.bf16.msra.mxu0 %v3003_v56  ;;  %v515_v55 = vrot.slane %v493_v51, %v3333_v41  ;;  %v494_v56 = vcombine.high %v3522_v52, %v3522_v52  ;;  %v3106_v48 = vld [vmem:[%s3912_s1 + $0x4a8] sm:$0xff]   ;;  %v3111_v51 = vld [vmem:[%s3912_s1 + $0x458] sm:$0xff]  }
  0x28   :  { %2699 = vmatprep.subr.bf16.mxu0 %v3006_v57  ;;  %v3060_v57 = vld [vmem:[%s3912_s1 + $0x2c0] sm:$0xff]  }
  0x29   :  { %2720 = vmatpush3.bf16.msra.mxu1 %v3005_v58  ;;  %v3059_v58 = vld [vmem:[%s3912_s1 + $0x200] sm:$0xff]  }
  0x2a   :  { %2721 = vmatprep.subr.bf16.mxu1 %v3008_v59  ;;  %v525_v59 = vcombine.high %v515_v55, %v515_v55 }
  0x2b   :  { %2700 = vmatpush3.bf16.msra.mxu0 %v3007_v60  ;;  %v501_v60 = vrot.slane %v485_v47, %v3333_v41  ;;  %v3107_v47 = vld [vmem:[%s3912_s1 + $0x460] sm:$0xff]  }
  0x2c   :  { %2701 = vmatprep.subr.bf16.mxu0 %v3010_v61  ;;  %v3062_v61 = vld [vmem:[%s3912_s1 + $0x378] sm:$0xff]  }
  0x2d   :  { %2722 = vmatpush3.bf16.msra.mxu1 %v3009_v62  ;;  %v3061_v62 = vld [vmem:[%s3912_s1 + $0x280] sm:$0xff]  }
  0x2e   :  { %2723 = vmatprep.subr.bf16.mxu1 %v3012_v63  ;;  %v522_v63 = vrot.slane %v494_v56, %v3333_v41  ;;  %v3114_v56 = vld [vmem:[%s3912_s1 + $0x498] sm:$0xff]  }
  0x2f   :  { %2702 = vmatpush3.bf16.msra.mxu0 %v3011_v0  ;;  %v3064_v0 = vld [vmem:[%s3912_s1 + $0x3f8] sm:$0xff]  }
  0x30   :  { %2703 = vmatprep.subr.bf16.mxu0 %v3014_v1  ;;  %v3063_v1 = vld [vmem:[%s3912_s1 + $0x338] sm:$0xff]  }
  0x31   :  { %2724 = vmatpush3.bf16.msra.mxu1 %v3013_v2  ;;  %v523_v2 = vcombine.high %v501_v60, %v501_v60 }
  0x32   :  { %2725 = vmatprep.subr.bf16.mxu1 %v3016_v3  ;;  %v3066_v3 = vld [vmem:[%s3912_s1 + $0x370] sm:$0xff]  }
  0x33   :  { %2704 = vmatpush3.bf16.msra.mxu0 %v3015_v4  ;;  %v3065_v4 = vld [vmem:[%s3912_s1 + $0x3b8] sm:$0xff]  }
  0x34   :  { %2705 = vmatprep.subr.bf16.mxu0 %v3018_v5  ;;  %v526_v5 = vcombine.high %v522_v63, %v522_v63 }
  0x35   :  { %2726 = vmatpush3.bf16.msra.mxu1 %v3017_v6  ;;  %v3068_v6 = vld [vmem:[%s3912_s1 + $0x3f0] sm:$0xff]  }
  0x36   :  { %2727 = vmatprep.subr.bf16.mxu1 %v3020_v7  ;;  %v3067_v7 = vld [vmem:[%s3912_s1 + $0x330] sm:$0xff]  }
  0x37   :  { %2706 = vmatpush3.bf16.msra.mxu0 %v3019_v8  ;;  %v3070_v8 = vld [vmem:[%s3912_s1 + $0x368] sm:$0xff]  }
  0x38   :  { %2707 = vmatprep.subr.bf16.mxu0 %v3022_v9  ;;  %v3069_v9 = vld [vmem:[%s3912_s1 + $0x3b0] sm:$0xff]  }
  0x39   :  { %2728 = vmatpush3.bf16.msra.mxu1 %v3021_v10  ;;  %v3072_v10 = vld [vmem:[%s3912_s1 + $0x3e8] sm:$0xff]  }
  0x3a   :  { %2729 = vmatprep.subr.bf16.mxu1 %v3024_v11  ;;  %v3071_v11 = vld [vmem:[%s3912_s1 + $0x328] sm:$0xff]  }
  0x3b   :  { %2708 = vmatpush3.bf16.msra.mxu0 %v3023_v12  ;;  %v3074_v12 = vld [vmem:[%s3912_s1 + $0x360] sm:$0xff]  }
  0x3c   :  { %2709 = vmatprep.subr.bf16.mxu0 %v3026_v13  ;;  %v3073_v13 = vld [vmem:[%s3912_s1 + $0x3a8] sm:$0xff]  }
  0x3d   :  { %2730 = vmatpush3.bf16.msra.mxu1 %v3025_v14  ;;  %v3076_v14 = vld [vmem:[%s3912_s1 + $0x3e0] sm:$0xff]  }
  0x3e   :  { %2731 = vmatprep.subr.bf16.mxu1 %v3028_v15  ;;  %v3075_v15 = vld [vmem:[%s3912_s1 + $0x320] sm:$0xff]  }
  0x3f   :  { %2710 = vmatpush3.bf16.msra.mxu0 %v3027_v16  ;;  %v3078_v16 = vld [vmem:[%s3912_s1 + $0x358] sm:$0xff]  }
  0x40   :  { %2739 = vmatprep.subr.bf16.mxu0 %v3030_v18  ;;  %v3080_v18 = vld [vmem:[%s3912_s1 + $0x3d8] sm:$0xff]  }
  0x41   :  { %2732 = vmatpush3.bf16.msra.mxu1 %v3029_v19  ;;  %v3079_v19 = vld [vmem:[%s3912_s1 + $0x318] sm:$0xff]  }
  0x42   :  { %1907 = vmatmul.mubr.bf16.vlgmr.msra.gmra.mxu0 %v459_v17  ;;  %2761 = vmatprep.subr.bf16.mxu1 %v3032_v20  ;;  %v3077_v17 = vld [vmem:[%s3912_s1 + $0x3a0] sm:$0xff]   ;;  %v3082_v20 = vld [vmem:[%s3912_s1 + $0x350] sm:$0xff]  }
  0x43   :  { %2740 = vmatpush3.bf16.msra.mxu0 %v3031_v21  ;;  %1986 = vmatprep.mubr.bf16.mxu0 %v515_v55  ;;  %v3081_v21 = vld [vmem:[%s3912_s1 + $0x398] sm:$0xff]   ;;  %v3115_v55 = vld [vmem:[%s3912_s1 + $0x450] sm:$0xff]  }
  0x44   :  { %1947 = vmatmul.mubr.bf16.vlgmr.msra.gmra.mxu1 %v475_v22  ;;  %2741 = vmatprep.subr.bf16.mxu0 %v3034_v23  ;;  %v3084_v22 = vld [vmem:[%s3912_s1 + $0x3d0] sm:$0xff]  }
  0x45   :  { %2762 = vmatpush3.bf16.msra.mxu1 %v3033_v24  ;;  %2026 = vmatprep.mubr.bf16.mxu1 %v525_v59  ;;  %v3083_v23 = vld [vmem:[%s3912_s1 + $0x310] sm:$0xff]   ;;  %v3086_v24 = vld [vmem:[%s3912_s1 + $0x348] sm:$0xff]  }
  0x46   :  { %2763 = vmatprep.subr.bf16.mxu1 %v3036_v25  ;;  %v3085_v25 = vld [vmem:[%s3912_s1 + $0x390] sm:$0xff]   ;;  %v3119_v59 = vld [vmem:[%s3912_s1 + $0x448] sm:$0xff]  }
  0x47   :  { %2742 = vmatpush3.bf16.msra.mxu0 %v3035_v26  ;;  %v3088_v26 = vld [vmem:[%s3912_s1 + $0x3c8] sm:$0xff]  }
  0x48   :  { %2743 = vmatprep.subr.bf16.mxu0 %v3038_v27  ;;  %v3087_v27 = vld [vmem:[%s3912_s1 + $0x308] sm:$0xff]  }
  0x49   :  { %2764 = vmatpush3.bf16.msra.mxu1 %v3037_v28  ;;  %v3090_v28 = vld [vmem:[%s3912_s1 + $0x340] sm:$0xff]  }
  0x4a   :  { %2765 = vmatprep.subr.bf16.mxu1 %v3040_v29  ;;  %v3089_v29 = vld [vmem:[%s3912_s1 + $0x388] sm:$0xff]  }
  0x4b   :  { %2744 = vmatpush3.bf16.msra.mxu0 %v3039_v30  ;;  %v3092_v30 = vld [vmem:[%s3912_s1 + $0x3c0] sm:$0xff]  }
  0x4c   :  { %2745 = vmatprep.subr.bf16.mxu0 %v3042_v31  ;;  %v3091_v31 = vld [vmem:[%s3912_s1 + $0x300] sm:$0xff]  }
  0x4d   :  { %2766 = vmatpush3.bf16.msra.mxu1 %v3041_v32  ;;  %v508_v32 = vrot.slane %v3522_v52, %v3333_v41  ;;  %v3110_v52 = vld [vmem:[%s3912_s1 + $0x4a0] sm:$0xff]  }
  0x4e   :  { %2767 = vmatprep.subr.bf16.mxu1 %v3044_v33  ;;  %v3095_v33 = vld [vmem:[%s3912_s1 + $0x478] sm:$0xff]  }
  0x4f   :  { %2746 = vmatpush3.bf16.msra.mxu0 %v3043_v34  ;;  %v3094_v34 = vld [vmem:[%s3912_s1 + $0x380] sm:$0xff]  }
  0x50   :  { %2747 = vmatprep.subr.bf16.mxu0 %v3046_v35  ;;  %v3097_v35 = vld [vmem:[%s3912_s1 + $0x4f8] sm:$0xff]  }
  0x51   :  { %2768 = vmatpush3.bf16.msra.mxu1 %v3045_v36  ;;  %v3096_v36 = vld [vmem:[%s3912_s1 + $0x438] sm:$0xff]  }
  0x52   :  { %2769 = vmatprep.subr.bf16.mxu1 %v3048_v37  ;;  %v524_v37 = vcombine.high %v508_v32, %v508_v32 }
  0x53   :  { %2748 = vmatpush3.bf16.msra.mxu0 %v3047_v38  ;;  %v3099_v38 = vld [vmem:[%s3912_s1 + $0x470] sm:$0xff]  }
  0x54   :  { %2749 = vmatprep.subr.bf16.mxu0 %v3050_v39  ;;  %v3098_v39 = vld [vmem:[%s3912_s1 + $0x4b8] sm:$0xff]  }
  0x55   :  { %2770 = vmatpush3.bf16.msra.mxu1 %v3049_v40  ;;  %v3101_v40 = vld [vmem:[%s3912_s1 + $0x4f0] sm:$0xff]  }
  0x56   :  { %2771 = vmatprep.subr.bf16.mxu1 %v3052_v42  ;;  %v3100_v42 = vld [vmem:[%s3912_s1 + $0x430] sm:$0xff]  }
  0x57   :  { %2750 = vmatpush3.bf16.msra.mxu0 %v3051_v43  ;;  %v3103_v43 = vld [vmem:[%s3912_s1 + $0x468] sm:$0xff]  }
  0x58   :  { %2751 = vmatprep.subr.bf16.mxu0 %v3054_v44  ;;  %v3102_v44 = vld [vmem:[%s3912_s1 + $0x4b0] sm:$0xff]  }
  0x59   :  { %2772 = vmatpush3.bf16.msra.mxu1 %v3053_v46  ;;  %v3104_v46 = vld [vmem:[%s3912_s1 + $0x428] sm:$0xff]  }
  0x5a   :  { %2773 = vmatprep.subr.bf16.mxu1 %v3056_v49  ;;  %v3109_v49 = vld [vmem:[%s3912_s1 + $0x4e0] sm:$0xff]  }
  0x5b   :  { %2752 = vmatpush3.bf16.msra.mxu0 %v3055_v50  ;;  %v3108_v50 = vld [vmem:[%s3912_s1 + $0x420] sm:$0xff]  }
  0x5c   :  { %2753 = vmatprep.subr.bf16.mxu0 %v3058_v53  ;;  %v3113_v53 = vld [vmem:[%s3912_s1 + $0x4d8] sm:$0xff]  }
  0x5d   :  { %2774 = vmatpush3.bf16.msra.mxu1 %v3057_v54  ;;  %v3112_v54 = vld [vmem:[%s3912_s1 + $0x418] sm:$0xff]  }
  0x5e   :  { %2775 = vmatprep.subr.bf16.mxu1 %v3060_v57  ;;  %v3117_v57 = vld [vmem:[%s3912_s1 + $0x4d0] sm:$0xff]  }
  0x5f   :  { %2754 = vmatpush3.bf16.msra.mxu0 %v3059_v58  ;;  %v3116_v58 = vld [vmem:[%s3912_s1 + $0x410] sm:$0xff]  }
  0x60   :  { %2783 = vmatprep.subr.bf16.mxu0 %v3062_v61  ;;  %v3118_v61 = vld [vmem:[%s3912_s1 + $0x490] sm:$0xff]  }
  0x61   :  { %2776 = vmatpush3.bf16.msra.mxu1 %v3061_v62 }
  0x62   :  { %1987 = vmatmul.mubr.bf16.vlgmr.msra.gmra.mxu0 %v501_v60  ;;  %2805 = vmatprep.subr.bf16.mxu1 %v3064_v0  ;;  %v24_v60 = vld [vmem:[%s3911_s0 + $0x10] sm:$0xff]  ;;  %v3121_v0 = vld [vmem:[%s3912_s1 + $0x4c8] sm:$0xff]  }
  0x63   :  { %2784 = vmatpush3.bf16.msra.mxu0 %v3063_v1  ;;  %2066 = vmatprep.mubr.bf16.mxu0 %v522_v63  ;;  %v534_v62 = vrot.slane %v24_v60, %v3333_v41  ;;  %v527_v63 = vcombine.high %v24_v60, %v24_v60  ;;  %v3120_v1 = vld [vmem:[%s3912_s1 + $0x408] sm:$0xff]  }
  0x64   :  { %2027 = vmatmul.mubr.bf16.vlgmr.msra.gmra.mxu1 %v523_v2  ;;  %2785 = vmatprep.subr.bf16.mxu0 %v3066_v3 }
  0x65   :  { %2806 = vmatpush3.bf16.msra.mxu1 %v3065_v4  ;;  %2106 = vmatprep.mubr.bf16.mxu1 %v526_v5  ;;  %v542_v2 = vcombine.high %v534_v62, %v534_v62  ;;  %v3728_v3 = vrot.slane %v527_v63, %v3333_v41  ;;  %v3123_v4 = vld [vmem:[%s3912_s1 + $0x440] sm:$0xff]   ;;  %v3122_v5 = vld [vmem:[%s3912_s1 + $0x488] sm:$0xff]  }
  0x66   :  { %2807 = vmatprep.subr.bf16.mxu1 %v3068_v6 }
  0x67   :  { %2786 = vmatpush3.bf16.msra.mxu0 %v3067_v7  ;;  %v564_v6 = vrot.slane %v542_v2, %v3333_v41  ;;  %v543_v7 = vcombine.high %v3728_v3, %v3728_v3 }
  0x68   :  { %2787 = vmatprep.subr.bf16.mxu0 %v3070_v8  ;;  %v3125_v8 = vld [vmem:[%s3912_s1 + $0x4c0] sm:$0xff]  }
  0x69   :  { %2808 = vmatpush3.bf16.msra.mxu1 %v3069_v9  ;;  %v3124_v9 = vld [vmem:[%s3912_s1 + $0x400] sm:$0xff]  }
  0x6a   :  { %2809 = vmatprep.subr.bf16.mxu1 %v3072_v10  ;;  %v574_v10 = vcombine.high %v564_v6, %v564_v6 }
  0x6b   :  { %2788 = vmatpush3.bf16.msra.mxu0 %v3071_v11  ;;  %v550_v11 = vrot.slane %v534_v62, %v3333_v41 }
  0x6c   :  { %2789 = vmatprep.subr.bf16.mxu0 %v3074_v12  ;;  %v3127_v12 = vld [vmem:[%s3912_s1 + $0x578] sm:$0xff]  }
  0x6d   :  { %2810 = vmatpush3.bf16.msra.mxu1 %v3073_v13  ;;  %v3126_v13 = vld [vmem:[%s3912_s1 + $0x480] sm:$0xff]  }
  0x6e   :  { %2811 = vmatprep.subr.bf16.mxu1 %v3076_v14  ;;  %v571_v14 = vrot.slane %v543_v7, %v3333_v41 }
  0x6f   :  { %2790 = vmatpush3.bf16.msra.mxu0 %v3075_v15  ;;  %v3129_v15 = vld [vmem:[%s3912_s1 + $0x5f8] sm:$0xff]  }
  0x70   :  { %2791 = vmatprep.subr.bf16.mxu0 %v3078_v16  ;;  %v3128_v16 = vld [vmem:[%s3912_s1 + $0x538] sm:$0xff]  }
  0x71   :  { %2812 = vmatpush3.bf16.msra.mxu1 %v3077_v17  ;;  %v572_v17 = vcombine.high %v550_v11, %v550_v11 }
  0x72   :  { %2813 = vmatprep.subr.bf16.mxu1 %v3080_v18  ;;  %v3131_v18 = vld [vmem:[%s3912_s1 + $0x570] sm:$0xff]  }
  0x73   :  { %2792 = vmatpush3.bf16.msra.mxu0 %v3079_v19  ;;  %v3130_v19 = vld [vmem:[%s3912_s1 + $0x5b8] sm:$0xff]  }
  0x74   :  { %2793 = vmatprep.subr.bf16.mxu0 %v3082_v20  ;;  %v575_v20 = vcombine.high %v571_v14, %v571_v14 }
  0x75   :  { %2814 = vmatpush3.bf16.msra.mxu1 %v3081_v21  ;;  %v3133_v21 = vld [vmem:[%s3912_s1 + $0x5f0] sm:$0xff]  }
  0x76   :  { %2815 = vmatprep.subr.bf16.mxu1 %v3084_v22  ;;  %v3132_v22 = vld [vmem:[%s3912_s1 + $0x530] sm:$0xff]  }
  0x77   :  { %2794 = vmatpush3.bf16.msra.mxu0 %v3083_v23  ;;  %v3135_v23 = vld [vmem:[%s3912_s1 + $0x568] sm:$0xff]  }
  0x78   :  { %2795 = vmatprep.subr.bf16.mxu0 %v3086_v24  ;;  %v3134_v24 = vld [vmem:[%s3912_s1 + $0x5b0] sm:$0xff]  }
  0x79   :  { %2816 = vmatpush3.bf16.msra.mxu1 %v3085_v25  ;;  %v3137_v25 = vld [vmem:[%s3912_s1 + $0x5e8] sm:$0xff]  }
  0x7a   :  { %2817 = vmatprep.subr.bf16.mxu1 %v3088_v26  ;;  %v3136_v26 = vld [vmem:[%s3912_s1 + $0x528] sm:$0xff]  }
  0x7b   :  { %2796 = vmatpush3.bf16.msra.mxu0 %v3087_v27  ;;  %v3139_v27 = vld [vmem:[%s3912_s1 + $0x560] sm:$0xff]  }
  0x7c   :  { %2797 = vmatprep.subr.bf16.mxu0 %v3090_v28  ;;  %v3138_v28 = vld [vmem:[%s3912_s1 + $0x5a8] sm:$0xff]  }
  0x7d   :  { %2818 = vmatpush3.bf16.msra.mxu1 %v3089_v29  ;;  %v3141_v29 = vld [vmem:[%s3912_s1 + $0x5e0] sm:$0xff]  }
  0x7e   :  { %2819 = vmatprep.subr.bf16.mxu1 %v3092_v30  ;;  %v3140_v30 = vld [vmem:[%s3912_s1 + $0x520] sm:$0xff]  }
  0x7f   :  { %2798 = vmatpush3.bf16.msra.mxu0 %v3091_v31  ;;  %v3143_v31 = vld [vmem:[%s3912_s1 + $0x558] sm:$0xff]  }
  0x80   :  { %2827 = vmatprep.subr.bf16.mxu0 %v3095_v33  ;;  %v3145_v33 = vld [vmem:[%s3912_s1 + $0x5d8] sm:$0xff]  }
  0x81   :  { %2820 = vmatpush3.bf16.msra.mxu1 %v3094_v34  ;;  %v3144_v34 = vld [vmem:[%s3912_s1 + $0x518] sm:$0xff]  }
  0x82   :  { %2067 = vmatmul.mubr.bf16.vlgmr.msra.gmra.mxu0 %v508_v32  ;;  %2849 = vmatprep.subr.bf16.mxu1 %v3097_v35  ;;  %v3142_v32 = vld [vmem:[%s3912_s1 + $0x5a0] sm:$0xff]   ;;  %v3147_v35 = vld [vmem:[%s3912_s1 + $0x550] sm:$0xff]  }
  0x83   :  { %2828 = vmatpush3.bf16.msra.mxu0 %v3096_v36  ;;  %2146 = vmatprep.mubr.bf16.mxu0 %v564_v6  ;;  %v3146_v36 = vld [vmem:[%s3912_s1 + $0x598] sm:$0xff]  }
  0x84   :  { %2107 = vmatmul.mubr.bf16.vlgmr.msra.gmra.mxu1 %v524_v37  ;;  %2829 = vmatprep.subr.bf16.mxu0 %v3099_v38  ;;  %v3149_v37 = vld [vmem:[%s3912_s1 + $0x5d0] sm:$0xff]  }
  0x85   :  { %2850 = vmatpush3.bf16.msra.mxu1 %v3098_v39  ;;  %2186 = vmatprep.mubr.bf16.mxu1 %v574_v10  ;;  %v3148_v38 = vld [vmem:[%s3912_s1 + $0x510] sm:$0xff]   ;;  %v3151_v39 = vld [vmem:[%s3912_s1 + $0x548] sm:$0xff]  }
  0x86   :  { %2851 = vmatprep.subr.bf16.mxu1 %v3101_v40  ;;  %v3150_v40 = vld [vmem:[%s3912_s1 + $0x590] sm:$0xff]  }
  0x87   :  { %2830 = vmatpush3.bf16.msra.mxu0 %v3100_v42  ;;  %v3153_v42 = vld [vmem:[%s3912_s1 + $0x5c8] sm:$0xff]  }
  0x88   :  { %2831 = vmatprep.subr.bf16.mxu0 %v3103_v43  ;;  %v3152_v43 = vld [vmem:[%s3912_s1 + $0x508] sm:$0xff]  }
  0x89   :  { %2852 = vmatpush3.bf16.msra.mxu1 %v3102_v44  ;;  %v3155_v44 = vld [vmem:[%s3912_s1 + $0x540] sm:$0xff]  }
  0x8a   :  { %2853 = vmatprep.subr.bf16.mxu1 %v3105_v45  ;;  %v3154_v45 = vld [vmem:[%s3912_s1 + $0x588] sm:$0xff]  }
  0x8b   :  { %2832 = vmatpush3.bf16.msra.mxu0 %v3104_v46  ;;  %v3156_v46 = vld [vmem:[%s3912_s1 + $0x500] sm:$0xff]  }
  0x8c   :  { %2833 = vmatprep.subr.bf16.mxu0 %v3107_v47  ;;  %v3157_v47 = vld [vmem:[%s3912_s1 + $0x5c0] sm:$0xff]  }
  0x8d   :  { %2854 = vmatpush3.bf16.msra.mxu1 %v3106_v48  ;;  %v3159_v48 = vld [vmem:[%s3912_s1 + $0x580] sm:$0xff]  }
  0x8e   :  { %2855 = vmatprep.subr.bf16.mxu1 %v3109_v49  ;;  %v557_v49 = vrot.slane %v3728_v3, %v3333_v41 }
  0x8f   :  { %2834 = vmatpush3.bf16.msra.mxu0 %v3108_v50  ;;  %v3160_v50 = vld [vmem:[%s3912_s1 + $0x618] sm:$0xff]  }
  0x90   :  { %2835 = vmatprep.subr.bf16.mxu0 %v3111_v51  ;;  %v3195_v51 = vmov 0.0  }
  0x91   :  { %2856 = vmatpush3.bf16.msra.mxu1 %v3110_v52  ;;  %v573_v52 = vcombine.high %v557_v49, %v557_v49 }
  0x92   :  { %2857 = vmatprep.subr.bf16.mxu1 %v3113_v53 }
  0x93   :  { %2836 = vmatpush3.bf16.msra.mxu0 %v3112_v54 }
  0x94   :  { %2837 = vmatprep.subr.bf16.mxu0 %v3115_v55 }
  0x95   :  { %2858 = vmatpush3.bf16.msra.mxu1 %v3114_v56 }
  0x96   :  { %2859 = vmatprep.subr.bf16.mxu1 %v3117_v57 }
  0x97   :  { %2838 = vmatpush3.bf16.msra.mxu0 %v3116_v58 }
  0x98   :  { %2839 = vmatprep.subr.bf16.mxu0 %v3119_v59 }
  0x99   :  { %2860 = vmatpush3.bf16.msra.mxu1 %v3118_v61 }
  0x9a   :  { %2861 = vmatprep.subr.bf16.mxu1 %v3121_v0 }
  0x9b   :  { %2840 = vmatpush3.bf16.msra.mxu0 %v3120_v1 }
  0x9c   :  { %2841 = vmatprep.subr.bf16.mxu0 %v3123_v4 }
  0x9d   :  { %2862 = vmatpush3.bf16.msra.mxu1 %v3122_v5 }
  0x9e   :  { %2863 = vmatprep.subr.bf16.mxu1 %v3125_v8 }
  0x9f   :  { %2842 = vmatpush3.bf16.msra.mxu0 %v3124_v9 }
  0xa0   :  { %2871 = vmatprep.subr.bf16.mxu0 %v3127_v12 }
  0xa1   :  { %2864 = vmatpush3.bf16.msra.mxu1 %v3126_v13 }
  0xa2   :  { %2147 = vmatmul.mubr.bf16.vlgmr.msra.gmra.mxu0 %v550_v11  ;;  %2893 = vmatprep.subr.bf16.mxu1 %v3129_v15 }
  0xa3   :  { %2872 = vmatpush3.bf16.msra.mxu0 %v3128_v16  ;;  %2226 = vmatprep.mubr.bf16.mxu0 %v571_v14 }
  0xa4   :  { %2187 = vmatmul.mubr.bf16.vlgmr.msra.gmra.mxu1 %v572_v17  ;;  %2873 = vmatprep.subr.bf16.mxu0 %v3131_v18 }
  0xa5   :  { %2894 = vmatpush3.bf16.msra.mxu1 %v3130_v19  ;;  %2266 = vmatprep.mubr.bf16.mxu1 %v575_v20 }
  0xa6   :  { %2895 = vmatprep.subr.bf16.mxu1 %v3133_v21 }
  0xa7   :  { %2874 = vmatpush3.bf16.msra.mxu0 %v3132_v22 }
  0xa8   :  { %2875 = vmatprep.subr.bf16.mxu0 %v3135_v23 }
  0xa9   :  { %2896 = vmatpush3.bf16.msra.mxu1 %v3134_v24 }
  0xaa   :  { %2897 = vmatprep.subr.bf16.mxu1 %v3137_v25 }
  0xab   :  { %2876 = vmatpush3.bf16.msra.mxu0 %v3136_v26 }
  0xac   :  { %2877 = vmatprep.subr.bf16.mxu0 %v3139_v27 }
  0xad   :  { %2898 = vmatpush3.bf16.msra.mxu1 %v3138_v28 }
  0xae   :  { %2899 = vmatprep.subr.bf16.mxu1 %v3141_v29 }
  0xaf   :  { %2878 = vmatpush3.bf16.msra.mxu0 %v3140_v30 }
  0xb0   :  { %2879 = vmatprep.subr.bf16.mxu0 %v3143_v31 }
  0xb1   :  { %2900 = vmatpush3.bf16.msra.mxu1 %v3142_v32 }
  0xb2   :  { %2901 = vmatprep.subr.bf16.mxu1 %v3145_v33 }
  0xb3   :  { %2880 = vmatpush3.bf16.msra.mxu0 %v3144_v34 }
  0xb4   :  { %2881 = vmatprep.subr.bf16.mxu0 %v3147_v35 }
  0xb5   :  { %2902 = vmatpush3.bf16.msra.mxu1 %v3146_v36 }
  0xb6   :  { %2903 = vmatprep.subr.bf16.mxu1 %v3149_v37 }
  0xb7   :  { %2882 = vmatpush3.bf16.msra.mxu0 %v3148_v38 }
  0xb8   :  { %2883 = vmatprep.subr.bf16.mxu0 %v3151_v39 }
  0xb9   :  { %2904 = vmatpush3.bf16.msra.mxu1 %v3150_v40 }
  0xba   :  { %2905 = vmatprep.subr.bf16.mxu1 %v3153_v42 }
  0xbb   :  { %2884 = vmatpush3.bf16.msra.mxu0 %v3152_v43 }
  0xbc   :  { %2885 = vmatprep.subr.bf16.mxu0 %v3155_v44 }
  0xbd   :  { %2906 = vmatpush3.bf16.msra.mxu1 %v3154_v45 }
  0xbe   :  { %2907 = vmatprep.subr.bf16.mxu1 %v3157_v47 }
  0xbf   :  { %2886 = vmatpush3.bf16.msra.mxu0 %v3156_v46 }
  0xc0   :  { %2929 = vmatprep.subr.bf16.mxu0 %v3195_v51 }
  0xc1   :  { %10 = vsyncpa [#allocation3], 0  ;;  %2908 = vmatpush3.bf16.msra.mxu1 %v3159_v48  ;;  %v3161_v53 = vld [vmem:[%s3912_s1 + $0x610] sm:$0xff]   ;;  %vm3196_vm0 = vmmov 0   ;;  %v3162_v54 = vld [vmem:[%s3912_s1 + $0x608] sm:$0xff]   ;;  %vm1790_vm1 = vcmask 523264  }
  0xc2   :  { %2227 = vmatmul.mubr.bf16.vlgmr.msra.gmra.mxu0 %v557_v49  ;;  %2941 = vmatprep.subr.bf16.mxu1 %v3195_v51  ;;  %v3163_v55 = vld [vmem:[%s3912_s1 + $0x600] sm:$0xff]   ;;  %v2444_v56 = vld.sshfl [vmem:[%s3911_s0 + $0x18] sm:$0x1 pattern:$0x75316420]  ;;  %v3165_v7 = vld [vmem:[%s3914_s3 + $0x30] sm:$0xff]  }
  0xc3   :  { %2930 = vmatpush3.bf16.msra.mxu0 %v3160_v50  ;;  %2937 = vmatprep.mubr.msk.bf16.mxu0 %vm3196_vm0, %v3195_v51  ;;  %v589_v57 = vrot.slane %v2444_v56, %v3333_v41  ;;  %v2443_v59 = vld [vmem:[%s3913_s2] ss:$0 sm:$0xff]  ;;  %v3164_v41 = vld [vmem:[%s3914_s3 + $0x38] sm:$0xff]   ;;  %v3166_v8 = vld [vmem:[%s3914_s3 + $0x28] sm:$0xff]   ;;  %s3197_s9 = smov [#allocation2]   ;;  %vm2427_vm2 = vcmask 74752  }
  0xc4   :  { %2267 = vmatmul.mubr.bf16.vlgmr.msra.gmra.mxu1 %v573_v52  ;;  %2931 = vmatprep.subr.bf16.mxu0 %v3195_v51  ;;  %v3167_v12 = vld [vmem:[%s3914_s3 + $0x20] sm:$0xff]   ;;  %v3168_v20 = vld [vmem:[%s3914_s3 + $0x18] sm:$0xff]   ;;  %v3169_v23 = vld [vmem:[%s3914_s3 + $0x10] sm:$0xff]   ;;  %s2435_s10 = sshll.u32 %s3197_s9, 4  ;;  %s2436_s10 = int_to_ptr.vmem [resolvable:$true] %s2435_s10 }
  0xc5   :  { %2957 = vmatprep.mubr.msk.bf16.mxu1 %vm3196_vm0, %v3195_v51  ;;  %2942 = vmatpush3.bf16.msra.mxu1 %v3164_v41  ;;  %v3170_v24 = vld [vmem:[%s3914_s3 + $0x8] sm:$0xff]   ;;  %v3171_v25 = vld [vmem:[%s3914_s3] sm:$0xff]   ;;  %s3172_s11 = scalar_lea.vmem %s2436_s10, 32  ;;  %p3177_p1 = scmp.lt.s32.totalorder %s2436_s10, %s2436_s10 }
  0xc6   :  { %2943 = vmatprep.subr.bf16.mxu1 %v3195_v51  ;;  %p3173_p0 = scmp.ne.s32.totalorder %s2436_s10, %s3172_s11  ;;  %p3178_p2 = scmp.lt.s32.totalorder %s3172_s11, %s3172_s11 }
  0xc7   :  { %2932 = vmatpush3.bf16.msra.mxu0 %v3161_v53 }
  0xc8   :  { %2933 = vmatprep.subr.bf16.mxu0 %v3195_v51  ;;  %p3179_p3 = por %p3178_p2, %p3177_p1 }
  0xc9   :  { %2944 = vmatpush3.bf16.msra.mxu1 %v3165_v7 }
  0xca   :  { %2945 = vmatprep.subr.bf16.mxu1 %v3195_v51  ;;  %p3180_p4 = pnand %p3179_p3, %p3173_p0 }
  0xcb   :  { %2934 = vmatpush3.bf16.msra.mxu0 %v3162_v54 }
  0xcc   :  { %2935 = vmatprep.subr.bf16.mxu0 %v3195_v51 }
  0xcd   :  { %2946 = vmatpush3.bf16.msra.mxu1 %v3166_v8 }
  0xce   :  { %2947 = vmatprep.subr.bf16.mxu1 %v3195_v51 }
  0xcf   :  { %2936 = vmatpush3.bf16.msra.mxu0 %v3163_v55 }
  0xd1   :  { %2948 = vmatpush3.bf16.msra.mxu1 %v3167_v12 }
  0xd2   :  { %2938 = vmatmul.mubr.msk.bf16.vlgmr.msra.gmra.mxu0 %vm1790_vm1, %v589_v57  ;;  %2949 = vmatprep.subr.bf16.mxu1 %v3195_v51 }
  0xd5   :  { %2950 = vmatpush3.bf16.msra.mxu1 %v3168_v20 }
  0xd6   :  { %2951 = vmatprep.subr.bf16.mxu1 %v3195_v51 }
  0xd9   :  { %2952 = vmatpush3.bf16.msra.mxu1 %v3169_v23 }
  0xda   :  { %2953 = vmatprep.subr.bf16.mxu1 %v3195_v51 }
  0xdd   :  { %2954 = vmatpush3.bf16.msra.mxu1 %v3170_v24 }
  0xde   :  { %2955 = vmatprep.subr.bf16.mxu1 %v3195_v51 }
  0xe1   :  { %2956 = vmatpush3.bf16.msra.mxu1 %v3171_v25 }
  0xe2   :  { %v2667_v58 = vpop.f32.mrf.mxu0 }
  0xe4   :  { %v2668_v60 = vpop.f32.mrf.mxu0  ;;  %v2689_v61 = vpop.f32.mrf.mxu1 }
  0xe5   :  { %v2669_v62 = vadd.f32 %v2668_v60, %v2667_v58 }
  0xe6   :  { %v2670_v63 = vpop.f32.mrf.mxu0  ;;  %v2690_v0 = vpop.f32.mrf.mxu1 }
  0xe7   :  { %v1829_v1 = vadd.f32 %v2669_v62, %v2443_v59  ;;  %v2691_v2 = vadd.f32 %v2690_v0, %v2689_v61 }
  0xe8   :  { %v2671_v3 = vpop.f32.mrf.mxu0  ;;  %v2692_v4 = vpop.f32.mrf.mxu1 }
  0xe9   :  { %v1869_v5 = vadd.f32 %v2691_v2, %v1829_v1 }
  0xea   :  { %v2693_v6 = vpop.f32.mrf.mxu1 }
 0x102   :  { %v2711_v9 = vpop.f32.mrf.mxu0 }
 0x104   :  { %v2712_v10 = vpop.f32.mrf.mxu0  ;;  %v2733_v11 = vpop.f32.mrf.mxu1 }
 0x105   :  { %v2713_v13 = vadd.f32 %v2712_v10, %v2711_v9 }
 0x106   :  { %v2714_v14 = vpop.f32.mrf.mxu0  ;;  %v2734_v15 = vpop.f32.mrf.mxu1 }
 0x107   :  { %v1909_v16 = vadd.f32 %v2713_v13, %v1869_v5  ;;  %v2735_v17 = vadd.f32 %v2734_v15, %v2733_v11 }
 0x108   :  { %v2715_v18 = vpop.f32.mrf.mxu0  ;;  %v2736_v19 = vpop.f32.mrf.mxu1 }
 0x109   :  { %v1949_v21 = vadd.f32 %v2735_v17, %v1909_v16  ;;  %v2642_v17 = vld [vmem:[%s3915_s4] ss:$0 sm:$0xff] }
 0x10a   :  { %v2737_v22 = vpop.f32.mrf.mxu1 }
 0x122   :  { %v2755_v26 = vpop.f32.mrf.mxu0 }
 0x124   :  { %v2756_v27 = vpop.f32.mrf.mxu0  ;;  %v2777_v28 = vpop.f32.mrf.mxu1 }
 0x125   :  { %v2757_v29 = vadd.f32 %v2756_v27, %v2755_v26 }
 0x126   :  { %v2758_v30 = vpop.f32.mrf.mxu0  ;;  %v2778_v31 = vpop.f32.mrf.mxu1 }
 0x127   :  { %v1989_v32 = vadd.f32 %v2757_v29, %v1949_v21  ;;  %v2779_v33 = vadd.f32 %v2778_v31, %v2777_v28 }
 0x128   :  { %v2759_v34 = vpop.f32.mrf.mxu0  ;;  %v2780_v35 = vpop.f32.mrf.mxu1 }
 0x129   :  { %v2029_v36 = vadd.f32 %v2779_v33, %v1989_v32 }
 0x12a   :  { %v2781_v37 = vpop.f32.mrf.mxu1 }
 0x142   :  { %v2799_v38 = vpop.f32.mrf.mxu0 }
 0x144   :  { %v2800_v39 = vpop.f32.mrf.mxu0  ;;  %v2821_v40 = vpop.f32.mrf.mxu1 }
 0x145   :  { %v2801_v42 = vadd.f32 %v2800_v39, %v2799_v38 }
 0x146   :  { %v2802_v43 = vpop.f32.mrf.mxu0  ;;  %v2822_v44 = vpop.f32.mrf.mxu1 }
 0x147   :  { %v2069_v45 = vadd.f32 %v2801_v42, %v2029_v36  ;;  %v2823_v46 = vadd.f32 %v2822_v44, %v2821_v40 }
 0x148   :  { %v2803_v47 = vpop.f32.mrf.mxu0  ;;  %v2824_v48 = vpop.f32.mrf.mxu1 }
 0x149   :  { %v2109_v49 = vadd.f32 %v2823_v46, %v2069_v45 }
 0x14a   :  { %v2825_v50 = vpop.f32.mrf.mxu1 }
 0x162   :  { %v2843_v51 = vpop.f32.mrf.mxu0 }
 0x164   :  { %v2844_v52 = vpop.f32.mrf.mxu0  ;;  %v2865_v53 = vpop.f32.mrf.mxu1 }
 0x165   :  { %v2845_v60 = vadd.f32 %v2844_v52, %v2843_v51 }
 0x166   :  { %v2846_v54 = vpop.f32.mrf.mxu0  ;;  %v2866_v55 = vpop.f32.mrf.mxu1 }
 0x167   :  { %v2149_v1 = vadd.f32 %v2845_v60, %v2109_v49  ;;  %v2867_v2 = vadd.f32 %v2866_v55, %v2865_v53 }
 0x168   :  { %v2847_v56 = vpop.f32.mrf.mxu0  ;;  %v2868_v57 = vpop.f32.mrf.mxu1 }
 0x169   :  { %v2189_v41 = vadd.f32 %v2867_v2, %v2149_v1 }
 0x16a   :  { %v2869_v58 = vpop.f32.mrf.mxu1 }
 0x182   :  { %v2887_v59 = vpop.f32.mrf.mxu0 }
 0x184   :  { %v2888_v61 = vpop.f32.mrf.mxu0  ;;  %v2909_v62 = vpop.f32.mrf.mxu1 }
 0x185   :  { %v2889_v5 = vadd.f32 %v2888_v61, %v2887_v59 }
 0x186   :  { %v2890_v63 = vpop.f32.mrf.mxu0  ;;  %v2910_v0 = vpop.f32.mrf.mxu1 }
 0x187   :  { %v2229_v7 = vadd.f32 %v2889_v5, %v2189_v41  ;;  %v2911_v8 = vadd.f32 %v2910_v0, %v2909_v62 }
 0x188   :  { %v2891_v3 = vpop.f32.mrf.mxu0  ;;  %v2912_v4 = vpop.f32.mrf.mxu1 }
 0x189   :  { %v2269_v9 = vadd.f32 %v2911_v8, %v2229_v7 }
 0x18a   :  { %v2913_v6 = vpop.f32.mrf.mxu1 }
 0x192   :  { %v2308_v10 = vpop.f32.mrf.mxu0 }
 0x193   :  { %v2309_v11 = vadd.f32 %v2308_v10, %v2269_v9 }
 0x194   :  { %v2939_v12 = vpop.f32.mrf.mxu0 }
 0x195   :  { %v2314_v13 = vmax.f32 %v2309_v11, 0.0 }
 0x196   :  { %v2311_v14 = vpop.f32.mrf.mxu0 }
 0x197   :  { %v2315_v15 = vpack.c.bf16 %v2314_v13, %v2314_v13 }
 0x198   :  { %v2940_v16 = vpop.f32.mrf.mxu0 }
 0x199   :  { %2958 = vmatmul.mubr.bf16.vlgmr.msra.gmra.mxu1 %v2315_v15 }
 0x259   :  { %v2421_v18 = vpop.f32.mrf.mxu1 }
 0x25a   :  { %v2422_v19 = vadd.f32 %v2642_v17, %v2421_v18 }
 0x25b   :  { %v2959_v20 = vpop.f32.mrf.mxu1 }
 0x25c   :  { %2428 = vst.msk [vmem:[#allocation2] sm:$0x3] %vm2427_vm2, %v2422_v19 }
 0x25d   :  { %v2424_v21 = vpop.f32.mrf.mxu1 }
 0x25e   :  { %3183 = shalt.err (!%p3180_p4)
}
 0x25f   :  { %2438 = dma.vmem_to_hbm [thread:$0]  %s2436_s10, 32, %s3916_s5, [#allocation3]   ;;  %v2960_v22 = vpop.f32.mrf.mxu1 }
 0x260   :  { %3192 = dma.done.wait [#allocation3], 32  }
 0x261   :  { %3193 = vsyncadd [#allocation3], 4294967264 }
 0x262   :  { %2442 = vsyncpa [#allocation3], 1 }

// kernel: simple_cnn_forward.4
= control target key start
LH: loop header
LB: loop body
LE: loop exit
PB: predicated region body
PF: predicated region fallthrough
CT: control target
= control target key end

     0   :  { %8 = vsyncpa [#allocation3], 0  ;;  %s8118_s0 = inlined_call_operand.vmem [shape: bf16[2,16,512], index: 0, kind: input, shape index: {}]   ;;  %s8119_s1 = inlined_call_operand.hbm [shape: bf16[3,512,896], index: 1, kind: input, shape index: {}]   ;;  %s8120_s2 = inlined_call_operand.hbm [shape: f32[1,448], index: 2, kind: input, shape index: {}]   ;;  %s8121_s3 = inlined_call_operand.vmem [shape: bf16[2,7,448], index: 3, kind: output, shape index: {}]  }
   0x1   :  { %9 = vsyncpa [#allocation5], 0  ;;  %s7756_s12 = smov 0  }
   0x2 LB: > { %s7762_s13 = sadd.s32 4294967295, %s7729_s12   ;;  %p5830_p0 = scmp.ge.s32.totalorder %s7729_s12, 1  ;;  %s7729_s12 = sphi %s7756_s12, %s15_s12  }
   0x3   : > { %p114_p1 = scmp.lt.s32.totalorder %s7729_s12, 3  ;;  %s7731_s14 = smov [#allocation2]  }
   0x4   : > { %s126_s15 = sshll.u32 %s7731_s14, 4  ;;  %p6672_p3 = scmp.eq.s32.totalorder %s7762_s13, 0  ;;  %s127_s15 = int_to_ptr.vmem [resolvable:$true] %s126_s15 }
   0x5   : > { %p7766_p2 = pnand %p5830_p0, %p114_p1  ;;  %s7732_s17 = smov [#allocation4]  }
   0x6   : > { %s140_s18 = sshll.u32 %s7732_s17, 4  ;;  %s7674_s20 = scalar_lea.vmem %s127_s15, 86016  ;;  %s141_s18 = int_to_ptr.vmem [resolvable:$true] %s140_s18 }
   0x7   : > { %p6665_p4 = pneg %p7766_p2  ;;  %p7675_p7 = scmp.ne.s32.totalorder %s127_s15, %s7674_s20 }
   0x8   : > { %p7682_p10 = scmp.lt.s32.totalorder %s127_s15, %s127_s15  ;;  %p7683_p11 = scmp.lt.s32.totalorder %s7674_s20, %s7674_s20 }
   0x9   : > { %p7775_p5 = pnand %p6672_p3, %p6665_p4 }
   0xa   : > { %p7684_p12 = por %p7683_p11, %p7682_p10 }
   0xb   : > { %p7665_p6 = pneg %p7775_p5 }
   0xd   : > { %p7677_p8 = pnand %p7675_p7, %p7665_p6 }
   0xf   : > { %p7678_p9 = pneg %p7677_p8 }
  0x11   : > { %p7685_p13 = pnand %p7684_p12, %p7678_p9 }
  0x13   : > { %7688 = shalt.err (!%p7685_p13)
}
  0x14   : > { %s7733_s21 = smov 448   ;;  %s7734_s22 = smov 28  }
  0x15   : > { %6668 = dma.hbm_to_vmem [thread:$0]  (!%p7775_p5), %s8119_s1, 86016, %s127_s15, [#allocation3], %s7733_s21, %s7733_s21, %s7734_s22  }
  0x16   : > { %s7700_s25 = scalar_lea.vmem %s141_s18, 64  ;;  %p7708_p7 = scmp.lt.s32.totalorder %s141_s18, %s141_s18 }
  0x17   : > { %p7701_p0 = scmp.ne.s32.totalorder %s141_s18, %s7700_s25  ;;  %p7709_p8 = scmp.lt.s32.totalorder %s7700_s25, %s7700_s25 }
  0x19   : > { %p7703_p1 = pnand %p7701_p0, %p7665_p6  ;;  %p7710_p10 = por %p7709_p8, %p7708_p7 }
  0x1b   : > { %p7704_p4 = pneg %p7703_p1 }
  0x1d   : > { %p7711_p9 = pnand %p7710_p10, %p7704_p4 }
  0x1f   : > { %7714 = shalt.err (!%p7711_p9)
}
  0x20   : > { %6671 = dma.hbm_to_vmem [thread:$0]  (!%p7775_p5), %s8120_s2, 64, %s141_s18, [#allocation5]  }
  0x21   : > { %161 = sbr.rel (%p7766_p2) target bundleno = 1056 (0x420), region = 32 }
  0x26   : > { %7720 = dma.done.wait (%p6672_p3), [#allocation3], 86016  }
  0x27   : > { %7722 = vsyncadd (%p6672_p3), [#allocation3], 4294881280 }
  0x28   : > { %7724 = dma.done.wait (%p6672_p3), [#allocation5], 64  }
  0x29   : > { %7726 = vsyncadd (%p6672_p3), [#allocation5], 4294967232  ;;  %v6689_v0 = vld [vmem:[#allocation2 + $0x88c] ss:$28 sps:$4 sm:$0xff]   ;;  %v6695_v4 = vld [vmem:[#allocation2 + $0x854] ss:$28 sps:$4 sm:$0xff]  }
  0x2a   : > { %v6691_v1 = vld [vmem:[#allocation2 + $0xc0c] ss:$28 sps:$4 sm:$0xff]   ;;  %2175 = vmatprep.subr.bf16.mxu0 %v6689_v0  ;;  %v6697_v5 = vld [vmem:[#allocation2 + $0xbd4] ss:$28 sps:$4 sm:$0xff]   ;;  %v6701_v8 = vld [vmem:[#allocation2 + $0x81c] ss:$28 sps:$4 sm:$0xff]  }
  0x2b   : > { %v6693_v2 = vld [vmem:[#allocation2 + $0x888] ss:$28 sps:$4 sm:$0xff]   ;;  %2218 = vmatprep.subr.bf16.mxu1 %v6691_v1  ;;  %v6699_v6 = vld [vmem:[#allocation2 + $0x850] ss:$28 sps:$4 sm:$0xff]   ;;  %v6703_v9 = vld [vmem:[#allocation2 + $0xb9c] ss:$28 sps:$4 sm:$0xff]  }
  0x2c   : > { %v6694_v3 = vld [vmem:[#allocation2 + $0xc08] ss:$28 sps:$4 sm:$0xff]   ;;  %2176 = vmatpush1.bf16.msra.mxu0 %v6693_v2  ;;  %v6700_v7 = vld [vmem:[#allocation2 + $0xbd0] ss:$28 sps:$4 sm:$0xff]   ;;  %v6705_v10 = vld [vmem:[#allocation2 + $0x818] ss:$28 sps:$4 sm:$0xff]  }
  0x2d   : > { %2219 = vmatpush1.bf16.msra.mxu1 %v6694_v3  ;;  %2177 = vmatprep.subr.bf16.mxu0 %v6695_v4  ;;  %v6706_v11 = vld [vmem:[#allocation2 + $0xb98] ss:$28 sps:$4 sm:$0xff]   ;;  %v6707_v12 = vld [vmem:[#allocation2 + $0x7e4] ss:$28 sps:$4 sm:$0xff]   ;;  %v6713_v16 = vld [vmem:[#allocation2 + $0x7ac] ss:$28 sps:$4 sm:$0xff]  }
  0x2e   : > { %2220 = vmatprep.subr.bf16.mxu1 %v6697_v5  ;;  %v6709_v13 = vld [vmem:[#allocation2 + $0xb64] ss:$28 sps:$4 sm:$0xff]   ;;  %v6715_v17 = vld [vmem:[#allocation2 + $0xb2c] ss:$28 sps:$4 sm:$0xff]   ;;  %v6719_v20 = vld [vmem:[#allocation2 + $0x774] ss:$28 sps:$4 sm:$0xff]  }
  0x2f   : > { %v6711_v14 = vld [vmem:[#allocation2 + $0x7e0] ss:$28 sps:$4 sm:$0xff]   ;;  %v6717_v18 = vld [vmem:[#allocation2 + $0x7a8] ss:$28 sps:$4 sm:$0xff]   ;;  %v6721_v21 = vld [vmem:[#allocation2 + $0xaf4] ss:$28 sps:$4 sm:$0xff]  }
  0x30   : > { %2178 = vmatpush1.bf16.msra.mxu0 %v6699_v6  ;;  %v6712_v15 = vld [vmem:[#allocation2 + $0xb60] ss:$28 sps:$4 sm:$0xff]   ;;  %v6718_v19 = vld [vmem:[#allocation2 + $0xb28] ss:$28 sps:$4 sm:$0xff]   ;;  %v6723_v22 = vld [vmem:[#allocation2 + $0x770] ss:$28 sps:$4 sm:$0xff]  }
  0x31   : > { %2221 = vmatpush1.bf16.msra.mxu1 %v6700_v7  ;;  %2179 = vmatprep.subr.bf16.mxu0 %v6701_v8  ;;  %v6724_v23 = vld [vmem:[#allocation2 + $0xaf0] ss:$28 sps:$4 sm:$0xff]   ;;  %v6725_v24 = vld [vmem:[#allocation2 + $0x73c] ss:$28 sps:$4 sm:$0xff]   ;;  %v6731_v28 = vld [vmem:[#allocation2 + $0x704] ss:$28 sps:$4 sm:$0xff]  }
  0x32   : > { %2222 = vmatprep.subr.bf16.mxu1 %v6703_v9  ;;  %v6727_v25 = vld [vmem:[#allocation2 + $0xabc] ss:$28 sps:$4 sm:$0xff]   ;;  %v6733_v29 = vld [vmem:[#allocation2 + $0xa84] ss:$28 sps:$4 sm:$0xff]   ;;  %v6737_v32 = vld [vmem:[#allocation2 + $0xa4c] ss:$28 sps:$4 sm:$0xff]  }
  0x33   : > { %v6729_v26 = vld [vmem:[#allocation2 + $0x738] ss:$28 sps:$4 sm:$0xff]   ;;  %v6735_v30 = vld [vmem:[#allocation2 + $0x700] ss:$28 sps:$4 sm:$0xff]   ;;  %v6739_v33 = vld [vmem:[#allocation2 + $0xdcc] ss:$28 sps:$4 sm:$0xff]  }
  0x34   : > { %2180 = vmatpush1.bf16.msra.mxu0 %v6705_v10  ;;  %v6730_v27 = vld [vmem:[#allocation2 + $0xab8] ss:$28 sps:$4 sm:$0xff]   ;;  %v6736_v31 = vld [vmem:[#allocation2 + $0xa80] ss:$28 sps:$4 sm:$0xff]   ;;  %p189_p2 = scmp.lt.s32.totalorder %s7762_s13, 1  ;;  %s7735_s5 = smov 64  }
  0x35   : > { %2223 = vmatpush1.bf16.msra.mxu1 %v6706_v11  ;;  %2181 = vmatprep.subr.bf16.mxu0 %v6707_v12  ;;  %v6741_v34 = vld [vmem:[#allocation2 + $0xa48] ss:$28 sps:$4 sm:$0xff]   ;;  %v6743_v36 = vld [vmem:[#allocation2 + $0xa14] ss:$28 sps:$4 sm:$0xff]   ;;  %v6749_v40 = vld [vmem:[#allocation2 + $0x9dc] ss:$28 sps:$4 sm:$0xff]  }
  0x36   : > { %2224 = vmatprep.subr.bf16.mxu1 %v6709_v13  ;;  %v6742_v35 = vld [vmem:[#allocation2 + $0xdc8] ss:$28 sps:$4 sm:$0xff]   ;;  %v6745_v37 = vld [vmem:[#allocation2 + $0xd94] ss:$28 sps:$4 sm:$0xff]   ;;  %s8127_s13 = smov (!%p189_p2, %s7762_s13), 1  ;;  %vm5549_vm0 = vcmask 523264  }
  0x37   : > { %v6747_v38 = vld [vmem:[#allocation2 + $0xa10] ss:$28 sps:$4 sm:$0xff]   ;;  %v6751_v41 = vld [vmem:[#allocation2 + $0xd5c] ss:$28 sps:$4 sm:$0xff]   ;;  %s6521_s28 = sshll.u32 %s8127_s13, 5  ;;  %vm5660_vm1 = vcmask 1040384  }
  0x38   : > { %2182 = vmatpush1.bf16.msra.mxu0 %v6711_v14  ;;  %v6748_v39 = vld [vmem:[#allocation2 + $0xd90] ss:$28 sps:$4 sm:$0xff]   ;;  %v6753_v42 = vld [vmem:[#allocation2 + $0x9d8] ss:$28 sps:$4 sm:$0xff]   ;;  %v6755_v44 = vld [vmem:[#allocation2 + $0x9a4] ss:$28 sps:$4 sm:$0xff]   ;;  %s7815_s4 = scalar_lea.vmem %s8118_s0, %s6521_s28 }
  0x39   : > { %2225 = vmatpush1.bf16.msra.mxu1 %v6712_v15  ;;  %2183 = vmatprep.subr.bf16.mxu0 %v6713_v16  ;;  %v6754_v43 = vld [vmem:[#allocation2 + $0xd58] ss:$28 sps:$4 sm:$0xff]   ;;  %v6757_v45 = vld [vmem:[#allocation2 + $0xd24] ss:$28 sps:$4 sm:$0xff]   ;;  %v6761_v49 = vld [vmem:[#allocation2 + $0x96c] ss:$28 sps:$4 sm:$0xff]  }
  0x3a   : > { %2226 = vmatprep.subr.bf16.mxu1 %v6715_v17  ;;  %v6759_v46 = vld [vmem:[#allocation2 + $0x9a0] ss:$28 sps:$4 sm:$0xff]   ;;  %v6785_v48 = vld [vmem:[%s7815_s4 + $0x4] ss:$16 sps:$4 sm:$0xff]   ;;  %v6763_v51 = vld [vmem:[#allocation2 + $0xcec] ss:$28 sps:$4 sm:$0xff]  }
  0x3b   : > { %v6760_v47 = vld [vmem:[#allocation2 + $0xd20] ss:$28 sps:$4 sm:$0xff]   ;;  %v999_v52 = vshrl.u32 %v6785_v48, 16  ;;  %v1001_v53 = vshll.u32 %v6785_v48, 16  ;;  %v6765_v56 = vld [vmem:[#allocation2 + $0x968] ss:$28 sps:$4 sm:$0xff]  }
  0x3c   : > { %2184 = vmatpush1.bf16.msra.mxu0 %v6717_v18  ;;  %v6787_v50 = vld [vmem:[%s7815_s4 + $0xc] ss:$16 sps:$4 sm:$0xff]   ;;  %v6766_v58 = vld [vmem:[#allocation2 + $0xce8] ss:$28 sps:$4 sm:$0xff]   ;;  %v6767_v60 = vld [vmem:[#allocation2 + $0x934] ss:$28 sps:$4 sm:$0xff]  }
  0x3d   : > { %2227 = vmatpush1.bf16.msra.mxu1 %v6718_v19  ;;  %2185 = vmatprep.subr.bf16.mxu0 %v6719_v20  ;;  %v1013_v54 = vshrl.u32 %v6787_v50, 16  ;;  %v1015_v55 = vshll.u32 %v6787_v50, 16  ;;  %v1003_v57 = vrot.slane %v1001_v53, 1  ;;  %v6769_v61 = vld [vmem:[#allocation2 + $0xcb4] ss:$28 sps:$4 sm:$0xff]   ;;  %vm5665_vm2 = vcmask 1041408  }
  0x3e   : > { %2228 = vmatprep.subr.bf16.mxu1 %v6721_v21  ;;  %v6771_v63 = vld [vmem:[#allocation2 + $0x930] ss:$28 sps:$4 sm:$0xff]   ;;  %v6790_v2 = vld [vmem:[%s7815_s4 + $0x8] ss:$16 sps:$4 sm:$0xff]   ;;  %v6779_v10 = vld [vmem:[#allocation2 + $0x8c4] ss:$28 sps:$4 sm:$0xff]  }
  0x3f   : > { %v1017_v59 = vrot.slane %v1015_v55, 1  ;;  %v7819_v62 = vor.u32 %v1003_v57, %v999_v52  ;;  %v6789_v1 = vld [vmem:[%s7815_s4] ss:$16 sps:$4 sm:$0xff]   ;;  %v6773_v4 = vld [vmem:[#allocation2 + $0x8fc] ss:$28 sps:$4 sm:$0xff]   ;;  %v1008_v8 = vshll.u32 %v6790_v2, 16 }
  0x40   : > { %2186 = vmatpush1.bf16.msra.mxu0 %v6723_v22  ;;  %v6772_v3 = vld [vmem:[#allocation2 + $0xcb0] ss:$28 sps:$4 sm:$0xff]   ;;  %v6775_v5 = vld [vmem:[#allocation2 + $0xc7c] ss:$28 sps:$4 sm:$0xff]   ;;  %v994_v7 = vshll.u32 %v6789_v1, 16  ;;  %v992_v13 = vshrl.u32 %v6789_v1, 16 }
  0x41   : > { %2229 = vmatpush1.bf16.msra.mxu1 %v6724_v23  ;;  %2187 = vmatprep.subr.bf16.mxu0 %v6725_v24  ;;  %v7821_v0 = vor.u32 %v1017_v59, %v1013_v54  ;;  %v6777_v6 = vld [vmem:[#allocation2 + $0x8f8] ss:$28 sps:$4 sm:$0xff]   ;;  %v6781_v11 = vld [vmem:[#allocation2 + $0xc44] ss:$28 sps:$4 sm:$0xff]   ;;  %v1006_v15 = vshrl.u32 %v6790_v2, 16  ;;  %v1010_v16 = vrot.slane %v1008_v8, 1 }
  0x42   : > { %2230 = vmatprep.subr.bf16.mxu1 %v6727_v25  ;;  %2207 = vmatprep.mubr.bf16.mxu0 %v7819_v62  ;;  %v6778_v9 = vld [vmem:[#allocation2 + $0xc78] ss:$28 sps:$4 sm:$0xff]   ;;  %v6783_v12 = vld [vmem:[#allocation2 + $0x8c0] ss:$28 sps:$4 sm:$0xff]   ;;  %v996_v14 = vrot.slane %v994_v7, 1  ;;  %vm5670_vm3 = vcmask 1042432  }
  0x43   : > { %2250 = vmatprep.mubr.bf16.mxu1 %v7821_v0  ;;  %v6784_v17 = vld [vmem:[#allocation2 + $0xc40] ss:$28 sps:$4 sm:$0xff]   ;;  %v6793_v18 = vld [vmem:[#allocation2 + $0x894] ss:$28 sps:$4 sm:$0xff]   ;;  %v7829_v21 = vor.u32 %v1010_v16, %v1006_v15  ;;  %v6835_v48 = vld [vmem:[#allocation2 + $0x70c] ss:$28 sps:$4 sm:$0xff]  }
  0x44   : > { %2188 = vmatpush1.bf16.msra.mxu0 %v6729_v26  ;;  %v6796_v19 = vld [vmem:[#allocation2 + $0xc14] ss:$28 sps:$4 sm:$0xff]   ;;  %v7827_v20 = vor.u32 %v996_v14, %v992_v13  ;;  %v6799_v24 = vld [vmem:[#allocation2 + $0x85c] ss:$28 sps:$4 sm:$0xff]   ;;  %v6833_v50 = vld [vmem:[#allocation2 + $0x708] ss:$28 sps:$4 sm:$0xff]  }
  0x45   : > { %2231 = vmatpush1.bf16.msra.mxu1 %v6730_v27  ;;  %2189 = vmatprep.subr.bf16.mxu0 %v6731_v28  ;;  %v6791_v22 = vld [vmem:[#allocation2 + $0x890] ss:$28 sps:$4 sm:$0xff]   ;;  %v6802_v25 = vld [vmem:[#allocation2 + $0xbdc] ss:$28 sps:$4 sm:$0xff]   ;;  %v6805_v28 = vld [vmem:[#allocation2 + $0x824] ss:$28 sps:$4 sm:$0xff]  }
  0x46   : > { %2232 = vmatprep.subr.bf16.mxu1 %v6733_v29  ;;  %v6794_v23 = vld [vmem:[#allocation2 + $0xc10] ss:$28 sps:$4 sm:$0xff]   ;;  %v6797_v26 = vld [vmem:[#allocation2 + $0x858] ss:$28 sps:$4 sm:$0xff]   ;;  %v6808_v29 = vld [vmem:[#allocation2 + $0xba4] ss:$28 sps:$4 sm:$0xff]  }
  0x47   : > { %v6800_v27 = vld [vmem:[#allocation2 + $0xbd8] ss:$28 sps:$4 sm:$0xff]   ;;  %v6839_v54 = vld [vmem:[#allocation2 + $0xa50] ss:$28 sps:$4 sm:$0xff]   ;;  %v6854_v1 = vld [vmem:[#allocation2 + $0xd60] ss:$28 sps:$4 sm:$0xff]  }
  0x48   : > { %2190 = vmatpush1.bf16.msra.mxu0 %v6735_v30  ;;  %v6803_v30 = vld [vmem:[#allocation2 + $0x820] ss:$28 sps:$4 sm:$0xff]   ;;  %v6841_v52 = vld [vmem:[#allocation2 + $0xa54] ss:$28 sps:$4 sm:$0xff]   ;;  %v6859_v2 = vld [vmem:[#allocation2 + $0x9ac] ss:$28 sps:$4 sm:$0xff]  }
  0x49   : > { %2233 = vmatpush1.bf16.msra.mxu1 %v6736_v31  ;;  %2191 = vmatprep.subr.bf16.mxu0 %v6737_v32  ;;  %v6806_v31 = vld [vmem:[#allocation2 + $0xba0] ss:$28 sps:$4 sm:$0xff]   ;;  %v6811_v32 = vld [vmem:[#allocation2 + $0x7ec] ss:$28 sps:$4 sm:$0xff]   ;;  %v6844_v53 = vld [vmem:[#allocation2 + $0xdd4] ss:$28 sps:$4 sm:$0xff]  }
  0x4a   : > { %2234 = vmatprep.subr.bf16.mxu1 %v6739_v33  ;;  %v6814_v33 = vld [vmem:[#allocation2 + $0xb6c] ss:$28 sps:$4 sm:$0xff]   ;;  %v6850_v57 = vld [vmem:[#allocation2 + $0xd9c] ss:$28 sps:$4 sm:$0xff]   ;;  %v6868_v7 = vld [vmem:[#allocation2 + $0xcf4] ss:$28 sps:$4 sm:$0xff]  }
  0x4b   : > { %v6842_v55 = vld [vmem:[#allocation2 + $0xdd0] ss:$28 sps:$4 sm:$0xff]   ;;  %v6848_v59 = vld [vmem:[#allocation2 + $0xd98] ss:$28 sps:$4 sm:$0xff]   ;;  %v6877_v14 = vld [vmem:[#allocation2 + $0x904] ss:$28 sps:$4 sm:$0xff]  }
  0x4c   : > { %2192 = vmatpush2.bf16.msra.mxu0 %v6741_v34  ;;  %v6809_v34 = vld [vmem:[#allocation2 + $0x7e8] ss:$28 sps:$4 sm:$0xff]   ;;  %v6863_v8 = vld [vmem:[#allocation2 + $0x970] ss:$28 sps:$4 sm:$0xff]   ;;  %v6872_v13 = vld [vmem:[#allocation2 + $0xcb8] ss:$28 sps:$4 sm:$0xff]  }
  0x4d   : > { %2235 = vmatpush2.bf16.msra.mxu1 %v6742_v35  ;;  %2193 = vmatprep.subr.bf16.mxu0 %v6743_v36  ;;  %v6812_v35 = vld [vmem:[#allocation2 + $0xb68] ss:$28 sps:$4 sm:$0xff]   ;;  %v6817_v36 = vld [vmem:[#allocation2 + $0x7b4] ss:$28 sps:$4 sm:$0xff]   ;;  %v6875_v16 = vld [vmem:[#allocation2 + $0x900] ss:$28 sps:$4 sm:$0xff]  }
  0x4e   : > { %2236 = vmatprep.subr.bf16.mxu1 %v6745_v37  ;;  %v6820_v37 = vld [vmem:[#allocation2 + $0xb34] ss:$28 sps:$4 sm:$0xff]   ;;  %v6880_v15 = vld [vmem:[#allocation2 + $0xc84] ss:$28 sps:$4 sm:$0xff]   ;;  %vm5675_vm4 = vcmask 1043456   ;;  %vm5680_vm5 = vcmask 1044480  }
  0x4f   : > { %vm5685_vm6 = vcmask 1045504   ;;  %vm5736_vm7 = vsmask.f32 3328  ;;  %vm5738_vm8 = vcmask 1047556   ;;  %vm5739_vm9 = vsmask.f32 7424 }
  0x50   : > { %2194 = vmatpush2.bf16.msra.mxu0 %v6747_v38  ;;  %v6815_v38 = vld [vmem:[#allocation2 + $0x7b0] ss:$28 sps:$4 sm:$0xff]   ;;  %s6522_s6 = sshll.u32 %s8127_s13, 4  ;;  %vm8070_vm10 = vmand %vm5675_vm4, %vm5736_vm7  ;;  %vm5745_vm13 = vcmask 523268  }
  0x51   : > { %2237 = vmatpush2.bf16.msra.mxu1 %v6748_v39  ;;  %2195 = vmatprep.subr.bf16.mxu0 %v6749_v40  ;;  %v6818_v39 = vld [vmem:[#allocation2 + $0xb30] ss:$28 sps:$4 sm:$0xff]   ;;  %v6823_v40 = vld [vmem:[#allocation2 + $0x77c] ss:$28 sps:$4 sm:$0xff]   ;;  %s8078_s9 = scalar_lea.vmem %s8121_s3, %s6522_s6  ;;  %vm5740_vm11 = vmand %vm5738_vm8, %vm5739_vm9 }
  0x52   : > { %2238 = vmatprep.subr.bf16.mxu1 %v6751_v41  ;;  %v6826_v41 = vld [vmem:[#allocation2 + $0xafc] ss:$28 sps:$4 sm:$0xff]   ;;  %vm5741_vm12 = vmor %vm5740_vm11, %vm8070_vm10 }
  0x53   : > { %vm5746_vm14 = vmand %vm5745_vm13, %vm5739_vm9 }
  0x54   : > { %2196 = vmatpush2.bf16.msra.mxu0 %v6753_v42  ;;  %v6821_v42 = vld [vmem:[#allocation2 + $0x778] ss:$28 sps:$4 sm:$0xff]   ;;  %vm5747_vm15 = vmor %vm5746_vm14, %vm8070_vm10 }
  0x55   : > { %2239 = vmatpush2.bf16.msra.mxu1 %v6754_v43  ;;  %2197 = vmatprep.subr.bf16.mxu0 %v6755_v44  ;;  %v6824_v43 = vld [vmem:[#allocation2 + $0xaf8] ss:$28 sps:$4 sm:$0xff]   ;;  %v6829_v44 = vld [vmem:[#allocation2 + $0x744] ss:$28 sps:$4 sm:$0xff]  }
  0x56   : > { %2240 = vmatprep.subr.bf16.mxu1 %v6757_v45  ;;  %v6832_v45 = vld [vmem:[#allocation2 + $0xac4] ss:$28 sps:$4 sm:$0xff]  }
  0x58   : > { %2198 = vmatpush2.bf16.msra.mxu0 %v6759_v46  ;;  %v6827_v46 = vld [vmem:[#allocation2 + $0x740] ss:$28 sps:$4 sm:$0xff]  }
  0x59   : > { %2241 = vmatpush2.bf16.msra.mxu1 %v6760_v47  ;;  %2199 = vmatprep.subr.bf16.mxu0 %v6761_v49  ;;  %v6830_v47 = vld [vmem:[#allocation2 + $0xac0] ss:$28 sps:$4 sm:$0xff]   ;;  %v6838_v49 = vld [vmem:[#allocation2 + $0xa8c] ss:$28 sps:$4 sm:$0xff]  }
  0x5a   : > { %2242 = vmatprep.subr.bf16.mxu1 %v6763_v51  ;;  %v6836_v51 = vld [vmem:[#allocation2 + $0xa88] ss:$28 sps:$4 sm:$0xff]  }
  0x5c   : > { %2200 = vmatpush2.bf16.msra.mxu0 %v6765_v56  ;;  %v6847_v56 = vld [vmem:[#allocation2 + $0xa1c] ss:$28 sps:$4 sm:$0xff]  }
  0x5d   : > { %2243 = vmatpush2.bf16.msra.mxu1 %v6766_v58  ;;  %2201 = vmatprep.subr.bf16.mxu0 %v6767_v60  ;;  %v6845_v58 = vld [vmem:[#allocation2 + $0xa18] ss:$28 sps:$4 sm:$0xff]   ;;  %v6853_v60 = vld [vmem:[#allocation2 + $0x9e4] ss:$28 sps:$4 sm:$0xff]  }
  0x5e   : > { %2244 = vmatprep.subr.bf16.mxu1 %v6769_v61  ;;  %v6856_v61 = vld [vmem:[#allocation2 + $0xd64] ss:$28 sps:$4 sm:$0xff]  }
  0x60   : > { %2202 = vmatpush2.bf16.msra.mxu0 %v6771_v63  ;;  %v6851_v63 = vld [vmem:[#allocation2 + $0x9e0] ss:$28 sps:$4 sm:$0xff]  }
  0x61   : > { %2245 = vmatpush2.bf16.msra.mxu1 %v6772_v3  ;;  %2203 = vmatprep.subr.bf16.mxu0 %v6773_v4  ;;  %v6862_v3 = vld [vmem:[#allocation2 + $0xd2c] ss:$28 sps:$4 sm:$0xff]  }
  0x62   : > { %2246 = vmatprep.subr.bf16.mxu1 %v6775_v5  ;;  %v6857_v4 = vld [vmem:[#allocation2 + $0x9a8] ss:$28 sps:$4 sm:$0xff]  }
  0x63   : > { %v6860_v5 = vld [vmem:[#allocation2 + $0xd28] ss:$28 sps:$4 sm:$0xff]  }
  0x64   : > { %2204 = vmatpush2.bf16.msra.mxu0 %v6777_v6  ;;  %v6865_v6 = vld [vmem:[#allocation2 + $0x974] ss:$28 sps:$4 sm:$0xff]  }
  0x65   : > { %2247 = vmatpush2.bf16.msra.mxu1 %v6778_v9  ;;  %2205 = vmatprep.subr.bf16.mxu0 %v6779_v10  ;;  %v6866_v9 = vld [vmem:[#allocation2 + $0xcf0] ss:$28 sps:$4 sm:$0xff]   ;;  %v6871_v10 = vld [vmem:[#allocation2 + $0x93c] ss:$28 sps:$4 sm:$0xff]  }
  0x66   : > { %2248 = vmatprep.subr.bf16.mxu1 %v6781_v11  ;;  %v6874_v11 = vld [vmem:[#allocation2 + $0xcbc] ss:$28 sps:$4 sm:$0xff]  }
  0x68   : > { %2206 = vmatpush2.bf16.msra.mxu0 %v6783_v12  ;;  %v6869_v12 = vld [vmem:[#allocation2 + $0x938] ss:$28 sps:$4 sm:$0xff]  }
  0x69   : > { %2249 = vmatpush2.bf16.msra.mxu1 %v6784_v17  ;;  %2261 = vmatprep.subr.bf16.mxu0 %v6793_v18  ;;  %v6878_v17 = vld [vmem:[#allocation2 + $0xc80] ss:$28 sps:$4 sm:$0xff]   ;;  %v6883_v18 = vld [vmem:[#allocation2 + $0x8cc] ss:$28 sps:$4 sm:$0xff]  }
  0x6a   : > { %2304 = vmatprep.subr.bf16.mxu1 %v6796_v19  ;;  %v6886_v19 = vld [vmem:[#allocation2 + $0xc4c] ss:$28 sps:$4 sm:$0xff]  }
  0x6b   : > { %2208 = vmatmul.mubr.bf16.vlgmr.msra.gmra.mxu0 %v7827_v20 }
  0x6c   : > { %2251 = vmatmul.mubr.bf16.vlgmr.msra.gmra.mxu1 %v7829_v21  ;;  %2262 = vmatpush1.bf16.msra.mxu0 %v6791_v22  ;;  %v6881_v22 = vld [vmem:[#allocation2 + $0x8c8] ss:$28 sps:$4 sm:$0xff]  }
  0x6d   : > { %2305 = vmatpush1.bf16.msra.mxu1 %v6794_v23  ;;  %2263 = vmatprep.subr.bf16.mxu0 %v6799_v24  ;;  %v6884_v23 = vld [vmem:[#allocation2 + $0xc48] ss:$28 sps:$4 sm:$0xff]   ;;  %v6889_v24 = vld [vmem:[#allocation2 + $0x89c] ss:$28 sps:$4 sm:$0xff]  }
  0x6e   : > { %2306 = vmatprep.subr.bf16.mxu1 %v6802_v25  ;;  %2293 = vmatprep.mubr.bf16.mxu0 %v7819_v62  ;;  %v6892_v25 = vld [vmem:[#allocation2 + $0xc1c] ss:$28 sps:$4 sm:$0xff]  }
  0x6f   : > { %2336 = vmatprep.mubr.bf16.mxu1 %v7821_v0 }
  0x70   : > { %2264 = vmatpush1.bf16.msra.mxu0 %v6797_v26  ;;  %v6887_v26 = vld [vmem:[#allocation2 + $0x898] ss:$28 sps:$4 sm:$0xff]  }
  0x71   : > { %2307 = vmatpush1.bf16.msra.mxu1 %v6800_v27  ;;  %2265 = vmatprep.subr.bf16.mxu0 %v6805_v28  ;;  %v6890_v27 = vld [vmem:[#allocation2 + $0xc18] ss:$28 sps:$4 sm:$0xff]   ;;  %v6895_v28 = vld [vmem:[#allocation2 + $0x864] ss:$28 sps:$4 sm:$0xff]  }
  0x72   : > { %2308 = vmatprep.subr.bf16.mxu1 %v6808_v29  ;;  %v6898_v29 = vld [vmem:[#allocation2 + $0xbe4] ss:$28 sps:$4 sm:$0xff]  }
  0x74   : > { %2266 = vmatpush1.bf16.msra.mxu0 %v6803_v30  ;;  %v6893_v30 = vld [vmem:[#allocation2 + $0x860] ss:$28 sps:$4 sm:$0xff]  }
  0x75   : > { %2309 = vmatpush1.bf16.msra.mxu1 %v6806_v31  ;;  %2267 = vmatprep.subr.bf16.mxu0 %v6811_v32  ;;  %v6896_v31 = vld [vmem:[#allocation2 + $0xbe0] ss:$28 sps:$4 sm:$0xff]   ;;  %v6901_v32 = vld [vmem:[#allocation2 + $0x82c] ss:$28 sps:$4 sm:$0xff]  }
  0x76   : > { %2310 = vmatprep.subr.bf16.mxu1 %v6814_v33  ;;  %v6904_v33 = vld [vmem:[#allocation2 + $0xbac] ss:$28 sps:$4 sm:$0xff]  }
  0x78   : > { %2268 = vmatpush1.bf16.msra.mxu0 %v6809_v34  ;;  %v6899_v34 = vld [vmem:[#allocation2 + $0x828] ss:$28 sps:$4 sm:$0xff]  }
  0x79   : > { %2311 = vmatpush1.bf16.msra.mxu1 %v6812_v35  ;;  %2269 = vmatprep.subr.bf16.mxu0 %v6817_v36  ;;  %v6902_v35 = vld [vmem:[#allocation2 + $0xba8] ss:$28 sps:$4 sm:$0xff]   ;;  %v6907_v36 = vld [vmem:[#allocation2 + $0x7f4] ss:$28 sps:$4 sm:$0xff]  }
  0x7a   : > { %2312 = vmatprep.subr.bf16.mxu1 %v6820_v37  ;;  %v6910_v37 = vld [vmem:[#allocation2 + $0xb74] ss:$28 sps:$4 sm:$0xff]  }
  0x7c   : > { %2270 = vmatpush1.bf16.msra.mxu0 %v6815_v38  ;;  %v6905_v38 = vld [vmem:[#allocation2 + $0x7f0] ss:$28 sps:$4 sm:$0xff]  }
  0x7d   : > { %2313 = vmatpush1.bf16.msra.mxu1 %v6818_v39  ;;  %2271 = vmatprep.subr.bf16.mxu0 %v6823_v40  ;;  %v6908_v39 = vld [vmem:[#allocation2 + $0xb70] ss:$28 sps:$4 sm:$0xff]   ;;  %v6913_v40 = vld [vmem:[#allocation2 + $0x7bc] ss:$28 sps:$4 sm:$0xff]  }
  0x7e   : > { %2314 = vmatprep.subr.bf16.mxu1 %v6826_v41  ;;  %v6916_v41 = vld [vmem:[#allocation2 + $0xb3c] ss:$28 sps:$4 sm:$0xff]  }
  0x80   : > { %2272 = vmatpush1.bf16.msra.mxu0 %v6821_v42  ;;  %v6911_v42 = vld [vmem:[#allocation2 + $0x7b8] ss:$28 sps:$4 sm:$0xff]  }
  0x81   : > { %2315 = vmatpush1.bf16.msra.mxu1 %v6824_v43  ;;  %2273 = vmatprep.subr.bf16.mxu0 %v6829_v44  ;;  %v6914_v43 = vld [vmem:[#allocation2 + $0xb38] ss:$28 sps:$4 sm:$0xff]   ;;  %v6919_v44 = vld [vmem:[#allocation2 + $0x784] ss:$28 sps:$4 sm:$0xff]  }
  0x82   : > { %2316 = vmatprep.subr.bf16.mxu1 %v6832_v45  ;;  %v6922_v45 = vld [vmem:[#allocation2 + $0xb04] ss:$28 sps:$4 sm:$0xff]  }
  0x84   : > { %2274 = vmatpush1.bf16.msra.mxu0 %v6827_v46  ;;  %v6917_v46 = vld [vmem:[#allocation2 + $0x780] ss:$28 sps:$4 sm:$0xff]  }
  0x85   : > { %2317 = vmatpush1.bf16.msra.mxu1 %v6830_v47  ;;  %2275 = vmatprep.subr.bf16.mxu0 %v6835_v48  ;;  %v6920_v47 = vld [vmem:[#allocation2 + $0xb00] ss:$28 sps:$4 sm:$0xff]   ;;  %v6925_v48 = vld [vmem:[#allocation2 + $0x74c] ss:$28 sps:$4 sm:$0xff]  }
  0x86   : > { %2318 = vmatprep.subr.bf16.mxu1 %v6838_v49  ;;  %v6928_v49 = vld [vmem:[#allocation2 + $0xacc] ss:$28 sps:$4 sm:$0xff]  }
  0x88   : > { %2276 = vmatpush1.bf16.msra.mxu0 %v6833_v50  ;;  %v6923_v50 = vld [vmem:[#allocation2 + $0x748] ss:$28 sps:$4 sm:$0xff]  }
  0x89   : > { %2319 = vmatpush1.bf16.msra.mxu1 %v6836_v51  ;;  %2277 = vmatprep.subr.bf16.mxu0 %v6841_v52  ;;  %v6926_v51 = vld [vmem:[#allocation2 + $0xac8] ss:$28 sps:$4 sm:$0xff]   ;;  %v6931_v52 = vld [vmem:[#allocation2 + $0x714] ss:$28 sps:$4 sm:$0xff]  }
  0x8a   : > { %2320 = vmatprep.subr.bf16.mxu1 %v6844_v53  ;;  %v6934_v53 = vld [vmem:[#allocation2 + $0xa94] ss:$28 sps:$4 sm:$0xff]  }
  0x8c   : > { %2278 = vmatpush2.bf16.msra.mxu0 %v6839_v54  ;;  %v6929_v54 = vld [vmem:[#allocation2 + $0x710] ss:$28 sps:$4 sm:$0xff]  }
  0x8d   : > { %2321 = vmatpush2.bf16.msra.mxu1 %v6842_v55  ;;  %2279 = vmatprep.subr.bf16.mxu0 %v6847_v56  ;;  %v6932_v55 = vld [vmem:[#allocation2 + $0xa90] ss:$28 sps:$4 sm:$0xff]   ;;  %v6937_v56 = vld [vmem:[#allocation2 + $0xa5c] ss:$28 sps:$4 sm:$0xff]  }
  0x8e   : > { %2322 = vmatprep.subr.bf16.mxu1 %v6850_v57  ;;  %v6940_v57 = vld [vmem:[#allocation2 + $0xddc] ss:$28 sps:$4 sm:$0xff]  }
  0x90   : > { %2280 = vmatpush2.bf16.msra.mxu0 %v6845_v58  ;;  %v6935_v58 = vld [vmem:[#allocation2 + $0xa58] ss:$28 sps:$4 sm:$0xff]  }
  0x91   : > { %2323 = vmatpush2.bf16.msra.mxu1 %v6848_v59  ;;  %2281 = vmatprep.subr.bf16.mxu0 %v6853_v60  ;;  %v6938_v59 = vld [vmem:[#allocation2 + $0xdd8] ss:$28 sps:$4 sm:$0xff]   ;;  %v6943_v60 = vld [vmem:[#allocation2 + $0xa24] ss:$28 sps:$4 sm:$0xff]  }
  0x92   : > { %2324 = vmatprep.subr.bf16.mxu1 %v6856_v61  ;;  %v6946_v61 = vld [vmem:[#allocation2 + $0xda4] ss:$28 sps:$4 sm:$0xff]  }
  0x94   : > { %2282 = vmatpush2.bf16.msra.mxu0 %v6851_v63  ;;  %v6941_v63 = vld [vmem:[#allocation2 + $0xa20] ss:$28 sps:$4 sm:$0xff]  }
  0x95   : > { %2325 = vmatpush2.bf16.msra.mxu1 %v6854_v1  ;;  %2283 = vmatprep.subr.bf16.mxu0 %v6859_v2  ;;  %v6944_v1 = vld [vmem:[#allocation2 + $0xda0] ss:$28 sps:$4 sm:$0xff]   ;;  %v6949_v2 = vld [vmem:[#allocation2 + $0x9ec] ss:$28 sps:$4 sm:$0xff]  }
  0x96   : > { %2326 = vmatprep.subr.bf16.mxu1 %v6862_v3  ;;  %v6952_v3 = vld [vmem:[#allocation2 + $0xd6c] ss:$28 sps:$4 sm:$0xff]  }
  0x98   : > { %2284 = vmatpush2.bf16.msra.mxu0 %v6857_v4  ;;  %v6947_v4 = vld [vmem:[#allocation2 + $0x9e8] ss:$28 sps:$4 sm:$0xff]  }
  0x99   : > { %2327 = vmatpush2.bf16.msra.mxu1 %v6860_v5  ;;  %2285 = vmatprep.subr.bf16.mxu0 %v6865_v6  ;;  %v6950_v5 = vld [vmem:[#allocation2 + $0xd68] ss:$28 sps:$4 sm:$0xff]   ;;  %v6955_v6 = vld [vmem:[#allocation2 + $0x9b4] ss:$28 sps:$4 sm:$0xff]  }
  0x9a   : > { %2328 = vmatprep.subr.bf16.mxu1 %v6868_v7  ;;  %v6958_v7 = vld [vmem:[#allocation2 + $0xd34] ss:$28 sps:$4 sm:$0xff]  }
  0x9c   : > { %2286 = vmatpush2.bf16.msra.mxu0 %v6863_v8  ;;  %v6953_v8 = vld [vmem:[#allocation2 + $0x9b0] ss:$28 sps:$4 sm:$0xff]  }
  0x9d   : > { %2329 = vmatpush2.bf16.msra.mxu1 %v6866_v9  ;;  %2287 = vmatprep.subr.bf16.mxu0 %v6871_v10  ;;  %v6956_v9 = vld [vmem:[#allocation2 + $0xd30] ss:$28 sps:$4 sm:$0xff]   ;;  %v6961_v10 = vld [vmem:[#allocation2 + $0x97c] ss:$28 sps:$4 sm:$0xff]  }
  0x9e   : > { %2330 = vmatprep.subr.bf16.mxu1 %v6874_v11  ;;  %v6964_v11 = vld [vmem:[#allocation2 + $0xcfc] ss:$28 sps:$4 sm:$0xff]  }
  0xa0   : > { %2288 = vmatpush2.bf16.msra.mxu0 %v6869_v12  ;;  %v6959_v12 = vld [vmem:[#allocation2 + $0x978] ss:$28 sps:$4 sm:$0xff]  }
  0xa1   : > { %2331 = vmatpush2.bf16.msra.mxu1 %v6872_v13  ;;  %2289 = vmatprep.subr.bf16.mxu0 %v6877_v14  ;;  %v6962_v13 = vld [vmem:[#allocation2 + $0xcf8] ss:$28 sps:$4 sm:$0xff]   ;;  %v6967_v14 = vld [vmem:[#allocation2 + $0x944] ss:$28 sps:$4 sm:$0xff]  }
  0xa2   : > { %2332 = vmatprep.subr.bf16.mxu1 %v6880_v15  ;;  %v6970_v15 = vld [vmem:[#allocation2 + $0xcc4] ss:$28 sps:$4 sm:$0xff]  }
  0xa4   : > { %2290 = vmatpush2.bf16.msra.mxu0 %v6875_v16  ;;  %v6965_v16 = vld [vmem:[#allocation2 + $0x940] ss:$28 sps:$4 sm:$0xff]  }
  0xa5   : > { %2333 = vmatpush2.bf16.msra.mxu1 %v6878_v17  ;;  %2291 = vmatprep.subr.bf16.mxu0 %v6883_v18  ;;  %v6968_v17 = vld [vmem:[#allocation2 + $0xcc0] ss:$28 sps:$4 sm:$0xff]   ;;  %v6973_v18 = vld [vmem:[#allocation2 + $0x90c] ss:$28 sps:$4 sm:$0xff]  }
  0xa6   : > { %2334 = vmatprep.subr.bf16.mxu1 %v6886_v19  ;;  %v6976_v19 = vld [vmem:[#allocation2 + $0xc8c] ss:$28 sps:$4 sm:$0xff]  }
  0xa8   : > { %2292 = vmatpush2.bf16.msra.mxu0 %v6881_v22  ;;  %v6971_v22 = vld [vmem:[#allocation2 + $0x908] ss:$28 sps:$4 sm:$0xff]  }
  0xa9   : > { %2335 = vmatpush2.bf16.msra.mxu1 %v6884_v23  ;;  %2347 = vmatprep.subr.bf16.mxu0 %v6889_v24  ;;  %v6974_v23 = vld [vmem:[#allocation2 + $0xc88] ss:$28 sps:$4 sm:$0xff]   ;;  %v6979_v24 = vld [vmem:[#allocation2 + $0x8d4] ss:$28 sps:$4 sm:$0xff]  }
  0xaa   : > { %2390 = vmatprep.subr.bf16.mxu1 %v6892_v25  ;;  %v6982_v25 = vld [vmem:[#allocation2 + $0xc54] ss:$28 sps:$4 sm:$0xff]  }
  0xab   : > { %2294 = vmatmul.mubr.bf16.vlgmr.msra.gmra.mxu0 %v7827_v20 }
  0xac   : > { %2337 = vmatmul.mubr.bf16.vlgmr.msra.gmra.mxu1 %v7829_v21  ;;  %2348 = vmatpush1.bf16.msra.mxu0 %v6887_v26  ;;  %v6977_v26 = vld [vmem:[#allocation2 + $0x8d0] ss:$28 sps:$4 sm:$0xff]  }
  0xad   : > { %2391 = vmatpush1.bf16.msra.mxu1 %v6890_v27  ;;  %2349 = vmatprep.subr.bf16.mxu0 %v6895_v28  ;;  %v6980_v27 = vld [vmem:[#allocation2 + $0xc50] ss:$28 sps:$4 sm:$0xff]   ;;  %v6983_v28 = vld [vmem:[#allocation2 + $0xa60] ss:$28 sps:$4 sm:$0xff]  }
  0xae   : > { %2392 = vmatprep.subr.bf16.mxu1 %v6898_v29  ;;  %2379 = vmatprep.mubr.bf16.mxu0 %v7819_v62  ;;  %v6984_v29 = vld [vmem:[#allocation2 + $0xde0] ss:$28 sps:$4 sm:$0xff]  }
  0xaf   : > { %2422 = vmatprep.mubr.bf16.mxu1 %v7821_v0 }
  0xb0   : > { %2350 = vmatpush1.bf16.msra.mxu0 %v6893_v30  ;;  %v6985_v30 = vld [vmem:[#allocation2 + $0x8a0] ss:$28 sps:$4 sm:$0xff]  }
  0xb1   : > { %2393 = vmatpush1.bf16.msra.mxu1 %v6896_v31  ;;  %2351 = vmatprep.subr.bf16.mxu0 %v6901_v32  ;;  %v6986_v31 = vld [vmem:[#allocation2 + $0xc20] ss:$28 sps:$4 sm:$0xff]   ;;  %v6987_v32 = vld [vmem:[#allocation2 + $0xa28] ss:$28 sps:$4 sm:$0xff]  }
  0xb2   : > { %2394 = vmatprep.subr.bf16.mxu1 %v6904_v33  ;;  %v6988_v33 = vld [vmem:[#allocation2 + $0xda8] ss:$28 sps:$4 sm:$0xff]  }
  0xb4   : > { %2352 = vmatpush1.bf16.msra.mxu0 %v6899_v34  ;;  %v6989_v34 = vld [vmem:[#allocation2 + $0x868] ss:$28 sps:$4 sm:$0xff]  }
  0xb5   : > { %2395 = vmatpush1.bf16.msra.mxu1 %v6902_v35  ;;  %2353 = vmatprep.subr.bf16.mxu0 %v6907_v36  ;;  %v6990_v35 = vld [vmem:[#allocation2 + $0xbe8] ss:$28 sps:$4 sm:$0xff]   ;;  %v6991_v36 = vld [vmem:[#allocation2 + $0x9f0] ss:$28 sps:$4 sm:$0xff]  }
  0xb6   : > { %2396 = vmatprep.subr.bf16.mxu1 %v6910_v37  ;;  %v6992_v37 = vld [vmem:[#allocation2 + $0xd70] ss:$28 sps:$4 sm:$0xff]  }
  0xb8   : > { %2354 = vmatpush1.bf16.msra.mxu0 %v6905_v38  ;;  %v6993_v38 = vld [vmem:[#allocation2 + $0x830] ss:$28 sps:$4 sm:$0xff]  }
  0xb9   : > { %2397 = vmatpush1.bf16.msra.mxu1 %v6908_v39  ;;  %2355 = vmatprep.subr.bf16.mxu0 %v6913_v40  ;;  %v6994_v39 = vld [vmem:[#allocation2 + $0xbb0] ss:$28 sps:$4 sm:$0xff]   ;;  %v6995_v40 = vld [vmem:[#allocation2 + $0x9b8] ss:$28 sps:$4 sm:$0xff]  }
  0xba   : > { %2398 = vmatprep.subr.bf16.mxu1 %v6916_v41  ;;  %v6996_v41 = vld [vmem:[#allocation2 + $0xd38] ss:$28 sps:$4 sm:$0xff]  }
  0xbc   : > { %2356 = vmatpush1.bf16.msra.mxu0 %v6911_v42  ;;  %v6997_v42 = vld [vmem:[#allocation2 + $0x7f8] ss:$28 sps:$4 sm:$0xff]  }
  0xbd   : > { %2399 = vmatpush1.bf16.msra.mxu1 %v6914_v43  ;;  %2357 = vmatprep.subr.bf16.mxu0 %v6919_v44  ;;  %v6998_v43 = vld [vmem:[#allocation2 + $0xb78] ss:$28 sps:$4 sm:$0xff]   ;;  %v6999_v44 = vld [vmem:[#allocation2 + $0x980] ss:$28 sps:$4 sm:$0xff]  }
  0xbe   : > { %2400 = vmatprep.subr.bf16.mxu1 %v6922_v45  ;;  %v7000_v45 = vld [vmem:[#allocation2 + $0xd00] ss:$28 sps:$4 sm:$0xff]  }
  0xc0   : > { %2358 = vmatpush1.bf16.msra.mxu0 %v6917_v46  ;;  %v7001_v46 = vld [vmem:[#allocation2 + $0x7c0] ss:$28 sps:$4 sm:$0xff]  }
  0xc1   : > { %2401 = vmatpush1.bf16.msra.mxu1 %v6920_v47  ;;  %2359 = vmatprep.subr.bf16.mxu0 %v6925_v48  ;;  %v7004_v47 = vld [vmem:[#allocation2 + $0xcc8] ss:$28 sps:$4 sm:$0xff]  }
  0xc2   : > { %2402 = vmatprep.subr.bf16.mxu1 %v6928_v49  ;;  %v7005_v48 = vld [vmem:[#allocation2 + $0x788] ss:$28 sps:$4 sm:$0xff]  }
  0xc3   : > { %v7006_v49 = vld [vmem:[#allocation2 + $0xb08] ss:$28 sps:$4 sm:$0xff]  }
  0xc4   : > { %2360 = vmatpush1.bf16.msra.mxu0 %v6923_v50  ;;  %v7007_v50 = vld [vmem:[#allocation2 + $0x910] ss:$28 sps:$4 sm:$0xff]  }
  0xc5   : > { %2403 = vmatpush1.bf16.msra.mxu1 %v6926_v51  ;;  %2361 = vmatprep.subr.bf16.mxu0 %v6931_v52  ;;  %v7008_v51 = vld [vmem:[#allocation2 + $0xc90] ss:$28 sps:$4 sm:$0xff]  }
  0xc6   : > { %2404 = vmatprep.subr.bf16.mxu1 %v6934_v53  ;;  %v7009_v52 = vld [vmem:[#allocation2 + $0x750] ss:$28 sps:$4 sm:$0xff]  }
  0xc7   : > { %v7010_v53 = vld [vmem:[#allocation2 + $0xad0] ss:$28 sps:$4 sm:$0xff]  }
  0xc8   : > { %2362 = vmatpush1.bf16.msra.mxu0 %v6929_v54  ;;  %v7011_v54 = vld [vmem:[#allocation2 + $0x8d8] ss:$28 sps:$4 sm:$0xff]  }
  0xc9   : > { %2405 = vmatpush1.bf16.msra.mxu1 %v6932_v55  ;;  %2363 = vmatprep.subr.bf16.mxu0 %v6937_v56  ;;  %v7012_v55 = vld [vmem:[#allocation2 + $0xc58] ss:$28 sps:$4 sm:$0xff]  }
  0xca   : > { %2406 = vmatprep.subr.bf16.mxu1 %v6940_v57  ;;  %v7013_v56 = vld [vmem:[#allocation2 + $0x718] ss:$28 sps:$4 sm:$0xff]  }
  0xcb   : > { %v7014_v57 = vld [vmem:[#allocation2 + $0xa98] ss:$28 sps:$4 sm:$0xff]  }
  0xcc   : > { %2364 = vmatpush2.bf16.msra.mxu0 %v6935_v58  ;;  %v7017_v58 = vld [vmem:[#allocation2 + $0x18c] ss:$28 sps:$4 sm:$0xff]  }
  0xcd   : > { %2407 = vmatpush2.bf16.msra.mxu1 %v6938_v59  ;;  %2365 = vmatprep.subr.bf16.mxu0 %v6943_v60  ;;  %v7020_v59 = vld [vmem:[#allocation2 + $0x50c] ss:$28 sps:$4 sm:$0xff]  }
  0xce   : > { %2408 = vmatprep.subr.bf16.mxu1 %v6946_v61  ;;  %v7015_v60 = vld [vmem:[#allocation2 + $0x188] ss:$28 sps:$4 sm:$0xff]  }
  0xcf   : > { %v7018_v61 = vld [vmem:[#allocation2 + $0x508] ss:$28 sps:$4 sm:$0xff]  }
  0xd0   : > { %2366 = vmatpush2.bf16.msra.mxu0 %v6941_v63  ;;  %v7023_v63 = vld [vmem:[#allocation2 + $0x154] ss:$28 sps:$4 sm:$0xff]  }
  0xd1   : > { %2409 = vmatpush2.bf16.msra.mxu1 %v6944_v1  ;;  %2367 = vmatprep.subr.bf16.mxu0 %v6949_v2  ;;  %v7026_v1 = vld [vmem:[#allocation2 + $0x4d4] ss:$28 sps:$4 sm:$0xff]  }
  0xd2   : > { %2410 = vmatprep.subr.bf16.mxu1 %v6952_v3  ;;  %v7021_v2 = vld [vmem:[#allocation2 + $0x150] ss:$28 sps:$4 sm:$0xff]  }
  0xd3   : > { %v7024_v3 = vld [vmem:[#allocation2 + $0x4d0] ss:$28 sps:$4 sm:$0xff]  }
  0xd4   : > { %2368 = vmatpush2.bf16.msra.mxu0 %v6947_v4  ;;  %v7029_v4 = vld [vmem:[#allocation2 + $0x11c] ss:$28 sps:$4 sm:$0xff]  }
  0xd5   : > { %2411 = vmatpush2.bf16.msra.mxu1 %v6950_v5  ;;  %2369 = vmatprep.subr.bf16.mxu0 %v6955_v6  ;;  %v7032_v5 = vld [vmem:[#allocation2 + $0x49c] ss:$28 sps:$4 sm:$0xff]   ;;  %v7846_v6 = vld [vmem:[%s7815_s4 + $0x4] ss:$16 sps:$4 sm:$0xff]  }
  0xd6   : > { %2412 = vmatprep.subr.bf16.mxu1 %v6958_v7  ;;  %v7850_v7 = vld [vmem:[%s7815_s4 + $0xc] ss:$16 sps:$4 sm:$0xff]  }
  0xd8   : > { %2370 = vmatpush2.bf16.msra.mxu0 %v6953_v8  ;;  %v7027_v8 = vld [vmem:[#allocation2 + $0x118] ss:$28 sps:$4 sm:$0xff]  }
  0xd9   : > { %2413 = vmatpush2.bf16.msra.mxu1 %v6956_v9  ;;  %2371 = vmatprep.subr.bf16.mxu0 %v6961_v10  ;;  %v7038_v9 = vld [vmem:[#allocation2 + $0x464] ss:$28 sps:$4 sm:$0xff]  }
  0xda   : > { %2414 = vmatprep.subr.bf16.mxu1 %v6964_v11  ;;  %v7033_v10 = vld [vmem:[#allocation2 + $0xe0] ss:$28 sps:$4 sm:$0xff]  }
  0xdb   : > { %v7036_v11 = vld [vmem:[#allocation2 + $0x460] ss:$28 sps:$4 sm:$0xff]  }
  0xdc   : > { %2372 = vmatpush2.bf16.msra.mxu0 %v6959_v12  ;;  %v7041_v12 = vld [vmem:[#allocation2 + $0xac] ss:$28 sps:$4 sm:$0xff]  }
  0xdd   : > { %2415 = vmatpush2.bf16.msra.mxu1 %v6962_v13  ;;  %2373 = vmatprep.subr.bf16.mxu0 %v6967_v14  ;;  %v7044_v13 = vld [vmem:[#allocation2 + $0x42c] ss:$28 sps:$4 sm:$0xff]  }
  0xde   : > { %2416 = vmatprep.subr.bf16.mxu1 %v6970_v15  ;;  %v7039_v14 = vld [vmem:[#allocation2 + $0xa8] ss:$28 sps:$4 sm:$0xff]  }
  0xdf   : > { %v7042_v15 = vld [vmem:[#allocation2 + $0x428] ss:$28 sps:$4 sm:$0xff]  }
  0xe0   : > { %2374 = vmatpush2.bf16.msra.mxu0 %v6965_v16  ;;  %v7047_v16 = vld [vmem:[#allocation2 + $0x74] ss:$28 sps:$4 sm:$0xff]  }
  0xe1   : > { %2417 = vmatpush2.bf16.msra.mxu1 %v6968_v17  ;;  %2375 = vmatprep.subr.bf16.mxu0 %v6973_v18  ;;  %v7050_v17 = vld [vmem:[#allocation2 + $0x3f4] ss:$28 sps:$4 sm:$0xff]  }
  0xe2   : > { %2418 = vmatprep.subr.bf16.mxu1 %v6976_v19  ;;  %v7045_v18 = vld [vmem:[#allocation2 + $0x70] ss:$28 sps:$4 sm:$0xff]  }
  0xe3   : > { %v7048_v19 = vld [vmem:[#allocation2 + $0x3f0] ss:$28 sps:$4 sm:$0xff]  }
  0xe4   : > { %2376 = vmatpush2.bf16.msra.mxu0 %v6971_v22  ;;  %v7053_v22 = vld [vmem:[#allocation2 + $0x3c] ss:$28 sps:$4 sm:$0xff]  }
  0xe5   : > { %2419 = vmatpush2.bf16.msra.mxu1 %v6974_v23  ;;  %2377 = vmatprep.subr.bf16.mxu0 %v6979_v24  ;;  %v7056_v23 = vld [vmem:[#allocation2 + $0x3bc] ss:$28 sps:$4 sm:$0xff]  }
  0xe6   : > { %2420 = vmatprep.subr.bf16.mxu1 %v6982_v25  ;;  %v7051_v24 = vld [vmem:[#allocation2 + $0x38] ss:$28 sps:$4 sm:$0xff]  }
  0xe7   : > { %v7054_v25 = vld [vmem:[#allocation2 + $0x3b8] ss:$28 sps:$4 sm:$0xff]  }
  0xe8   : > { %2378 = vmatpush2.bf16.msra.mxu0 %v6977_v26  ;;  %v7059_v26 = vld [vmem:[#allocation2 + $0x4] ss:$28 sps:$4 sm:$0xff]  }
  0xe9   : > { %2421 = vmatpush2.bf16.msra.mxu1 %v6980_v27  ;;  %6525 = vmatprep.subr.bf16.mxu0 %v6983_v28  ;;  %v7062_v27 = vld [vmem:[#allocation2 + $0x384] ss:$28 sps:$4 sm:$0xff]  }
  0xea   : > { %6547 = vmatprep.subr.bf16.mxu1 %v6984_v29  ;;  %v7057_v28 = vld [vmem:[#allocation2] ss:$28 sps:$4 sm:$0xff]  }
  0xeb   : > { %2380 = vmatmul.mubr.bf16.vlgmr.msra.gmra.mxu0 %v7827_v20  ;;  %v7060_v29 = vld [vmem:[#allocation2 + $0x380] ss:$28 sps:$4 sm:$0xff]  }
  0xec   : > { %2423 = vmatmul.mubr.bf16.vlgmr.msra.gmra.mxu1 %v7829_v21  ;;  %6526 = vmatpush3.bf16.msra.mxu0 %v6985_v30  ;;  %v7065_v30 = vld [vmem:[#allocation2 + $0x34c] ss:$28 sps:$4 sm:$0xff]  }
  0xed   : > { %6548 = vmatpush3.bf16.msra.mxu1 %v6986_v31  ;;  %6527 = vmatprep.subr.bf16.mxu0 %v6987_v32  ;;  %v7068_v31 = vld [vmem:[#allocation2 + $0x6cc] ss:$28 sps:$4 sm:$0xff]  }
  0xee   : > { %6549 = vmatprep.subr.bf16.mxu1 %v6988_v33  ;;  %2465 = vmatprep.mubr.bf16.mxu0 %v7819_v62  ;;  %v7002_v62 = vld [vmem:[#allocation2 + $0xb40] ss:$28 sps:$4 sm:$0xff]   ;;  %v7063_v32 = vld [vmem:[#allocation2 + $0x348] ss:$28 sps:$4 sm:$0xff]  }
  0xef   : > { %2506 = vmatprep.mubr.bf16.mxu1 %v7821_v0  ;;  %v7003_v0 = vld [vmem:[#allocation2 + $0x948] ss:$28 sps:$4 sm:$0xff]  }
  0xf0   : > { %6528 = vmatpush3.bf16.msra.mxu0 %v6989_v34  ;;  %v7066_v33 = vld [vmem:[#allocation2 + $0x6c8] ss:$28 sps:$4 sm:$0xff]   ;;  %v7071_v34 = vld [vmem:[#allocation2 + $0x314] ss:$28 sps:$4 sm:$0xff]  }
  0xf1   : > { %6550 = vmatpush3.bf16.msra.mxu1 %v6990_v35  ;;  %6529 = vmatprep.subr.bf16.mxu0 %v6991_v36  ;;  %v7074_v35 = vld [vmem:[#allocation2 + $0x694] ss:$28 sps:$4 sm:$0xff]  }
  0xf2   : > { %6551 = vmatprep.subr.bf16.mxu1 %v6992_v37 }
  0xf4   : > { %6530 = vmatpush3.bf16.msra.mxu0 %v6993_v38  ;;  %v7069_v38 = vld [vmem:[#allocation2 + $0x310] ss:$28 sps:$4 sm:$0xff]  }
  0xf5   : > { %6552 = vmatpush3.bf16.msra.mxu1 %v6994_v39  ;;  %6531 = vmatprep.subr.bf16.mxu0 %v6995_v40  ;;  %v7072_v40 = vld [vmem:[#allocation2 + $0x690] ss:$28 sps:$4 sm:$0xff]  }
  0xf6   : > { %6553 = vmatprep.subr.bf16.mxu1 %v6996_v41  ;;  %v7077_v41 = vld [vmem:[#allocation2 + $0x2dc] ss:$28 sps:$4 sm:$0xff]  }
  0xf8   : > { %6532 = vmatpush3.bf16.msra.mxu0 %v6997_v42 }
  0xf9   : > { %6554 = vmatpush3.bf16.msra.mxu1 %v6998_v43  ;;  %6533 = vmatprep.subr.bf16.mxu0 %v6999_v44  ;;  %v7080_v44 = vld [vmem:[#allocation2 + $0x65c] ss:$28 sps:$4 sm:$0xff]  }
  0xfa   : > { %6555 = vmatprep.subr.bf16.mxu1 %v7000_v45 }
  0xfc   : > { %6534 = vmatpush3.bf16.msra.mxu0 %v7001_v46 }
  0xfd   : > { %6556 = vmatpush3.bf16.msra.mxu1 %v7002_v62  ;;  %6535 = vmatprep.subr.bf16.mxu0 %v7003_v0  ;;  %v7075_v0 = vld [vmem:[#allocation2 + $0x2d8] ss:$28 sps:$4 sm:$0xff]  }
  0xfe   : > { %6557 = vmatprep.subr.bf16.mxu1 %v7004_v47 }
 0x100   : > { %6536 = vmatpush3.bf16.msra.mxu0 %v7005_v48  ;;  %v7078_v48 = vld [vmem:[#allocation2 + $0x658] ss:$28 sps:$4 sm:$0xff]  }
 0x101   : > { %6558 = vmatpush3.bf16.msra.mxu1 %v7006_v49  ;;  %6537 = vmatprep.subr.bf16.mxu0 %v7007_v50  ;;  %v7083_v49 = vld [vmem:[#allocation2 + $0x2a4] ss:$28 sps:$4 sm:$0xff]  }
 0x102   : > { %6559 = vmatprep.subr.bf16.mxu1 %v7008_v51 }
 0x104   : > { %6538 = vmatpush3.bf16.msra.mxu0 %v7009_v52  ;;  %v7086_v52 = vld [vmem:[#allocation2 + $0x624] ss:$28 sps:$4 sm:$0xff]  }
 0x105   : > { %6560 = vmatpush3.bf16.msra.mxu1 %v7010_v53  ;;  %6539 = vmatprep.subr.bf16.mxu0 %v7011_v54  ;;  %v7081_v54 = vld [vmem:[#allocation2 + $0x2a0] ss:$28 sps:$4 sm:$0xff]  }
 0x106   : > { %6561 = vmatprep.subr.bf16.mxu1 %v7012_v55  ;;  %v7084_v55 = vld [vmem:[#allocation2 + $0x620] ss:$28 sps:$4 sm:$0xff]  }
 0x108   : > { %6540 = vmatpush3.bf16.msra.mxu0 %v7013_v56  ;;  %v7089_v56 = vld [vmem:[#allocation2 + $0x26c] ss:$28 sps:$4 sm:$0xff]  }
 0x109   : > { %6562 = vmatpush3.bf16.msra.mxu1 %v7014_v57  ;;  %3671 = vmatprep.subr.bf16.mxu0 %v7017_v58  ;;  %v7092_v57 = vld [vmem:[#allocation2 + $0x5ec] ss:$28 sps:$4 sm:$0xff]  }
 0x10a   : > { %3714 = vmatprep.subr.bf16.mxu1 %v7020_v59  ;;  %v7087_v58 = vld [vmem:[#allocation2 + $0x268] ss:$28 sps:$4 sm:$0xff]  }
 0x10b   : > { %2466 = vmatmul.mubr.bf16.vlgmr.msra.gmra.mxu0 %v7827_v20  ;;  %v7030_v20 = vld [vmem:[#allocation2 + $0x498] ss:$28 sps:$4 sm:$0xff]   ;;  %v7090_v59 = vld [vmem:[#allocation2 + $0x5e8] ss:$28 sps:$4 sm:$0xff]  }
 0x10c   : > { %2507 = vmatmul.mubr.bf16.vlgmr.msra.gmra.mxu1 %v7829_v21  ;;  %3672 = vmatpush1.bf16.msra.mxu0 %v7015_v60  ;;  %v7035_v21 = vld [vmem:[#allocation2 + $0xe4] ss:$28 sps:$4 sm:$0xff]   ;;  %v7095_v60 = vld [vmem:[#allocation2 + $0x234] ss:$28 sps:$4 sm:$0xff]  }
 0x10d   : > { %3715 = vmatpush1.bf16.msra.mxu1 %v7018_v61  ;;  %3673 = vmatprep.subr.bf16.mxu0 %v7023_v63  ;;  %v7098_v61 = vld [vmem:[#allocation2 + $0x5b4] ss:$28 sps:$4 sm:$0xff]  }
 0x10e   : > { %3716 = vmatprep.subr.bf16.mxu1 %v7026_v1  ;;  %3703 = vmatprep.mubr.bf16.mxu0 %v7846_v6  ;;  %v7093_v63 = vld [vmem:[#allocation2 + $0x230] ss:$28 sps:$4 sm:$0xff]  }
 0x10f   : > { %3746 = vmatprep.mubr.bf16.mxu1 %v7850_v7  ;;  %v7096_v1 = vld [vmem:[#allocation2 + $0x5b0] ss:$28 sps:$4 sm:$0xff]  }
 0x110   : > { %3674 = vmatpush1.bf16.msra.mxu0 %v7021_v2  ;;  %v7101_v2 = vld [vmem:[#allocation2 + $0x1fc] ss:$28 sps:$4 sm:$0xff]  }
 0x111   : > { %3717 = vmatpush1.bf16.msra.mxu1 %v7024_v3  ;;  %3675 = vmatprep.subr.bf16.mxu0 %v7029_v4  ;;  %v7104_v3 = vld [vmem:[#allocation2 + $0x57c] ss:$28 sps:$4 sm:$0xff]  }
 0x112   : > { %3718 = vmatprep.subr.bf16.mxu1 %v7032_v5  ;;  %v7099_v4 = vld [vmem:[#allocation2 + $0x1f8] ss:$28 sps:$4 sm:$0xff]  }
 0x113   : > { %v7102_v5 = vld [vmem:[#allocation2 + $0x578] ss:$28 sps:$4 sm:$0xff]  }
 0x114   : > { %3676 = vmatpush1.bf16.msra.mxu0 %v7027_v8  ;;  %v7107_v8 = vld [vmem:[#allocation2 + $0x1c4] ss:$28 sps:$4 sm:$0xff]  }
 0x115   : > { %3719 = vmatpush1.bf16.msra.mxu1 %v7030_v20  ;;  %3677 = vmatprep.subr.bf16.mxu0 %v7035_v21  ;;  %v7110_v20 = vld [vmem:[#allocation2 + $0x544] ss:$28 sps:$4 sm:$0xff]  }
 0x116   : > { %3720 = vmatprep.subr.bf16.mxu1 %v7038_v9  ;;  %v7105_v21 = vld [vmem:[#allocation2 + $0x1c0] ss:$28 sps:$4 sm:$0xff]  }
 0x117   : > { %v7108_v9 = vld [vmem:[#allocation2 + $0x540] ss:$28 sps:$4 sm:$0xff]  }
 0x118   : > { %3678 = vmatpush1.bf16.msra.mxu0 %v7033_v10  ;;  %v7113_v10 = vld [vmem:[#allocation2 + $0x194] ss:$28 sps:$4 sm:$0xff]  }
 0x119   : > { %3721 = vmatpush1.bf16.msra.mxu1 %v7036_v11  ;;  %3679 = vmatprep.subr.bf16.mxu0 %v7041_v12  ;;  %v7116_v11 = vld [vmem:[#allocation2 + $0x514] ss:$28 sps:$4 sm:$0xff]  }
 0x11a   : > { %3722 = vmatprep.subr.bf16.mxu1 %v7044_v13  ;;  %v7111_v12 = vld [vmem:[#allocation2 + $0x190] ss:$28 sps:$4 sm:$0xff]  }
 0x11b   : > { %v7114_v13 = vld [vmem:[#allocation2 + $0x510] ss:$28 sps:$4 sm:$0xff]  }
 0x11c   : > { %3680 = vmatpush1.bf16.msra.mxu0 %v7039_v14  ;;  %v7119_v14 = vld [vmem:[#allocation2 + $0x15c] ss:$28 sps:$4 sm:$0xff]  }
 0x11d   : > { %3723 = vmatpush1.bf16.msra.mxu1 %v7042_v15  ;;  %3681 = vmatprep.subr.bf16.mxu0 %v7047_v16  ;;  %v7122_v15 = vld [vmem:[#allocation2 + $0x4dc] ss:$28 sps:$4 sm:$0xff]   ;;  %v7862_v16 = vld [vmem:[%s7815_s4] ss:$16 sps:$4 sm:$0xff]  }
 0x11e   : > { %3724 = vmatprep.subr.bf16.mxu1 %v7050_v17  ;;  %v7866_v17 = vld [vmem:[%s7815_s4 + $0x8] ss:$16 sps:$4 sm:$0xff]  }
 0x120   : > { %3682 = vmatpush1.bf16.msra.mxu0 %v7045_v18  ;;  %v7117_v18 = vld [vmem:[#allocation2 + $0x158] ss:$28 sps:$4 sm:$0xff]  }
 0x121   : > { %3725 = vmatpush1.bf16.msra.mxu1 %v7048_v19  ;;  %3683 = vmatprep.subr.bf16.mxu0 %v7053_v22  ;;  %v7120_v19 = vld [vmem:[#allocation2 + $0x4d8] ss:$28 sps:$4 sm:$0xff]   ;;  %v7125_v22 = vld [vmem:[#allocation2 + $0x124] ss:$28 sps:$4 sm:$0xff]  }
 0x122   : > { %3726 = vmatprep.subr.bf16.mxu1 %v7056_v23  ;;  %v7128_v23 = vld [vmem:[#allocation2 + $0x4a4] ss:$28 sps:$4 sm:$0xff]  }
 0x124   : > { %3684 = vmatpush1.bf16.msra.mxu0 %v7051_v24  ;;  %v7123_v24 = vld [vmem:[#allocation2 + $0x120] ss:$28 sps:$4 sm:$0xff]  }
 0x125   : > { %3727 = vmatpush1.bf16.msra.mxu1 %v7054_v25  ;;  %3685 = vmatprep.subr.bf16.mxu0 %v7059_v26  ;;  %v7126_v25 = vld [vmem:[#allocation2 + $0x4a0] ss:$28 sps:$4 sm:$0xff]   ;;  %v7131_v26 = vld [vmem:[#allocation2 + $0xec] ss:$28 sps:$4 sm:$0xff]  }
 0x126   : > { %3728 = vmatprep.subr.bf16.mxu1 %v7062_v27  ;;  %v7134_v27 = vld [vmem:[#allocation2 + $0x46c] ss:$28 sps:$4 sm:$0xff]  }
 0x128   : > { %3686 = vmatpush1.bf16.msra.mxu0 %v7057_v28  ;;  %v7129_v28 = vld [vmem:[#allocation2 + $0xe8] ss:$28 sps:$4 sm:$0xff]  }
 0x129   : > { %3729 = vmatpush1.bf16.msra.mxu1 %v7060_v29  ;;  %3687 = vmatprep.subr.bf16.mxu0 %v7065_v30  ;;  %v7132_v29 = vld [vmem:[#allocation2 + $0x468] ss:$28 sps:$4 sm:$0xff]   ;;  %v7137_v30 = vld [vmem:[#allocation2 + $0xb4] ss:$28 sps:$4 sm:$0xff]  }
 0x12a   : > { %3730 = vmatprep.subr.bf16.mxu1 %v7068_v31  ;;  %v7140_v31 = vld [vmem:[#allocation2 + $0x434] ss:$28 sps:$4 sm:$0xff]  }
 0x12b   : > { %v2209_v36 = vpop.f32.mrf.mxu0 }
 0x12c   : > { %v2252_v37 = vpop.f32.mrf.mxu1  ;;  %3688 = vmatpush2.bf16.msra.mxu0 %v7063_v32  ;;  %v7135_v32 = vld [vmem:[#allocation2 + $0xb0] ss:$28 sps:$4 sm:$0xff]  }
 0x12d   : > { %v7853_v39 = vadd.f32 %v2252_v37, %v2209_v36  ;;  %3731 = vmatpush2.bf16.msra.mxu1 %v7066_v33  ;;  %v2211_v42 = vpop.f32.mrf.mxu0  ;;  %3689 = vmatprep.subr.bf16.mxu0 %v7071_v34  ;;  %v7138_v33 = vld [vmem:[#allocation2 + $0x430] ss:$28 sps:$4 sm:$0xff]   ;;  %v7143_v34 = vld [vmem:[#allocation2 + $0x7c] ss:$28 sps:$4 sm:$0xff]  }
 0x12e   : > { %v2254_v43 = vpop.f32.mrf.mxu1  ;;  %3732 = vmatprep.subr.bf16.mxu1 %v7074_v35  ;;  %v7146_v35 = vld [vmem:[#allocation2 + $0x3fc] ss:$28 sps:$4 sm:$0xff]  }
 0x12f   : > { %v7855_v45 = vadd.f32 %v2254_v43, %v2211_v42  ;;  %v2213_v46 = vpop.f32.mrf.mxu0  ;;  %v7141_v36 = vld [vmem:[#allocation2 + $0x78] ss:$28 sps:$4 sm:$0xff]   ;;  %v7150_v42 = vld [vmem:[#allocation2 + $0x3c0] ss:$28 sps:$4 sm:$0xff]   ;;  %v7155_v43 = vld [vmem:[#allocation2 + $0xc] ss:$28 sps:$4 sm:$0xff]  }
 0x130   : > { %v2256_v62 = vpop.f32.mrf.mxu1  ;;  %3690 = vmatpush2.bf16.msra.mxu0 %v7069_v38  ;;  %v7144_v37 = vld [vmem:[#allocation2 + $0x3f8] ss:$28 sps:$4 sm:$0xff]   ;;  %v7149_v38 = vld [vmem:[#allocation2 + $0x44] ss:$28 sps:$4 sm:$0xff]  }
 0x131   : > { %v7857_v47 = vadd.f32 %v2256_v62, %v2213_v46  ;;  %3733 = vmatpush2.bf16.msra.mxu1 %v7072_v40  ;;  %v2215_v50 = vpop.f32.mrf.mxu0  ;;  %3691 = vmatprep.subr.bf16.mxu0 %v7077_v41  ;;  %v7152_v40 = vld [vmem:[#allocation2 + $0x3c4] ss:$28 sps:$4 sm:$0xff]  }
 0x132   : > { %v2258_v51 = vpop.f32.mrf.mxu1  ;;  %3734 = vmatprep.subr.bf16.mxu1 %v7080_v44  ;;  %v7147_v41 = vld [vmem:[#allocation2 + $0x40] ss:$28 sps:$4 sm:$0xff]   ;;  %v7158_v44 = vld [vmem:[#allocation2 + $0x38c] ss:$28 sps:$4 sm:$0xff]  }
 0x133   : > { %v7859_v53 = vadd.f32 %v2258_v51, %v2215_v50  ;;  %v7153_v46 = vld [vmem:[#allocation2 + $0x8] ss:$28 sps:$4 sm:$0xff]   ;;  %v7162_v50 = vld [vmem:[#allocation2 + $0x6d0] ss:$28 sps:$4 sm:$0xff]   ;;  %v7167_v51 = vld [vmem:[#allocation2 + $0x31c] ss:$28 sps:$4 sm:$0xff]  }
 0x134   : > { %3692 = vmatpush2.bf16.msra.mxu0 %v7075_v0  ;;  %v7156_v62 = vld [vmem:[#allocation2 + $0x388] ss:$28 sps:$4 sm:$0xff]   ;;  %v7161_v0 = vld [vmem:[#allocation2 + $0x354] ss:$28 sps:$4 sm:$0xff]  }
 0x135   : > { %3735 = vmatpush2.bf16.msra.mxu1 %v7078_v48  ;;  %3693 = vmatprep.subr.bf16.mxu0 %v7083_v49  ;;  %v7164_v48 = vld [vmem:[#allocation2 + $0x6d4] ss:$28 sps:$4 sm:$0xff]  }
 0x136   : > { %3736 = vmatprep.subr.bf16.mxu1 %v7086_v52  ;;  %v7159_v49 = vld [vmem:[#allocation2 + $0x350] ss:$28 sps:$4 sm:$0xff]   ;;  %v7170_v52 = vld [vmem:[#allocation2 + $0x69c] ss:$28 sps:$4 sm:$0xff]  }
 0x138   : > { %3694 = vmatpush2.bf16.msra.mxu0 %v7081_v54 }
 0x139   : > { %3737 = vmatpush2.bf16.msra.mxu1 %v7084_v55  ;;  %3695 = vmatprep.subr.bf16.mxu0 %v7089_v56  ;;  %v7165_v56 = vld [vmem:[#allocation2 + $0x318] ss:$28 sps:$4 sm:$0xff]  }
 0x13a   : > { %3738 = vmatprep.subr.bf16.mxu1 %v7092_v57 }
 0x13c   : > { %3696 = vmatpush2.bf16.msra.mxu0 %v7087_v58  ;;  %v7168_v58 = vld [vmem:[#allocation2 + $0x698] ss:$28 sps:$4 sm:$0xff]  }
 0x13d   : > { %3739 = vmatpush2.bf16.msra.mxu1 %v7090_v59  ;;  %3697 = vmatprep.subr.bf16.mxu0 %v7095_v60  ;;  %v7173_v59 = vld [vmem:[#allocation2 + $0x2e4] ss:$28 sps:$4 sm:$0xff]  }
 0x13e   : > { %3740 = vmatprep.subr.bf16.mxu1 %v7098_v61 }
 0x140   : > { %3698 = vmatpush2.bf16.msra.mxu0 %v7093_v63  ;;  %v7176_v63 = vld [vmem:[#allocation2 + $0x664] ss:$28 sps:$4 sm:$0xff]  }
 0x141   : > { %3741 = vmatpush2.bf16.msra.mxu1 %v7096_v1  ;;  %3699 = vmatprep.subr.bf16.mxu0 %v7101_v2 }
 0x142   : > { %3742 = vmatprep.subr.bf16.mxu1 %v7104_v3  ;;  %v7171_v3 = vld [vmem:[#allocation2 + $0x2e0] ss:$28 sps:$4 sm:$0xff]  }
 0x144   : > { %3700 = vmatpush2.bf16.msra.mxu0 %v7099_v4 }
 0x145   : > { %3743 = vmatpush2.bf16.msra.mxu1 %v7102_v5  ;;  %3701 = vmatprep.subr.bf16.mxu0 %v7107_v8  ;;  %v7174_v5 = vld [vmem:[#allocation2 + $0x660] ss:$28 sps:$4 sm:$0xff]   ;;  %v7179_v8 = vld [vmem:[#allocation2 + $0x2ac] ss:$28 sps:$4 sm:$0xff]  }
 0x146   : > { %3744 = vmatprep.subr.bf16.mxu1 %v7110_v20  ;;  %v7182_v20 = vld [vmem:[#allocation2 + $0x62c] ss:$28 sps:$4 sm:$0xff]  }
 0x148   : > { %3702 = vmatpush2.bf16.msra.mxu0 %v7105_v21  ;;  %v7177_v21 = vld [vmem:[#allocation2 + $0x2a8] ss:$28 sps:$4 sm:$0xff]  }
 0x149   : > { %3745 = vmatpush2.bf16.msra.mxu1 %v7108_v9  ;;  %3757 = vmatprep.subr.bf16.mxu0 %v7113_v10  ;;  %v7180_v9 = vld [vmem:[#allocation2 + $0x628] ss:$28 sps:$4 sm:$0xff]   ;;  %v7185_v10 = vld [vmem:[#allocation2 + $0x274] ss:$28 sps:$4 sm:$0xff]  }
 0x14a   : > { %3800 = vmatprep.subr.bf16.mxu1 %v7116_v11  ;;  %v7188_v11 = vld [vmem:[#allocation2 + $0x5f4] ss:$28 sps:$4 sm:$0xff]  }
 0x14b   : > { %3704 = vmatmul.mubr.bf16.vlgmr.msra.gmra.mxu0 %v7862_v16 }
 0x14c   : > { %3747 = vmatmul.mubr.bf16.vlgmr.msra.gmra.mxu1 %v7866_v17  ;;  %3758 = vmatpush1.bf16.msra.mxu0 %v7111_v12  ;;  %v7183_v12 = vld [vmem:[#allocation2 + $0x270] ss:$28 sps:$4 sm:$0xff]  }
 0x14d   : > { %3801 = vmatpush1.bf16.msra.mxu1 %v7114_v13  ;;  %3759 = vmatprep.subr.bf16.mxu0 %v7119_v14  ;;  %v7186_v13 = vld [vmem:[#allocation2 + $0x5f0] ss:$28 sps:$4 sm:$0xff]   ;;  %v7191_v14 = vld [vmem:[#allocation2 + $0x23c] ss:$28 sps:$4 sm:$0xff]  }
 0x14e   : > { %3802 = vmatprep.subr.bf16.mxu1 %v7122_v15  ;;  %3789 = vmatprep.mubr.bf16.mxu0 %v7846_v6  ;;  %v7194_v15 = vld [vmem:[#allocation2 + $0x5bc] ss:$28 sps:$4 sm:$0xff]  }
 0x14f   : > { %3832 = vmatprep.mubr.bf16.mxu1 %v7850_v7 }
 0x150   : > { %3760 = vmatpush1.bf16.msra.mxu0 %v7117_v18  ;;  %v7189_v18 = vld [vmem:[#allocation2 + $0x238] ss:$28 sps:$4 sm:$0xff]  }
 0x151   : > { %3803 = vmatpush1.bf16.msra.mxu1 %v7120_v19  ;;  %3761 = vmatprep.subr.bf16.mxu0 %v7125_v22  ;;  %v7192_v19 = vld [vmem:[#allocation2 + $0x5b8] ss:$28 sps:$4 sm:$0xff]   ;;  %v7197_v22 = vld [vmem:[#allocation2 + $0x204] ss:$28 sps:$4 sm:$0xff]  }
 0x152   : > { %3804 = vmatprep.subr.bf16.mxu1 %v7128_v23  ;;  %v7200_v23 = vld [vmem:[#allocation2 + $0x584] ss:$28 sps:$4 sm:$0xff]  }
 0x154   : > { %3762 = vmatpush1.bf16.msra.mxu0 %v7123_v24  ;;  %v7195_v24 = vld [vmem:[#allocation2 + $0x200] ss:$28 sps:$4 sm:$0xff]  }
 0x155   : > { %3805 = vmatpush1.bf16.msra.mxu1 %v7126_v25  ;;  %3763 = vmatprep.subr.bf16.mxu0 %v7131_v26  ;;  %v7198_v25 = vld [vmem:[#allocation2 + $0x580] ss:$28 sps:$4 sm:$0xff]   ;;  %v7203_v26 = vld [vmem:[#allocation2 + $0x1cc] ss:$28 sps:$4 sm:$0xff]  }
 0x156   : > { %3806 = vmatprep.subr.bf16.mxu1 %v7134_v27  ;;  %v7206_v27 = vld [vmem:[#allocation2 + $0x54c] ss:$28 sps:$4 sm:$0xff]  }
 0x158   : > { %3764 = vmatpush1.bf16.msra.mxu0 %v7129_v28  ;;  %v7201_v28 = vld [vmem:[#allocation2 + $0x1c8] ss:$28 sps:$4 sm:$0xff]  }
 0x159   : > { %3807 = vmatpush1.bf16.msra.mxu1 %v7132_v29  ;;  %3765 = vmatprep.subr.bf16.mxu0 %v7137_v30  ;;  %v7204_v29 = vld [vmem:[#allocation2 + $0x548] ss:$28 sps:$4 sm:$0xff]   ;;  %v7209_v30 = vld [vmem:[#allocation2 + $0x19c] ss:$28 sps:$4 sm:$0xff]  }
 0x15a   : > { %3808 = vmatprep.subr.bf16.mxu1 %v7140_v31  ;;  %v7212_v31 = vld [vmem:[#allocation2 + $0x51c] ss:$28 sps:$4 sm:$0xff]  }
 0x15c   : > { %3766 = vmatpush1.bf16.msra.mxu0 %v7135_v32  ;;  %v7207_v32 = vld [vmem:[#allocation2 + $0x198] ss:$28 sps:$4 sm:$0xff]  }
 0x15d   : > { %3809 = vmatpush1.bf16.msra.mxu1 %v7138_v33  ;;  %3767 = vmatprep.subr.bf16.mxu0 %v7143_v34  ;;  %v7210_v33 = vld [vmem:[#allocation2 + $0x518] ss:$28 sps:$4 sm:$0xff]   ;;  %v7215_v34 = vld [vmem:[#allocation2 + $0x164] ss:$28 sps:$4 sm:$0xff]  }
 0x15e   : > { %3810 = vmatprep.subr.bf16.mxu1 %v7146_v35  ;;  %v7218_v35 = vld [vmem:[#allocation2 + $0x4e4] ss:$28 sps:$4 sm:$0xff]  }
 0x160   : > { %3768 = vmatpush1.bf16.msra.mxu0 %v7141_v36  ;;  %v7213_v36 = vld [vmem:[#allocation2 + $0x160] ss:$28 sps:$4 sm:$0xff]  }
 0x161   : > { %3811 = vmatpush1.bf16.msra.mxu1 %v7144_v37  ;;  %3769 = vmatprep.subr.bf16.mxu0 %v7149_v38  ;;  %v7216_v37 = vld [vmem:[#allocation2 + $0x4e0] ss:$28 sps:$4 sm:$0xff]   ;;  %v7221_v38 = vld [vmem:[#allocation2 + $0x12c] ss:$28 sps:$4 sm:$0xff]  }
 0x162   : > { %3812 = vmatprep.subr.bf16.mxu1 %v7152_v40  ;;  %v7224_v40 = vld [vmem:[#allocation2 + $0x4ac] ss:$28 sps:$4 sm:$0xff]  }
 0x164   : > { %3770 = vmatpush1.bf16.msra.mxu0 %v7147_v41  ;;  %v7219_v41 = vld [vmem:[#allocation2 + $0x128] ss:$28 sps:$4 sm:$0xff]  }
 0x165   : > { %3813 = vmatpush1.bf16.msra.mxu1 %v7150_v42  ;;  %3771 = vmatprep.subr.bf16.mxu0 %v7155_v43  ;;  %v7222_v42 = vld [vmem:[#allocation2 + $0x4a8] ss:$28 sps:$4 sm:$0xff]   ;;  %v7227_v43 = vld [vmem:[#allocation2 + $0xf4] ss:$28 sps:$4 sm:$0xff]  }
 0x166   : > { %3814 = vmatprep.subr.bf16.mxu1 %v7158_v44  ;;  %v7228_v44 = vld [vmem:[#allocation2 + $0x470] ss:$28 sps:$4 sm:$0xff]  }
 0x168   : > { %3772 = vmatpush1.bf16.msra.mxu0 %v7153_v46  ;;  %v7233_v46 = vld [vmem:[#allocation2 + $0xbc] ss:$28 sps:$4 sm:$0xff]  }
 0x169   : > { %3815 = vmatpush1.bf16.msra.mxu1 %v7156_v62  ;;  %3773 = vmatprep.subr.bf16.mxu0 %v7161_v0  ;;  %v7236_v62 = vld [vmem:[#allocation2 + $0x43c] ss:$28 sps:$4 sm:$0xff]  }
 0x16a   : > { %3816 = vmatprep.subr.bf16.mxu1 %v7164_v48  ;;  %v7231_v0 = vld [vmem:[#allocation2 + $0xb8] ss:$28 sps:$4 sm:$0xff]   ;;  %v7242_v48 = vld [vmem:[#allocation2 + $0x404] ss:$28 sps:$4 sm:$0xff]  }
 0x16b   : > { %v2295_v54 = vpop.f32.mrf.mxu0 }
 0x16c   : > { %v2338_v55 = vpop.f32.mrf.mxu1  ;;  %3774 = vmatpush2.bf16.msra.mxu0 %v7159_v49  ;;  %v7237_v49 = vld [vmem:[#allocation2 + $0x80] ss:$28 sps:$4 sm:$0xff]  }
 0x16d   : > { %v7871_v57 = vadd.f32 %v2338_v55, %v2295_v54  ;;  %3817 = vmatpush2.bf16.msra.mxu1 %v7162_v50  ;;  %v7873_v60 = vpop.f32.mrf.mxu0  ;;  %3775 = vmatprep.subr.bf16.mxu0 %v7167_v51  ;;  %v7240_v50 = vld [vmem:[#allocation2 + $0x400] ss:$28 sps:$4 sm:$0xff]   ;;  %v7245_v51 = vld [vmem:[#allocation2 + $0x4c] ss:$28 sps:$4 sm:$0xff]  }
 0x16e   : > { %v7875_v61 = vpop.f32.mrf.mxu1  ;;  %3818 = vmatprep.subr.bf16.mxu1 %v7170_v52  ;;  %v7248_v52 = vld [vmem:[#allocation2 + $0x3cc] ss:$28 sps:$4 sm:$0xff]  }
 0x16f   : > { %v2299_v1 = vpop.f32.mrf.mxu0  ;;  %v7243_v54 = vld [vmem:[#allocation2 + $0x48] ss:$28 sps:$4 sm:$0xff]  }
 0x170   : > { %v2342_v2 = vpop.f32.mrf.mxu1  ;;  %3776 = vmatpush2.bf16.msra.mxu0 %v7165_v56  ;;  %v7246_v55 = vld [vmem:[#allocation2 + $0x3c8] ss:$28 sps:$4 sm:$0xff]   ;;  %v7251_v56 = vld [vmem:[#allocation2 + $0x14] ss:$28 sps:$4 sm:$0xff]  }
 0x171   : > { %v7877_v4 = vadd.f32 %v2342_v2, %v2299_v1  ;;  %3819 = vmatpush2.bf16.msra.mxu1 %v7168_v58  ;;  %3777 = vmatprep.subr.bf16.mxu0 %v7173_v59  ;;  %v7254_v58 = vld [vmem:[#allocation2 + $0x394] ss:$28 sps:$4 sm:$0xff]   ;;  %v7257_v1 = vld [vmem:[#allocation2 + $0x35c] ss:$28 sps:$4 sm:$0xff]  }
 0x172   : > { %3820 = vmatprep.subr.bf16.mxu1 %v7176_v63  ;;  %v7249_v59 = vld [vmem:[#allocation2 + $0x10] ss:$28 sps:$4 sm:$0xff]   ;;  %v7260_v2 = vld [vmem:[#allocation2 + $0x6dc] ss:$28 sps:$4 sm:$0xff]  }
 0x173   : > { %v7252_v63 = vld [vmem:[#allocation2 + $0x390] ss:$28 sps:$4 sm:$0xff]  }
 0x174   : > { %3778 = vmatpush2.bf16.msra.mxu0 %v7171_v3  ;;  %v7255_v3 = vld [vmem:[#allocation2 + $0x358] ss:$28 sps:$4 sm:$0xff]  }
 0x175   : > { %3821 = vmatpush2.bf16.msra.mxu1 %v7174_v5  ;;  %3779 = vmatprep.subr.bf16.mxu0 %v7179_v8  ;;  %v7258_v5 = vld [vmem:[#allocation2 + $0x6d8] ss:$28 sps:$4 sm:$0xff]   ;;  %v7883_v8 = vpop.f32.mrf.mxu0 }
 0x176   : > { %3822 = vmatprep.subr.bf16.mxu1 %v7182_v20  ;;  %v7885_v20 = vpop.f32.mrf.mxu1 }
 0x178   : > { %3780 = vmatpush2.bf16.msra.mxu0 %v7177_v21  ;;  %v7263_v21 = vld [vmem:[#allocation2 + $0x324] ss:$28 sps:$4 sm:$0xff]  }
 0x179   : > { %3823 = vmatpush2.bf16.msra.mxu1 %v7180_v9  ;;  %3781 = vmatprep.subr.bf16.mxu0 %v7185_v10  ;;  %v7266_v9 = vld [vmem:[#allocation2 + $0x6a4] ss:$28 sps:$4 sm:$0xff]  }
 0x17a   : > { %3824 = vmatprep.subr.bf16.mxu1 %v7188_v11 }
 0x17c   : > { %3782 = vmatpush2.bf16.msra.mxu0 %v7183_v12 }
 0x17d   : > { %3825 = vmatpush2.bf16.msra.mxu1 %v7186_v13  ;;  %3783 = vmatprep.subr.bf16.mxu0 %v7191_v14  ;;  %v7261_v13 = vld [vmem:[#allocation2 + $0x320] ss:$28 sps:$4 sm:$0xff]  }
 0x17e   : > { %3826 = vmatprep.subr.bf16.mxu1 %v7194_v15  ;;  %v7264_v14 = vld [vmem:[#allocation2 + $0x6a0] ss:$28 sps:$4 sm:$0xff]  }
 0x180   : > { %3784 = vmatpush2.bf16.msra.mxu0 %v7189_v18 }
 0x181   : > { %3827 = vmatpush2.bf16.msra.mxu1 %v7192_v19  ;;  %3785 = vmatprep.subr.bf16.mxu0 %v7197_v22  ;;  %v7269_v19 = vld [vmem:[#allocation2 + $0x2ec] ss:$28 sps:$4 sm:$0xff]  }
 0x182   : > { %3828 = vmatprep.subr.bf16.mxu1 %v7200_v23  ;;  %v7272_v22 = vld [vmem:[#allocation2 + $0x66c] ss:$28 sps:$4 sm:$0xff]  }
 0x184   : > { %3786 = vmatpush2.bf16.msra.mxu0 %v7195_v24 }
 0x185   : > { %3829 = vmatpush2.bf16.msra.mxu1 %v7198_v25  ;;  %3787 = vmatprep.subr.bf16.mxu0 %v7203_v26 }
 0x186   : > { %3830 = vmatprep.subr.bf16.mxu1 %v7206_v27  ;;  %v7267_v27 = vld [vmem:[#allocation2 + $0x2e8] ss:$28 sps:$4 sm:$0xff]  }
 0x188   : > { %3788 = vmatpush2.bf16.msra.mxu0 %v7201_v28  ;;  %v7270_v28 = vld [vmem:[#allocation2 + $0x668] ss:$28 sps:$4 sm:$0xff]  }
 0x189   : > { %3831 = vmatpush2.bf16.msra.mxu1 %v7204_v29  ;;  %3843 = vmatprep.subr.bf16.mxu0 %v7209_v30 }
 0x18a   : > { %3886 = vmatprep.subr.bf16.mxu1 %v7212_v31  ;;  %v7275_v31 = vld [vmem:[#allocation2 + $0x2b4] ss:$28 sps:$4 sm:$0xff]  }
 0x18b   : > { %3790 = vmatmul.mubr.bf16.vlgmr.msra.gmra.mxu0 %v7862_v16  ;;  %v7230_v16 = vld [vmem:[#allocation2 + $0x474] ss:$28 sps:$4 sm:$0xff]  }
 0x18c   : > { %3833 = vmatmul.mubr.bf16.vlgmr.msra.gmra.mxu1 %v7866_v17  ;;  %3844 = vmatpush1.bf16.msra.mxu0 %v7207_v32  ;;  %v7225_v17 = vld [vmem:[#allocation2 + $0xf0] ss:$28 sps:$4 sm:$0xff]  }
 0x18d   : > { %3887 = vmatpush1.bf16.msra.mxu1 %v7210_v33  ;;  %3845 = vmatprep.subr.bf16.mxu0 %v7215_v34  ;;  %v7278_v32 = vld [vmem:[#allocation2 + $0x634] ss:$28 sps:$4 sm:$0xff]  }
 0x18e   : > { %3888 = vmatprep.subr.bf16.mxu1 %v7218_v35  ;;  %3875 = vmatprep.mubr.bf16.mxu0 %v7846_v6  ;;  %v7234_v6 = vld [vmem:[#allocation2 + $0x438] ss:$28 sps:$4 sm:$0xff]   ;;  %v7273_v34 = vld [vmem:[#allocation2 + $0x2b0] ss:$28 sps:$4 sm:$0xff]  }
 0x18f   : > { %3918 = vmatprep.mubr.bf16.mxu1 %v7850_v7  ;;  %v7239_v7 = vld [vmem:[#allocation2 + $0x84] ss:$28 sps:$4 sm:$0xff]   ;;  %v7276_v35 = vld [vmem:[#allocation2 + $0x630] ss:$28 sps:$4 sm:$0xff]  }
 0x190   : > { %3846 = vmatpush1.bf16.msra.mxu0 %v7213_v36  ;;  %v7281_v36 = vld [vmem:[#allocation2 + $0x27c] ss:$28 sps:$4 sm:$0xff]  }
 0x191   : > { %3889 = vmatpush1.bf16.msra.mxu1 %v7216_v37  ;;  %3847 = vmatprep.subr.bf16.mxu0 %v7221_v38  ;;  %v7284_v37 = vld [vmem:[#allocation2 + $0x5fc] ss:$28 sps:$4 sm:$0xff]  }
 0x192   : > { %3890 = vmatprep.subr.bf16.mxu1 %v7224_v40  ;;  %v7279_v38 = vld [vmem:[#allocation2 + $0x278] ss:$28 sps:$4 sm:$0xff]  }
 0x193   : > { %v7282_v40 = vld [vmem:[#allocation2 + $0x5f8] ss:$28 sps:$4 sm:$0xff]  }
 0x194   : > { %3848 = vmatpush1.bf16.msra.mxu0 %v7219_v41  ;;  %v7287_v41 = vld [vmem:[#allocation2 + $0x244] ss:$28 sps:$4 sm:$0xff]  }
 0x195   : > { %3891 = vmatpush1.bf16.msra.mxu1 %v7222_v42  ;;  %3849 = vmatprep.subr.bf16.mxu0 %v7227_v43  ;;  %v7290_v42 = vld [vmem:[#allocation2 + $0x5c4] ss:$28 sps:$4 sm:$0xff]  }
 0x196   : > { %3892 = vmatprep.subr.bf16.mxu1 %v7230_v16  ;;  %v7285_v43 = vld [vmem:[#allocation2 + $0x240] ss:$28 sps:$4 sm:$0xff]  }
 0x197   : > { %v7288_v16 = vld [vmem:[#allocation2 + $0x5c0] ss:$28 sps:$4 sm:$0xff]  }
 0x198   : > { %3850 = vmatpush1.bf16.msra.mxu0 %v7225_v17  ;;  %v7293_v17 = vld [vmem:[#allocation2 + $0x20c] ss:$28 sps:$4 sm:$0xff]  }
 0x199   : > { %3893 = vmatpush1.bf16.msra.mxu1 %v7228_v44  ;;  %3851 = vmatprep.subr.bf16.mxu0 %v7233_v46  ;;  %v7296_v44 = vld [vmem:[#allocation2 + $0x58c] ss:$28 sps:$4 sm:$0xff]  }
 0x19a   : > { %3894 = vmatprep.subr.bf16.mxu1 %v7236_v62  ;;  %v7291_v46 = vld [vmem:[#allocation2 + $0x208] ss:$28 sps:$4 sm:$0xff]  }
 0x19b   : > { %v7294_v62 = vld [vmem:[#allocation2 + $0x588] ss:$28 sps:$4 sm:$0xff]  }
 0x19c   : > { %3852 = vmatpush1.bf16.msra.mxu0 %v7231_v0  ;;  %v7299_v0 = vld [vmem:[#allocation2 + $0x1d4] ss:$28 sps:$4 sm:$0xff]  }
 0x19d   : > { %3895 = vmatpush1.bf16.msra.mxu1 %v7234_v6  ;;  %3853 = vmatprep.subr.bf16.mxu0 %v7239_v7  ;;  %v7302_v6 = vld [vmem:[#allocation2 + $0x554] ss:$28 sps:$4 sm:$0xff]  }
 0x19e   : > { %3896 = vmatprep.subr.bf16.mxu1 %v7242_v48  ;;  %v7297_v7 = vld [vmem:[#allocation2 + $0x1d0] ss:$28 sps:$4 sm:$0xff]  }
 0x19f   : > { %v7300_v48 = vld [vmem:[#allocation2 + $0x550] ss:$28 sps:$4 sm:$0xff]  }
 0x1a0   : > { %3854 = vmatpush1.bf16.msra.mxu0 %v7237_v49  ;;  %v7303_v49 = vld [vmem:[#allocation2 + $0x360] ss:$28 sps:$4 sm:$0xff]  }
 0x1a1   : > { %3897 = vmatpush1.bf16.msra.mxu1 %v7240_v50  ;;  %3855 = vmatprep.subr.bf16.mxu0 %v7245_v51  ;;  %v7304_v50 = vld [vmem:[#allocation2 + $0x6e0] ss:$28 sps:$4 sm:$0xff]  }
 0x1a2   : > { %3898 = vmatprep.subr.bf16.mxu1 %v7248_v52  ;;  %v7305_v51 = vld [vmem:[#allocation2 + $0x1a0] ss:$28 sps:$4 sm:$0xff]  }
 0x1a3   : > { %v7306_v52 = vld [vmem:[#allocation2 + $0x520] ss:$28 sps:$4 sm:$0xff]  }
 0x1a4   : > { %3856 = vmatpush1.bf16.msra.mxu0 %v7243_v54  ;;  %v7307_v54 = vld [vmem:[#allocation2 + $0x328] ss:$28 sps:$4 sm:$0xff]  }
 0x1a5   : > { %3899 = vmatpush1.bf16.msra.mxu1 %v7246_v55  ;;  %3857 = vmatprep.subr.bf16.mxu0 %v7251_v56  ;;  %v7308_v55 = vld [vmem:[#allocation2 + $0x6a8] ss:$28 sps:$4 sm:$0xff]  }
 0x1a6   : > { %3900 = vmatprep.subr.bf16.mxu1 %v7254_v58  ;;  %v7309_v56 = vld [vmem:[#allocation2 + $0x168] ss:$28 sps:$4 sm:$0xff]  }
 0x1a7   : > { %v7310_v58 = vld [vmem:[#allocation2 + $0x4e8] ss:$28 sps:$4 sm:$0xff]  }
 0x1a8   : > { %3858 = vmatpush1.bf16.msra.mxu0 %v7249_v59 }
 0x1a9   : > { %3901 = vmatpush1.bf16.msra.mxu1 %v7252_v63  ;;  %3859 = vmatprep.subr.bf16.mxu0 %v7257_v1  ;;  %v7896_v1 = vld [vmem:[%s7815_s4] ss:$16 sps:$4 sm:$0xff]  }
 0x1aa   : > { %3902 = vmatprep.subr.bf16.mxu1 %v7260_v2  ;;  %v7900_v2 = vld [vmem:[%s7815_s4 + $0x8] ss:$16 sps:$4 sm:$0xff]  }
 0x1ab   : > { %v2381_v10 = vpop.f32.mrf.mxu0 }
 0x1ac   : > { %v2424_v11 = vpop.f32.mrf.mxu1  ;;  %3860 = vmatpush2.bf16.msra.mxu0 %v7255_v3 }
 0x1ad   : > { %v7887_v12 = vadd.f32 %v2424_v11, %v2381_v10  ;;  %3903 = vmatpush2.bf16.msra.mxu1 %v7258_v5  ;;  %v2383_v15 = vpop.f32.mrf.mxu0  ;;  %3861 = vmatprep.subr.bf16.mxu0 %v7263_v21  ;;  %v7311_v21 = vld [vmem:[#allocation2 + $0x2f0] ss:$28 sps:$4 sm:$0xff]  }
 0x1ae   : > { %v2426_v18 = vpop.f32.mrf.mxu1  ;;  %3904 = vmatprep.subr.bf16.mxu1 %v7266_v9  ;;  %v7312_v9 = vld [vmem:[#allocation2 + $0x670] ss:$28 sps:$4 sm:$0xff]  }
 0x1af   : > { %v7889_v23 = vadd.f32 %v2426_v18, %v2383_v15  ;;  %v2385_v24 = vpop.f32.mrf.mxu0  ;;  %v7904_v15 = vld [vmem:[%s7815_s4 + $0x4] ss:$16 sps:$4 sm:$0xff]   ;;  %v7908_v18 = vld [vmem:[%s7815_s4 + $0xc] ss:$16 sps:$4 sm:$0xff]  }
 0x1b0   : > { %v2428_v25 = vpop.f32.mrf.mxu1  ;;  %3862 = vmatpush2.bf16.msra.mxu0 %v7261_v13  ;;  %v7313_v13 = vld [vmem:[#allocation2 + $0x130] ss:$28 sps:$4 sm:$0xff]  }
 0x1b1   : > { %v7891_v26 = vadd.f32 %v2428_v25, %v2385_v24  ;;  %3905 = vmatpush2.bf16.msra.mxu1 %v7264_v14  ;;  %v2387_v29 = vpop.f32.mrf.mxu0  ;;  %3863 = vmatprep.subr.bf16.mxu0 %v7269_v19  ;;  %v7314_v14 = vld [vmem:[#allocation2 + $0x4b0] ss:$28 sps:$4 sm:$0xff]  }
 0x1b2   : > { %v2430_v30 = vpop.f32.mrf.mxu1  ;;  %3906 = vmatprep.subr.bf16.mxu1 %v7272_v22 }
 0x1b3   : > { %v7893_v33 = vadd.f32 %v2430_v30, %v2387_v29  ;;  %v7316_v29 = vld [vmem:[#allocation2 + $0x638] ss:$28 sps:$4 sm:$0xff]  }
 0x1b4   : > { %3864 = vmatpush2.bf16.msra.mxu0 %v7267_v27 }
 0x1b5   : > { %3907 = vmatpush2.bf16.msra.mxu1 %v7270_v28  ;;  %3865 = vmatprep.subr.bf16.mxu0 %v7275_v31  ;;  %v7315_v28 = vld [vmem:[#allocation2 + $0x2b8] ss:$28 sps:$4 sm:$0xff]  }
 0x1b6   : > { %3908 = vmatprep.subr.bf16.mxu1 %v7278_v32 }
 0x1b8   : > { %3866 = vmatpush2.bf16.msra.mxu0 %v7273_v34  ;;  %v7317_v34 = vld [vmem:[#allocation2 + $0xf8] ss:$28 sps:$4 sm:$0xff]  }
 0x1b9   : > { %3909 = vmatpush2.bf16.msra.mxu1 %v7276_v35  ;;  %3867 = vmatprep.subr.bf16.mxu0 %v7281_v36  ;;  %v7318_v35 = vld [vmem:[#allocation2 + $0x478] ss:$28 sps:$4 sm:$0xff]   ;;  %v7319_v36 = vld [vmem:[#allocation2 + $0x280] ss:$28 sps:$4 sm:$0xff]  }
 0x1ba   : > { %3910 = vmatprep.subr.bf16.mxu1 %v7284_v37  ;;  %v7320_v37 = vld [vmem:[#allocation2 + $0x600] ss:$28 sps:$4 sm:$0xff]  }
 0x1bc   : > { %3868 = vmatpush2.bf16.msra.mxu0 %v7279_v38  ;;  %v7321_v38 = vld [vmem:[#allocation2 + $0xc0] ss:$28 sps:$4 sm:$0xff]  }
 0x1bd   : > { %3911 = vmatpush2.bf16.msra.mxu1 %v7282_v40  ;;  %3869 = vmatprep.subr.bf16.mxu0 %v7287_v41  ;;  %v7322_v40 = vld [vmem:[#allocation2 + $0x440] ss:$28 sps:$4 sm:$0xff]   ;;  %v7323_v41 = vld [vmem:[#allocation2 + $0x248] ss:$28 sps:$4 sm:$0xff]  }
 0x1be   : > { %3912 = vmatprep.subr.bf16.mxu1 %v7290_v42  ;;  %v7324_v42 = vld [vmem:[#allocation2 + $0x5c8] ss:$28 sps:$4 sm:$0xff]  }
 0x1c0   : > { %3870 = vmatpush2.bf16.msra.mxu0 %v7285_v43  ;;  %v7325_v43 = vld [vmem:[#allocation2 + $0x88] ss:$28 sps:$4 sm:$0xff]  }
 0x1c1   : > { %3913 = vmatpush2.bf16.msra.mxu1 %v7288_v16  ;;  %3871 = vmatprep.subr.bf16.mxu0 %v7293_v17  ;;  %v7326_v16 = vld [vmem:[#allocation2 + $0x408] ss:$28 sps:$4 sm:$0xff]   ;;  %v7327_v17 = vld [vmem:[#allocation2 + $0x210] ss:$28 sps:$4 sm:$0xff]  }
 0x1c2   : > { %3914 = vmatprep.subr.bf16.mxu1 %v7296_v44  ;;  %v7328_v44 = vld [vmem:[#allocation2 + $0x590] ss:$28 sps:$4 sm:$0xff]  }
 0x1c4   : > { %3872 = vmatpush2.bf16.msra.mxu0 %v7291_v46  ;;  %v7329_v46 = vld [vmem:[#allocation2 + $0x50] ss:$28 sps:$4 sm:$0xff]  }
 0x1c5   : > { %3915 = vmatpush2.bf16.msra.mxu1 %v7294_v62  ;;  %3873 = vmatprep.subr.bf16.mxu0 %v7299_v0  ;;  %v7330_v62 = vld [vmem:[#allocation2 + $0x3d0] ss:$28 sps:$4 sm:$0xff]   ;;  %v7331_v0 = vld [vmem:[#allocation2 + $0x1d8] ss:$28 sps:$4 sm:$0xff]  }
 0x1c6   : > { %3916 = vmatprep.subr.bf16.mxu1 %v7302_v6  ;;  %v7332_v6 = vld [vmem:[#allocation2 + $0x558] ss:$28 sps:$4 sm:$0xff]  }
 0x1c8   : > { %3874 = vmatpush2.bf16.msra.mxu0 %v7297_v7  ;;  %v7333_v7 = vld [vmem:[#allocation2 + $0x18] ss:$28 sps:$4 sm:$0xff]  }
 0x1c9   : > { %3917 = vmatpush2.bf16.msra.mxu1 %v7300_v48  ;;  %6569 = vmatprep.subr.bf16.mxu0 %v7303_v49  ;;  %v7334_v48 = vld [vmem:[#allocation2 + $0x398] ss:$28 sps:$4 sm:$0xff]   ;;  %v7337_v49 = vld [vmem:[#allocation2 + $0xf8c] ss:$28 sps:$4 sm:$0xff]  }
 0x1ca   : > { %6591 = vmatprep.subr.bf16.mxu1 %v7304_v50  ;;  %v7340_v50 = vld [vmem:[#allocation2 + $0x130c] ss:$28 sps:$4 sm:$0xff]  }
 0x1cb   : > { %v6541_v59 = vpop.f32.mrf.mxu0  ;;  %3876 = vmatmul.mubr.bf16.vlgmr.msra.gmra.mxu0 %v7896_v1 }
 0x1cc   : > { %v6563_v63 = vpop.f32.mrf.mxu1  ;;  %3919 = vmatmul.mubr.bf16.vlgmr.msra.gmra.mxu1 %v7900_v2  ;;  %6570 = vmatpush3.bf16.msra.mxu0 %v7305_v51  ;;  %v7335_v51 = vld [vmem:[#allocation2 + $0xf88] ss:$28 sps:$4 sm:$0xff]  }
 0x1cd   : > { %6592 = vmatpush3.bf16.msra.mxu1 %v7306_v52  ;;  %v6542_v3 = vpop.f32.mrf.mxu0  ;;  %6571 = vmatprep.subr.bf16.mxu0 %v7307_v54  ;;  %v7338_v52 = vld [vmem:[#allocation2 + $0x1308] ss:$28 sps:$4 sm:$0xff]   ;;  %v7343_v54 = vld [vmem:[#allocation2 + $0xf54] ss:$28 sps:$4 sm:$0xff]  }
 0x1ce   : > { %v6564_v5 = vpop.f32.mrf.mxu1  ;;  %6593 = vmatprep.subr.bf16.mxu1 %v7308_v55  ;;  %v6543_v10 = vadd.f32 %v6542_v3, %v6541_v59  ;;  %3961 = vmatprep.mubr.bf16.mxu0 %v7904_v15  ;;  %v7346_v55 = vld [vmem:[#allocation2 + $0x12d4] ss:$28 sps:$4 sm:$0xff]   ;;  %v7349_v3 = vld [vmem:[#allocation2 + $0xf1c] ss:$28 sps:$4 sm:$0xff]  }
 0x1cf   : > { %v6565_v11 = vadd.f32 %v6564_v5, %v6563_v63  ;;  %4002 = vmatprep.mubr.bf16.mxu1 %v7908_v18  ;;  %v6544_v19 = vpop.f32.mrf.mxu0  ;;  %v7341_v59 = vld [vmem:[#allocation2 + $0xf50] ss:$28 sps:$4 sm:$0xff]   ;;  %v7352_v5 = vld [vmem:[#allocation2 + $0x129c] ss:$28 sps:$4 sm:$0xff]  }
 0x1d0   : > { %v6566_v22 = vpop.f32.mrf.mxu1  ;;  %6572 = vmatpush3.bf16.msra.mxu0 %v7309_v56  ;;  %v7916_v56 = vrot.slane %v7904_v15, 1  ;;  %v7344_v63 = vld [vmem:[#allocation2 + $0x12d0] ss:$28 sps:$4 sm:$0xff]  }
 0x1d1   : > { %v7911_v24 = vadd.f32 %v6565_v11, %v6543_v10  ;;  %6594 = vmatpush3.bf16.msra.mxu1 %v7310_v58  ;;  %v6545_v25 = vpop.f32.mrf.mxu0  ;;  %6573 = vmatprep.subr.bf16.mxu0 %v7311_v21  ;;  %v7919_v58 = vrot.slane %v7908_v18, 1  ;;  %v7347_v21 = vld [vmem:[#allocation2 + $0xf18] ss:$28 sps:$4 sm:$0xff]   ;;  %v7355_v10 = vld [vmem:[#allocation2 + $0xee4] ss:$28 sps:$4 sm:$0xff]  }
 0x1d2   : > { %v6567_v27 = vpop.f32.mrf.mxu1  ;;  %6595 = vmatprep.subr.bf16.mxu1 %v7312_v9  ;;  %v6546_v30 = vadd.f32 %v6545_v25, %v6544_v19  ;;  %v7350_v9 = vld [vmem:[#allocation2 + $0x1298] ss:$28 sps:$4 sm:$0xff]   ;;  %v7358_v11 = vld [vmem:[#allocation2 + $0x1264] ss:$28 sps:$4 sm:$0xff]   ;;  %v7361_v15 = vld [vmem:[#allocation2 + $0xeac] ss:$28 sps:$4 sm:$0xff]  }
 0x1d3   : > { %v6568_v31 = vadd.f32 %v6567_v27, %v6566_v22  ;;  %v7364_v18 = vld [vmem:[#allocation2 + $0x122c] ss:$28 sps:$4 sm:$0xff]   ;;  %v7367_v25 = vld [vmem:[#allocation2 + $0xe74] ss:$28 sps:$4 sm:$0xff]  }
 0x1d4   : > { %6574 = vmatpush3.bf16.msra.mxu0 %v7313_v13  ;;  %v7353_v13 = vld [vmem:[#allocation2 + $0xee0] ss:$28 sps:$4 sm:$0xff]   ;;  %v7359_v19 = vld [vmem:[#allocation2 + $0xea8] ss:$28 sps:$4 sm:$0xff]   ;;  %v7370_v27 = vld [vmem:[#allocation2 + $0x11f4] ss:$28 sps:$4 sm:$0xff]  }
 0x1d5   : > { %v7913_v32 = vadd.f32 %v6568_v31, %v6546_v30  ;;  %6596 = vmatpush3.bf16.msra.mxu1 %v7314_v14  ;;  %6575 = vmatprep.subr.bf16.mxu0 %v7315_v28  ;;  %v7356_v14 = vld [vmem:[#allocation2 + $0x1260] ss:$28 sps:$4 sm:$0xff]   ;;  %v7362_v22 = vld [vmem:[#allocation2 + $0x1228] ss:$28 sps:$4 sm:$0xff]   ;;  %v7365_v28 = vld [vmem:[#allocation2 + $0xe70] ss:$28 sps:$4 sm:$0xff]  }
 0x1d6   : > { %6597 = vmatprep.subr.bf16.mxu1 %v7316_v29  ;;  %v7368_v29 = vld [vmem:[#allocation2 + $0x11f0] ss:$28 sps:$4 sm:$0xff]   ;;  %v7373_v30 = vld [vmem:[#allocation2 + $0xe3c] ss:$28 sps:$4 sm:$0xff]  }
 0x1d7   : > { %v7376_v31 = vld [vmem:[#allocation2 + $0x11bc] ss:$28 sps:$4 sm:$0xff]  }
 0x1d8   : > { %6576 = vmatpush3.bf16.msra.mxu0 %v7317_v34  ;;  %v7371_v34 = vld [vmem:[#allocation2 + $0xe38] ss:$28 sps:$4 sm:$0xff]  }
 0x1d9   : > { %6598 = vmatpush3.bf16.msra.mxu1 %v7318_v35  ;;  %6577 = vmatprep.subr.bf16.mxu0 %v7319_v36  ;;  %v7374_v35 = vld [vmem:[#allocation2 + $0x11b8] ss:$28 sps:$4 sm:$0xff]   ;;  %v7379_v36 = vld [vmem:[#allocation2 + $0xe04] ss:$28 sps:$4 sm:$0xff]  }
 0x1da   : > { %6599 = vmatprep.subr.bf16.mxu1 %v7320_v37  ;;  %v7382_v37 = vld [vmem:[#allocation2 + $0x1184] ss:$28 sps:$4 sm:$0xff]  }
 0x1dc   : > { %6578 = vmatpush3.bf16.msra.mxu0 %v7321_v38  ;;  %v7377_v38 = vld [vmem:[#allocation2 + $0xe00] ss:$28 sps:$4 sm:$0xff]  }
 0x1dd   : > { %6600 = vmatpush3.bf16.msra.mxu1 %v7322_v40  ;;  %6579 = vmatprep.subr.bf16.mxu0 %v7323_v41  ;;  %v7380_v40 = vld [vmem:[#allocation2 + $0x1180] ss:$28 sps:$4 sm:$0xff]   ;;  %v7385_v41 = vld [vmem:[#allocation2 + $0x114c] ss:$28 sps:$4 sm:$0xff]  }
 0x1de   : > { %6601 = vmatprep.subr.bf16.mxu1 %v7324_v42  ;;  %v7388_v42 = vld [vmem:[#allocation2 + $0x14cc] ss:$28 sps:$4 sm:$0xff]  }
 0x1e0   : > { %6580 = vmatpush3.bf16.msra.mxu0 %v7325_v43  ;;  %v7383_v43 = vld [vmem:[#allocation2 + $0x1148] ss:$28 sps:$4 sm:$0xff]  }
 0x1e1   : > { %6602 = vmatpush3.bf16.msra.mxu1 %v7326_v16  ;;  %6581 = vmatprep.subr.bf16.mxu0 %v7327_v17  ;;  %v7386_v16 = vld [vmem:[#allocation2 + $0x14c8] ss:$28 sps:$4 sm:$0xff]   ;;  %v7391_v17 = vld [vmem:[#allocation2 + $0x1114] ss:$28 sps:$4 sm:$0xff]  }
 0x1e2   : > { %6603 = vmatprep.subr.bf16.mxu1 %v7328_v44  ;;  %v7394_v44 = vld [vmem:[#allocation2 + $0x1494] ss:$28 sps:$4 sm:$0xff]  }
 0x1e4   : > { %6582 = vmatpush3.bf16.msra.mxu0 %v7329_v46 }
 0x1e5   : > { %6604 = vmatpush3.bf16.msra.mxu1 %v7330_v62  ;;  %6583 = vmatprep.subr.bf16.mxu0 %v7331_v0 }
 0x1e6   : > { %6605 = vmatprep.subr.bf16.mxu1 %v7332_v6  ;;  %v7389_v6 = vld [vmem:[#allocation2 + $0x1110] ss:$28 sps:$4 sm:$0xff]  }
 0x1e8   : > { %6584 = vmatpush3.bf16.msra.mxu0 %v7333_v7  ;;  %v7392_v7 = vld [vmem:[#allocation2 + $0x1490] ss:$28 sps:$4 sm:$0xff]  }
 0x1e9   : > { %6606 = vmatpush3.bf16.msra.mxu1 %v7334_v48  ;;  %5171 = vmatprep.subr.bf16.mxu0 %v7337_v49 }
 0x1ea   : > { %5214 = vmatprep.subr.bf16.mxu1 %v7340_v50  ;;  %v7397_v50 = vld [vmem:[#allocation2 + $0x10dc] ss:$28 sps:$4 sm:$0xff]  }
 0x1eb   : > { %3962 = vmatmul.mubr.bf16.vlgmr.msra.gmra.mxu0 %v7896_v1 }
 0x1ec   : > { %4003 = vmatmul.mubr.bf16.vlgmr.msra.gmra.mxu1 %v7900_v2  ;;  %5172 = vmatpush1.bf16.msra.mxu0 %v7335_v51  ;;  %v7400_v51 = vld [vmem:[#allocation2 + $0x145c] ss:$28 sps:$4 sm:$0xff]  }
 0x1ed   : > { %5215 = vmatpush1.bf16.msra.mxu1 %v7338_v52  ;;  %5173 = vmatprep.subr.bf16.mxu0 %v7343_v54 }
 0x1ee   : > { %5216 = vmatprep.subr.bf16.mxu1 %v7346_v55  ;;  %5203 = vmatprep.mubr.bf16.mxu0 %v7916_v56 }
 0x1ef   : > { %5246 = vmatprep.mubr.bf16.mxu1 %v7919_v58 }
 0x1f0   : > { %5174 = vmatpush1.bf16.msra.mxu0 %v7341_v59 }
 0x1f1   : > { %5217 = vmatpush1.bf16.msra.mxu1 %v7344_v63  ;;  %5175 = vmatprep.subr.bf16.mxu0 %v7349_v3  ;;  %v7395_v3 = vld [vmem:[#allocation2 + $0x10d8] ss:$28 sps:$4 sm:$0xff]  }
 0x1f2   : > { %5218 = vmatprep.subr.bf16.mxu1 %v7352_v5  ;;  %v7398_v5 = vld [vmem:[#allocation2 + $0x1458] ss:$28 sps:$4 sm:$0xff]  }
 0x1f4   : > { %5176 = vmatpush1.bf16.msra.mxu0 %v7347_v21 }
 0x1f5   : > { %5219 = vmatpush1.bf16.msra.mxu1 %v7350_v9  ;;  %5177 = vmatprep.subr.bf16.mxu0 %v7355_v10  ;;  %v7403_v9 = vld [vmem:[#allocation2 + $0x10a4] ss:$28 sps:$4 sm:$0xff]  }
 0x1f6   : > { %5220 = vmatprep.subr.bf16.mxu1 %v7358_v11  ;;  %v7406_v10 = vld [vmem:[#allocation2 + $0x1424] ss:$28 sps:$4 sm:$0xff]  }
 0x1f8   : > { %5178 = vmatpush1.bf16.msra.mxu0 %v7353_v13 }
 0x1f9   : > { %5221 = vmatpush1.bf16.msra.mxu1 %v7356_v14  ;;  %5179 = vmatprep.subr.bf16.mxu0 %v7361_v15  ;;  %v7401_v15 = vld [vmem:[#allocation2 + $0x10a0] ss:$28 sps:$4 sm:$0xff]  }
 0x1fa   : > { %5222 = vmatprep.subr.bf16.mxu1 %v7364_v18  ;;  %v7409_v18 = vld [vmem:[#allocation2 + $0x106c] ss:$28 sps:$4 sm:$0xff]  }
 0x1fc   : > { %5180 = vmatpush1.bf16.msra.mxu0 %v7359_v19  ;;  %v7412_v19 = vld [vmem:[#allocation2 + $0x13ec] ss:$28 sps:$4 sm:$0xff]  }
 0x1fd   : > { %5223 = vmatpush1.bf16.msra.mxu1 %v7362_v22  ;;  %5181 = vmatprep.subr.bf16.mxu0 %v7367_v25  ;;  %v7407_v22 = vld [vmem:[#allocation2 + $0x1068] ss:$28 sps:$4 sm:$0xff]  }
 0x1fe   : > { %5224 = vmatprep.subr.bf16.mxu1 %v7370_v27  ;;  %v7410_v25 = vld [vmem:[#allocation2 + $0x13e8] ss:$28 sps:$4 sm:$0xff]   ;;  %v7415_v27 = vld [vmem:[#allocation2 + $0x1034] ss:$28 sps:$4 sm:$0xff]  }
 0x200   : > { %5182 = vmatpush1.bf16.msra.mxu0 %v7365_v28  ;;  %v7418_v28 = vld [vmem:[#allocation2 + $0x13b4] ss:$28 sps:$4 sm:$0xff]  }
 0x201   : > { %5225 = vmatpush1.bf16.msra.mxu1 %v7368_v29  ;;  %5183 = vmatprep.subr.bf16.mxu0 %v7373_v30  ;;  %v7416_v29 = vld [vmem:[#allocation2 + $0x13b0] ss:$28 sps:$4 sm:$0xff]   ;;  %v7421_v30 = vld [vmem:[#allocation2 + $0xffc] ss:$28 sps:$4 sm:$0xff]  }
 0x202   : > { %5226 = vmatprep.subr.bf16.mxu1 %v7376_v31  ;;  %v7424_v31 = vld [vmem:[#allocation2 + $0x137c] ss:$28 sps:$4 sm:$0xff]  }
 0x204   : > { %5184 = vmatpush1.bf16.msra.mxu0 %v7371_v34  ;;  %v7419_v34 = vld [vmem:[#allocation2 + $0xff8] ss:$28 sps:$4 sm:$0xff]  }
 0x205   : > { %5227 = vmatpush1.bf16.msra.mxu1 %v7374_v35  ;;  %5185 = vmatprep.subr.bf16.mxu0 %v7379_v36  ;;  %v7422_v35 = vld [vmem:[#allocation2 + $0x1378] ss:$28 sps:$4 sm:$0xff]   ;;  %v7427_v36 = vld [vmem:[#allocation2 + $0xfc4] ss:$28 sps:$4 sm:$0xff]  }
 0x206   : > { %5228 = vmatprep.subr.bf16.mxu1 %v7382_v37  ;;  %v7430_v37 = vld [vmem:[#allocation2 + $0x1344] ss:$28 sps:$4 sm:$0xff]  }
 0x208   : > { %5186 = vmatpush1.bf16.msra.mxu0 %v7377_v38  ;;  %v7425_v38 = vld [vmem:[#allocation2 + $0xfc0] ss:$28 sps:$4 sm:$0xff]  }
 0x209   : > { %5229 = vmatpush1.bf16.msra.mxu1 %v7380_v40  ;;  %5187 = vmatprep.subr.bf16.mxu0 %v7385_v41  ;;  %v7428_v40 = vld [vmem:[#allocation2 + $0x1340] ss:$28 sps:$4 sm:$0xff]   ;;  %v7433_v41 = vld [vmem:[#allocation2 + $0xf94] ss:$28 sps:$4 sm:$0xff]  }
 0x20a   : > { %5230 = vmatprep.subr.bf16.mxu1 %v7388_v42  ;;  %v7436_v42 = vld [vmem:[#allocation2 + $0x1314] ss:$28 sps:$4 sm:$0xff]  }
 0x20b   : > { %v3705_v46 = vpop.f32.mrf.mxu0 }
 0x20c   : > { %v3748_v62 = vpop.f32.mrf.mxu1  ;;  %v3706_v0 = vadd.f32 %v3705_v46, %v7853_v39  ;;  %5188 = vmatpush2.bf16.msra.mxu0 %v7383_v43  ;;  %v7938_v43 = vrot.slane %v7896_v1, 1  ;;  %v7439_v46 = vld [vmem:[#allocation2 + $0xf5c] ss:$28 sps:$4 sm:$0xff]  }
 0x20d   : > { %5231 = vmatpush2.bf16.msra.mxu1 %v7386_v16  ;;  %v3707_v48 = vpop.f32.mrf.mxu0  ;;  %5189 = vmatprep.subr.bf16.mxu0 %v7391_v17  ;;  %v7941_v16 = vrot.slane %v7900_v2, 1  ;;  %v7431_v17 = vld [vmem:[#allocation2 + $0xf90] ss:$28 sps:$4 sm:$0xff]   ;;  %v7440_v1 = vld [vmem:[#allocation2 + $0x12d8] ss:$28 sps:$4 sm:$0xff]  }
 0x20e   : > { %v3750_v49 = vpop.f32.mrf.mxu1  ;;  %5232 = vmatprep.subr.bf16.mxu1 %v7394_v44  ;;  %v7926_v52 = vadd.f32 %v3748_v62, %v3706_v0  ;;  %v3708_v54 = vadd.f32 %v3707_v48, %v7855_v45  ;;  %v7434_v44 = vld [vmem:[#allocation2 + $0x1310] ss:$28 sps:$4 sm:$0xff]   ;;  %v7442_v62 = vld [vmem:[#allocation2 + $0x12dc] ss:$28 sps:$4 sm:$0xff]   ;;  %v7445_v2 = vld [vmem:[#allocation2 + $0xf24] ss:$28 sps:$4 sm:$0xff]  }
 0x20f   : > { %v3709_v55 = vpop.f32.mrf.mxu0  ;;  %v7437_v0 = vld [vmem:[#allocation2 + $0xf58] ss:$28 sps:$4 sm:$0xff]   ;;  %v7446_v48 = vld [vmem:[#allocation2 + $0x12a0] ss:$28 sps:$4 sm:$0xff]  }
 0x210   : > { %v3752_v59 = vpop.f32.mrf.mxu1  ;;  %v7929_v63 = vadd.f32 %v3750_v49, %v3708_v54  ;;  %v3710_v39 = vadd.f32 %v3709_v55, %v7857_v47  ;;  %5190 = vmatpush2.bf16.msra.mxu0 %v7389_v6  ;;  %v7404_v47 = vld [vmem:[#allocation2 + $0x1420] ss:$28 sps:$4 sm:$0xff]   ;;  %v7451_v49 = vld [vmem:[#allocation2 + $0xeec] ss:$28 sps:$4 sm:$0xff]   ;;  %v7457_v55 = vld [vmem:[#allocation2 + $0xeb4] ss:$28 sps:$4 sm:$0xff]  }
 0x211   : > { %5233 = vmatpush2.bf16.msra.mxu1 %v7392_v7  ;;  %v3711_v21 = vpop.f32.mrf.mxu0  ;;  %5191 = vmatprep.subr.bf16.mxu0 %v7397_v50  ;;  %v7448_v6 = vld [vmem:[#allocation2 + $0x12a4] ss:$28 sps:$4 sm:$0xff]   ;;  %v7454_v50 = vld [vmem:[#allocation2 + $0x126c] ss:$28 sps:$4 sm:$0xff]  }
 0x212   : > { %5234 = vmatprep.subr.bf16.mxu1 %v7400_v51  ;;  %v7932_v11 = vadd.f32 %v3752_v59, %v3710_v39  ;;  %v3712_v13 = vadd.f32 %v3711_v21, %v7859_v53  ;;  %v3754_v45 = vpop.f32.mrf.mxu1  ;;  %v7413_v53 = vld [vmem:[#allocation2 + $0x1030] ss:$28 sps:$4 sm:$0xff]   ;;  %v7443_v7 = vld [vmem:[#allocation2 + $0xf20] ss:$28 sps:$4 sm:$0xff]   ;;  %v7449_v51 = vld [vmem:[#allocation2 + $0xee8] ss:$28 sps:$4 sm:$0xff]  }
 0x213   : > { %v7452_v54 = vld [vmem:[#allocation2 + $0x1268] ss:$28 sps:$4 sm:$0xff]   ;;  %v7460_v59 = vld [vmem:[#allocation2 + $0x1234] ss:$28 sps:$4 sm:$0xff]   ;;  %v7466_v21 = vld [vmem:[#allocation2 + $0x11fc] ss:$28 sps:$4 sm:$0xff]  }
 0x214   : > { %v7935_v14 = vadd.f32 %v3754_v45, %v3712_v13  ;;  %5192 = vmatpush2.bf16.msra.mxu0 %v7395_v3  ;;  %v7455_v39 = vld [vmem:[#allocation2 + $0xeb0] ss:$28 sps:$4 sm:$0xff]   ;;  %v7469_v13 = vld [vmem:[#allocation2 + $0xe44] ss:$28 sps:$4 sm:$0xff]  }
 0x215   : > { %5235 = vmatpush2.bf16.msra.mxu1 %v7398_v5  ;;  %5193 = vmatprep.subr.bf16.mxu0 %v7403_v9  ;;  %v7458_v3 = vld [vmem:[#allocation2 + $0x1230] ss:$28 sps:$4 sm:$0xff]   ;;  %v7463_v5 = vld [vmem:[#allocation2 + $0xe7c] ss:$28 sps:$4 sm:$0xff]   ;;  %v7472_v45 = vld [vmem:[#allocation2 + $0x11c4] ss:$28 sps:$4 sm:$0xff]  }
 0x216   : > { %5236 = vmatprep.subr.bf16.mxu1 %v7406_v10  ;;  %v7461_v9 = vld [vmem:[#allocation2 + $0xe78] ss:$28 sps:$4 sm:$0xff]  }
 0x217   : > { %v7464_v10 = vld [vmem:[#allocation2 + $0x11f8] ss:$28 sps:$4 sm:$0xff]  }
 0x218   : > { %5194 = vmatpush2.bf16.msra.mxu0 %v7401_v15  ;;  %v7467_v15 = vld [vmem:[#allocation2 + $0xe40] ss:$28 sps:$4 sm:$0xff]  }
 0x219   : > { %5237 = vmatpush2.bf16.msra.mxu1 %v7404_v47  ;;  %5195 = vmatprep.subr.bf16.mxu0 %v7409_v18  ;;  %v7470_v47 = vld [vmem:[#allocation2 + $0x11c0] ss:$28 sps:$4 sm:$0xff]   ;;  %v7475_v18 = vld [vmem:[#allocation2 + $0xe0c] ss:$28 sps:$4 sm:$0xff]  }
 0x21a   : > { %5238 = vmatprep.subr.bf16.mxu1 %v7412_v19  ;;  %v7478_v19 = vld [vmem:[#allocation2 + $0x118c] ss:$28 sps:$4 sm:$0xff]  }
 0x21c   : > { %5196 = vmatpush2.bf16.msra.mxu0 %v7407_v22  ;;  %v7473_v22 = vld [vmem:[#allocation2 + $0xe08] ss:$28 sps:$4 sm:$0xff]  }
 0x21d   : > { %5239 = vmatpush2.bf16.msra.mxu1 %v7410_v25  ;;  %5197 = vmatprep.subr.bf16.mxu0 %v7415_v27  ;;  %v7476_v25 = vld [vmem:[#allocation2 + $0x1188] ss:$28 sps:$4 sm:$0xff]   ;;  %v7481_v27 = vld [vmem:[#allocation2 + $0x1154] ss:$28 sps:$4 sm:$0xff]  }
 0x21e   : > { %5240 = vmatprep.subr.bf16.mxu1 %v7418_v28  ;;  %v7484_v28 = vld [vmem:[#allocation2 + $0x14d4] ss:$28 sps:$4 sm:$0xff]  }
 0x220   : > { %5198 = vmatpush2.bf16.msra.mxu0 %v7413_v53  ;;  %v7479_v53 = vld [vmem:[#allocation2 + $0x1150] ss:$28 sps:$4 sm:$0xff]  }
 0x221   : > { %5241 = vmatpush2.bf16.msra.mxu1 %v7416_v29  ;;  %5199 = vmatprep.subr.bf16.mxu0 %v7421_v30  ;;  %v7482_v29 = vld [vmem:[#allocation2 + $0x14d0] ss:$28 sps:$4 sm:$0xff]   ;;  %v7487_v30 = vld [vmem:[#allocation2 + $0x111c] ss:$28 sps:$4 sm:$0xff]  }
 0x222   : > { %5242 = vmatprep.subr.bf16.mxu1 %v7424_v31  ;;  %v7490_v31 = vld [vmem:[#allocation2 + $0x149c] ss:$28 sps:$4 sm:$0xff]  }
 0x224   : > { %5200 = vmatpush2.bf16.msra.mxu0 %v7419_v34 }
 0x225   : > { %5243 = vmatpush2.bf16.msra.mxu1 %v7422_v35  ;;  %5201 = vmatprep.subr.bf16.mxu0 %v7427_v36 }
 0x226   : > { %5244 = vmatprep.subr.bf16.mxu1 %v7430_v37  ;;  %v7485_v37 = vld [vmem:[#allocation2 + $0x1118] ss:$28 sps:$4 sm:$0xff]  }
 0x228   : > { %5202 = vmatpush2.bf16.msra.mxu0 %v7425_v38  ;;  %v7488_v38 = vld [vmem:[#allocation2 + $0x1498] ss:$28 sps:$4 sm:$0xff]  }
 0x229   : > { %5245 = vmatpush2.bf16.msra.mxu1 %v7428_v40  ;;  %5257 = vmatprep.subr.bf16.mxu0 %v7433_v41 }
 0x22a   : > { %5300 = vmatprep.subr.bf16.mxu1 %v7436_v42  ;;  %v7493_v42 = vld [vmem:[#allocation2 + $0x10e4] ss:$28 sps:$4 sm:$0xff]  }
 0x22b   : > { %5204 = vmatmul.mubr.bf16.vlgmr.msra.gmra.mxu0 %v7938_v43 }
 0x22c   : > { %5247 = vmatmul.mubr.bf16.vlgmr.msra.gmra.mxu1 %v7941_v16  ;;  %5258 = vmatpush1.bf16.msra.mxu0 %v7431_v17  ;;  %v7496_v17 = vld [vmem:[#allocation2 + $0x1464] ss:$28 sps:$4 sm:$0xff]  }
 0x22d   : > { %5301 = vmatpush1.bf16.msra.mxu1 %v7434_v44  ;;  %5259 = vmatprep.subr.bf16.mxu0 %v7439_v46 }
 0x22e   : > { %5302 = vmatprep.subr.bf16.mxu1 %v7442_v62  ;;  %5289 = vmatprep.mubr.bf16.mxu0 %v7916_v56 }
 0x22f   : > { %5332 = vmatprep.mubr.bf16.mxu1 %v7919_v58 }
 0x230   : > { %5260 = vmatpush1.bf16.msra.mxu0 %v7437_v0  ;;  %v7494_v0 = vld [vmem:[#allocation2 + $0x1460] ss:$28 sps:$4 sm:$0xff]  }
 0x231   : > { %5303 = vmatpush1.bf16.msra.mxu1 %v7440_v1  ;;  %5261 = vmatprep.subr.bf16.mxu0 %v7445_v2  ;;  %v7499_v2 = vld [vmem:[#allocation2 + $0x10ac] ss:$28 sps:$4 sm:$0xff]  }
 0x232   : > { %5304 = vmatprep.subr.bf16.mxu1 %v7448_v6  ;;  %v7502_v6 = vld [vmem:[#allocation2 + $0x142c] ss:$28 sps:$4 sm:$0xff]  }
 0x234   : > { %5262 = vmatpush1.bf16.msra.mxu0 %v7443_v7 }
 0x235   : > { %5305 = vmatpush1.bf16.msra.mxu1 %v7446_v48  ;;  %5263 = vmatprep.subr.bf16.mxu0 %v7451_v49  ;;  %v7497_v48 = vld [vmem:[#allocation2 + $0x10a8] ss:$28 sps:$4 sm:$0xff]  }
 0x236   : > { %5306 = vmatprep.subr.bf16.mxu1 %v7454_v50  ;;  %v7500_v49 = vld [vmem:[#allocation2 + $0x1428] ss:$28 sps:$4 sm:$0xff]   ;;  %v7505_v50 = vld [vmem:[#allocation2 + $0x1074] ss:$28 sps:$4 sm:$0xff]  }
 0x238   : > { %5264 = vmatpush1.bf16.msra.mxu0 %v7449_v51  ;;  %v7508_v51 = vld [vmem:[#allocation2 + $0x13f4] ss:$28 sps:$4 sm:$0xff]  }
 0x239   : > { %5307 = vmatpush1.bf16.msra.mxu1 %v7452_v54  ;;  %5265 = vmatprep.subr.bf16.mxu0 %v7457_v55  ;;  %v7506_v54 = vld [vmem:[#allocation2 + $0x13f0] ss:$28 sps:$4 sm:$0xff]   ;;  %v7511_v55 = vld [vmem:[#allocation2 + $0x103c] ss:$28 sps:$4 sm:$0xff]  }
 0x23a   : > { %5308 = vmatprep.subr.bf16.mxu1 %v7460_v59  ;;  %v7514_v59 = vld [vmem:[#allocation2 + $0x13bc] ss:$28 sps:$4 sm:$0xff]  }
 0x23c   : > { %5266 = vmatpush1.bf16.msra.mxu0 %v7455_v39  ;;  %v7509_v39 = vld [vmem:[#allocation2 + $0x1038] ss:$28 sps:$4 sm:$0xff]  }
 0x23d   : > { %5309 = vmatpush1.bf16.msra.mxu1 %v7458_v3  ;;  %5267 = vmatprep.subr.bf16.mxu0 %v7463_v5  ;;  %v7512_v3 = vld [vmem:[#allocation2 + $0x13b8] ss:$28 sps:$4 sm:$0xff]   ;;  %v7517_v5 = vld [vmem:[#allocation2 + $0x1004] ss:$28 sps:$4 sm:$0xff]  }
 0x23e   : > { %5310 = vmatprep.subr.bf16.mxu1 %v7466_v21  ;;  %v7520_v21 = vld [vmem:[#allocation2 + $0x1384] ss:$28 sps:$4 sm:$0xff]  }
 0x240   : > { %5268 = vmatpush1.bf16.msra.mxu0 %v7461_v9  ;;  %v7515_v9 = vld [vmem:[#allocation2 + $0x1000] ss:$28 sps:$4 sm:$0xff]  }
 0x241   : > { %5311 = vmatpush1.bf16.msra.mxu1 %v7464_v10  ;;  %5269 = vmatprep.subr.bf16.mxu0 %v7469_v13  ;;  %v7518_v10 = vld [vmem:[#allocation2 + $0x1380] ss:$28 sps:$4 sm:$0xff]   ;;  %v7523_v13 = vld [vmem:[#allocation2 + $0xfcc] ss:$28 sps:$4 sm:$0xff]  }
 0x242   : > { %5312 = vmatprep.subr.bf16.mxu1 %v7472_v45  ;;  %v7526_v45 = vld [vmem:[#allocation2 + $0x134c] ss:$28 sps:$4 sm:$0xff]  }
 0x244   : > { %5270 = vmatpush1.bf16.msra.mxu0 %v7467_v15  ;;  %v7521_v15 = vld [vmem:[#allocation2 + $0xfc8] ss:$28 sps:$4 sm:$0xff]  }
 0x245   : > { %5313 = vmatpush1.bf16.msra.mxu1 %v7470_v47  ;;  %5271 = vmatprep.subr.bf16.mxu0 %v7475_v18  ;;  %v7524_v47 = vld [vmem:[#allocation2 + $0x1348] ss:$28 sps:$4 sm:$0xff]   ;;  %v7529_v18 = vld [vmem:[#allocation2 + $0xf9c] ss:$28 sps:$4 sm:$0xff]  }
 0x246   : > { %5314 = vmatprep.subr.bf16.mxu1 %v7478_v19  ;;  %v7532_v19 = vld [vmem:[#allocation2 + $0x131c] ss:$28 sps:$4 sm:$0xff]  }
 0x248   : > { %5272 = vmatpush1.bf16.msra.mxu0 %v7473_v22  ;;  %v7527_v22 = vld [vmem:[#allocation2 + $0xf98] ss:$28 sps:$4 sm:$0xff]  }
 0x249   : > { %5315 = vmatpush1.bf16.msra.mxu1 %v7476_v25  ;;  %5273 = vmatprep.subr.bf16.mxu0 %v7481_v27  ;;  %v7530_v25 = vld [vmem:[#allocation2 + $0x1318] ss:$28 sps:$4 sm:$0xff]   ;;  %v7535_v27 = vld [vmem:[#allocation2 + $0xf64] ss:$28 sps:$4 sm:$0xff]  }
 0x24a   : > { %5316 = vmatprep.subr.bf16.mxu1 %v7484_v28  ;;  %v7538_v28 = vld [vmem:[#allocation2 + $0x12e4] ss:$28 sps:$4 sm:$0xff]  }
 0x24b   : > { %v3791_v34 = vpop.f32.mrf.mxu0 }
 0x24c   : > { %v3834_v35 = vpop.f32.mrf.mxu1  ;;  %v3792_v36 = vadd.f32 %v3791_v34, %v7871_v57  ;;  %5274 = vmatpush2.bf16.msra.mxu0 %v7479_v53  ;;  %v7491_v57 = vld [vmem:[#allocation2 + $0x10e0] ss:$28 sps:$4 sm:$0xff]   ;;  %v7539_v34 = vld [vmem:[#allocation2 + $0xf28] ss:$28 sps:$4 sm:$0xff]  }
 0x24d   : > { %5317 = vmatpush2.bf16.msra.mxu1 %v7482_v29  ;;  %v7948_v40 = vpop.f32.mrf.mxu0  ;;  %5275 = vmatprep.subr.bf16.mxu0 %v7487_v30  ;;  %v7533_v53 = vld [vmem:[#allocation2 + $0xf60] ss:$28 sps:$4 sm:$0xff]   ;;  %v7541_v30 = vld [vmem:[#allocation2 + $0xf2c] ss:$28 sps:$4 sm:$0xff]  }
 0x24e   : > { %v7950_v41 = vpop.f32.mrf.mxu1  ;;  %5318 = vmatprep.subr.bf16.mxu1 %v7490_v31  ;;  %v7952_v44 = vadd.f32 %v3834_v35, %v3792_v36  ;;  %v7536_v29 = vld [vmem:[#allocation2 + $0x12e0] ss:$28 sps:$4 sm:$0xff]   ;;  %v7544_v31 = vld [vmem:[#allocation2 + $0x12ac] ss:$28 sps:$4 sm:$0xff]   ;;  %v7547_v36 = vld [vmem:[#allocation2 + $0xef4] ss:$28 sps:$4 sm:$0xff]  }
 0x24f   : > { %v3795_v46 = vpop.f32.mrf.mxu0  ;;  %v7542_v35 = vld [vmem:[#allocation2 + $0x12a8] ss:$28 sps:$4 sm:$0xff]  }
 0x250   : > { %v3796_v62 = vadd.f32 %v3795_v46, %v7877_v4  ;;  %5276 = vmatpush2.bf16.msra.mxu0 %v7485_v37  ;;  %v3838_v1 = vpop.f32.mrf.mxu1  ;;  %v7503_v4 = vld [vmem:[#allocation2 + $0x1070] ss:$28 sps:$4 sm:$0xff]   ;;  %v7556_v46 = vld [vmem:[#allocation2 + $0x123c] ss:$28 sps:$4 sm:$0xff]  }
 0x251   : > { %5319 = vmatpush2.bf16.msra.mxu1 %v7488_v38  ;;  %5277 = vmatprep.subr.bf16.mxu0 %v7493_v42  ;;  %v7550_v37 = vld [vmem:[#allocation2 + $0x1274] ss:$28 sps:$4 sm:$0xff]  }
 0x252   : > { %5320 = vmatprep.subr.bf16.mxu1 %v7496_v17  ;;  %v7955_v7 = vadd.f32 %v3838_v1, %v3796_v62  ;;  %v7545_v38 = vld [vmem:[#allocation2 + $0xef0] ss:$28 sps:$4 sm:$0xff]   ;;  %v7553_v17 = vld [vmem:[#allocation2 + $0xebc] ss:$28 sps:$4 sm:$0xff]   ;;  %v7562_v1 = vld [vmem:[#allocation2 + $0x1204] ss:$28 sps:$4 sm:$0xff]  }
 0x253   : > { %v7548_v42 = vld [vmem:[#allocation2 + $0x1270] ss:$28 sps:$4 sm:$0xff]   ;;  %v7551_v62 = vld [vmem:[#allocation2 + $0xeb8] ss:$28 sps:$4 sm:$0xff]  }
 0x254   : > { %5278 = vmatpush2.bf16.msra.mxu0 %v7491_v57  ;;  %v7554_v57 = vld [vmem:[#allocation2 + $0x1238] ss:$28 sps:$4 sm:$0xff]  }
 0x255   : > { %5321 = vmatpush2.bf16.msra.mxu1 %v7494_v0  ;;  %5279 = vmatprep.subr.bf16.mxu0 %v7499_v2  ;;  %v7559_v0 = vld [vmem:[#allocation2 + $0xe84] ss:$28 sps:$4 sm:$0xff]  }
 0x256   : > { %5322 = vmatprep.subr.bf16.mxu1 %v7502_v6  ;;  %v7557_v2 = vld [vmem:[#allocation2 + $0xe80] ss:$28 sps:$4 sm:$0xff]  }
 0x257   : > { %v7560_v6 = vld [vmem:[#allocation2 + $0x1200] ss:$28 sps:$4 sm:$0xff]  }
 0x258   : > { %5280 = vmatpush2.bf16.msra.mxu0 %v7497_v48  ;;  %v7565_v48 = vld [vmem:[#allocation2 + $0xe4c] ss:$28 sps:$4 sm:$0xff]  }
 0x259   : > { %5323 = vmatpush2.bf16.msra.mxu1 %v7500_v49  ;;  %5281 = vmatprep.subr.bf16.mxu0 %v7505_v50  ;;  %v7568_v49 = vld [vmem:[#allocation2 + $0x11cc] ss:$28 sps:$4 sm:$0xff]  }
 0x25a   : > { %5324 = vmatprep.subr.bf16.mxu1 %v7508_v51  ;;  %v7563_v50 = vld [vmem:[#allocation2 + $0xe48] ss:$28 sps:$4 sm:$0xff]  }
 0x25b   : > { %v7566_v51 = vld [vmem:[#allocation2 + $0x11c8] ss:$28 sps:$4 sm:$0xff]  }
 0x25c   : > { %5282 = vmatpush2.bf16.msra.mxu0 %v7503_v4  ;;  %v7571_v4 = vld [vmem:[#allocation2 + $0xe14] ss:$28 sps:$4 sm:$0xff]  }
 0x25d   : > { %5325 = vmatpush2.bf16.msra.mxu1 %v7506_v54  ;;  %5283 = vmatprep.subr.bf16.mxu0 %v7511_v55  ;;  %v7574_v54 = vld [vmem:[#allocation2 + $0x1194] ss:$28 sps:$4 sm:$0xff]  }
 0x25e   : > { %5326 = vmatprep.subr.bf16.mxu1 %v7514_v59  ;;  %v7569_v55 = vld [vmem:[#allocation2 + $0xe10] ss:$28 sps:$4 sm:$0xff]  }
 0x25f   : > { %v7572_v59 = vld [vmem:[#allocation2 + $0x1190] ss:$28 sps:$4 sm:$0xff]  }
 0x260   : > { %5284 = vmatpush2.bf16.msra.mxu0 %v7509_v39  ;;  %v7577_v39 = vld [vmem:[#allocation2 + $0x115c] ss:$28 sps:$4 sm:$0xff]  }
 0x261   : > { %5327 = vmatpush2.bf16.msra.mxu1 %v7512_v3  ;;  %5285 = vmatprep.subr.bf16.mxu0 %v7517_v5  ;;  %v7580_v3 = vld [vmem:[#allocation2 + $0x14dc] ss:$28 sps:$4 sm:$0xff]  }
 0x262   : > { %5328 = vmatprep.subr.bf16.mxu1 %v7520_v21  ;;  %v7575_v5 = vld [vmem:[#allocation2 + $0x1158] ss:$28 sps:$4 sm:$0xff]  }
 0x263   : > { %v7578_v21 = vld [vmem:[#allocation2 + $0x14d8] ss:$28 sps:$4 sm:$0xff]  }
 0x264   : > { %5286 = vmatpush2.bf16.msra.mxu0 %v7515_v9  ;;  %v7961_v9 = vpop.f32.mrf.mxu0 }
 0x265   : > { %5329 = vmatpush2.bf16.msra.mxu1 %v7518_v10  ;;  %5287 = vmatprep.subr.bf16.mxu0 %v7523_v13  ;;  %v7963_v10 = vpop.f32.mrf.mxu1  ;;  %v7583_v13 = vld [vmem:[#allocation2 + $0x1124] ss:$28 sps:$4 sm:$0xff]  }
 0x266   : > { %5330 = vmatprep.subr.bf16.mxu1 %v7526_v45  ;;  %v7586_v45 = vld [vmem:[#allocation2 + $0x14a4] ss:$28 sps:$4 sm:$0xff]  }
 0x268   : > { %5288 = vmatpush2.bf16.msra.mxu0 %v7521_v15 }
 0x269   : > { %5331 = vmatpush2.bf16.msra.mxu1 %v7524_v47  ;;  %5343 = vmatprep.subr.bf16.mxu0 %v7529_v18 }
 0x26a   : > { %5386 = vmatprep.subr.bf16.mxu1 %v7532_v19  ;;  %v7581_v19 = vld [vmem:[#allocation2 + $0x1120] ss:$28 sps:$4 sm:$0xff]  }
 0x26b   : > { %5290 = vmatmul.mubr.bf16.vlgmr.msra.gmra.mxu0 %v7938_v43 }
 0x26c   : > { %5333 = vmatmul.mubr.bf16.vlgmr.msra.gmra.mxu1 %v7941_v16  ;;  %5344 = vmatpush1.bf16.msra.mxu0 %v7527_v22  ;;  %v7584_v22 = vld [vmem:[#allocation2 + $0x14a0] ss:$28 sps:$4 sm:$0xff]  }
 0x26d   : > { %5387 = vmatpush1.bf16.msra.mxu1 %v7530_v25  ;;  %5345 = vmatprep.subr.bf16.mxu0 %v7535_v27 }
 0x26e   : > { %5388 = vmatprep.subr.bf16.mxu1 %v7538_v28  ;;  %5375 = vmatprep.mubr.bf16.mxu0 %v7916_v56  ;;  %v7589_v28 = vld [vmem:[#allocation2 + $0x10ec] ss:$28 sps:$4 sm:$0xff]  }
 0x26f   : > { %5418 = vmatprep.mubr.bf16.mxu1 %v7919_v58 }
 0x270   : > { %5346 = vmatpush1.bf16.msra.mxu0 %v7533_v53  ;;  %v7592_v53 = vld [vmem:[#allocation2 + $0x146c] ss:$28 sps:$4 sm:$0xff]  }
 0x271   : > { %5389 = vmatpush1.bf16.msra.mxu1 %v7536_v29  ;;  %5347 = vmatprep.subr.bf16.mxu0 %v7541_v30 }
 0x272   : > { %5390 = vmatprep.subr.bf16.mxu1 %v7544_v31 }
 0x274   : > { %5348 = vmatpush1.bf16.msra.mxu0 %v7539_v34 }
 0x275   : > { %5391 = vmatpush1.bf16.msra.mxu1 %v7542_v35  ;;  %5349 = vmatprep.subr.bf16.mxu0 %v7547_v36  ;;  %v7587_v36 = vld [vmem:[#allocation2 + $0x10e8] ss:$28 sps:$4 sm:$0xff]  }
 0x276   : > { %5392 = vmatprep.subr.bf16.mxu1 %v7550_v37  ;;  %v7590_v37 = vld [vmem:[#allocation2 + $0x1468] ss:$28 sps:$4 sm:$0xff]  }
 0x278   : > { %5350 = vmatpush1.bf16.msra.mxu0 %v7545_v38 }
 0x279   : > { %5393 = vmatpush1.bf16.msra.mxu1 %v7548_v42  ;;  %5351 = vmatprep.subr.bf16.mxu0 %v7553_v17  ;;  %v7595_v42 = vld [vmem:[#allocation2 + $0x10b4] ss:$28 sps:$4 sm:$0xff]  }
 0x27a   : > { %5394 = vmatprep.subr.bf16.mxu1 %v7556_v46  ;;  %v7598_v17 = vld [vmem:[#allocation2 + $0x1434] ss:$28 sps:$4 sm:$0xff]  }
 0x27c   : > { %5352 = vmatpush1.bf16.msra.mxu0 %v7551_v62 }
 0x27d   : > { %5395 = vmatpush1.bf16.msra.mxu1 %v7554_v57  ;;  %5353 = vmatprep.subr.bf16.mxu0 %v7559_v0  ;;  %v7593_v0 = vld [vmem:[#allocation2 + $0x10b0] ss:$28 sps:$4 sm:$0xff]  }
 0x27e   : > { %5396 = vmatprep.subr.bf16.mxu1 %v7562_v1  ;;  %v7601_v1 = vld [vmem:[#allocation2 + $0x107c] ss:$28 sps:$4 sm:$0xff]  }
 0x280   : > { %5354 = vmatpush1.bf16.msra.mxu0 %v7557_v2  ;;  %v7604_v2 = vld [vmem:[#allocation2 + $0x13fc] ss:$28 sps:$4 sm:$0xff]  }
 0x281   : > { %5397 = vmatpush1.bf16.msra.mxu1 %v7560_v6  ;;  %5355 = vmatprep.subr.bf16.mxu0 %v7565_v48  ;;  %v7599_v6 = vld [vmem:[#allocation2 + $0x1078] ss:$28 sps:$4 sm:$0xff]  }
 0x282   : > { %5398 = vmatprep.subr.bf16.mxu1 %v7568_v49  ;;  %v7602_v48 = vld [vmem:[#allocation2 + $0x13f8] ss:$28 sps:$4 sm:$0xff]   ;;  %v7607_v49 = vld [vmem:[#allocation2 + $0x1044] ss:$28 sps:$4 sm:$0xff]  }
 0x284   : > { %5356 = vmatpush1.bf16.msra.mxu0 %v7563_v50  ;;  %v7610_v50 = vld [vmem:[#allocation2 + $0x13c4] ss:$28 sps:$4 sm:$0xff]  }
 0x285   : > { %5399 = vmatpush1.bf16.msra.mxu1 %v7566_v51  ;;  %5357 = vmatprep.subr.bf16.mxu0 %v7571_v4  ;;  %v7608_v51 = vld [vmem:[#allocation2 + $0x13c0] ss:$28 sps:$4 sm:$0xff]   ;;  %v7613_v4 = vld [vmem:[#allocation2 + $0x100c] ss:$28 sps:$4 sm:$0xff]  }
 0x286   : > { %5400 = vmatprep.subr.bf16.mxu1 %v7574_v54  ;;  %v7616_v54 = vld [vmem:[#allocation2 + $0x138c] ss:$28 sps:$4 sm:$0xff]  }
 0x288   : > { %5358 = vmatpush1.bf16.msra.mxu0 %v7569_v55  ;;  %v7611_v55 = vld [vmem:[#allocation2 + $0x1008] ss:$28 sps:$4 sm:$0xff]  }
 0x289   : > { %5401 = vmatpush1.bf16.msra.mxu1 %v7572_v59  ;;  %5359 = vmatprep.subr.bf16.mxu0 %v7577_v39  ;;  %v7614_v59 = vld [vmem:[#allocation2 + $0x1388] ss:$28 sps:$4 sm:$0xff]   ;;  %v7619_v39 = vld [vmem:[#allocation2 + $0xfd4] ss:$28 sps:$4 sm:$0xff]  }
 0x28a   : > { %5402 = vmatprep.subr.bf16.mxu1 %v7580_v3  ;;  %v7622_v3 = vld [vmem:[#allocation2 + $0x1354] ss:$28 sps:$4 sm:$0xff]  }
 0x28b   : > { %v3877_v15 = vpop.f32.mrf.mxu0 }
 0x28c   : > { %v3920_v47 = vpop.f32.mrf.mxu1  ;;  %v3878_v18 = vadd.f32 %v3877_v15, %v7887_v12  ;;  %5360 = vmatpush2.bf16.msra.mxu0 %v7575_v5  ;;  %v7617_v5 = vld [vmem:[#allocation2 + $0xfd0] ss:$28 sps:$4 sm:$0xff]   ;;  %v7625_v15 = vld [vmem:[#allocation2 + $0xfa0] ss:$28 sps:$4 sm:$0xff]  }
 0x28d   : > { %5403 = vmatpush2.bf16.msra.mxu1 %v7578_v21  ;;  %v3879_v25 = vpop.f32.mrf.mxu0  ;;  %5361 = vmatprep.subr.bf16.mxu0 %v7583_v13  ;;  %v7620_v21 = vld [vmem:[#allocation2 + $0x1350] ss:$28 sps:$4 sm:$0xff]   ;;  %v7623_v13 = vld [vmem:[#allocation2 + $0x1160] ss:$28 sps:$4 sm:$0xff]  }
 0x28e   : > { %v3922_v27 = vpop.f32.mrf.mxu1  ;;  %5404 = vmatprep.subr.bf16.mxu1 %v7586_v45  ;;  %v7966_v29 = vadd.f32 %v3920_v47, %v3878_v18  ;;  %v3880_v30 = vadd.f32 %v3879_v25, %v7889_v23  ;;  %v7624_v45 = vld [vmem:[#allocation2 + $0x14e0] ss:$28 sps:$4 sm:$0xff]   ;;  %v7627_v18 = vld [vmem:[#allocation2 + $0x1128] ss:$28 sps:$4 sm:$0xff]  }
 0x28f   : > { %v3881_v31 = vpop.f32.mrf.mxu0  ;;  %v7626_v47 = vld [vmem:[#allocation2 + $0x1320] ss:$28 sps:$4 sm:$0xff]  }
 0x290   : > { %v3924_v34 = vpop.f32.mrf.mxu1  ;;  %v7969_v35 = vadd.f32 %v3922_v27, %v3880_v30  ;;  %v3882_v12 = vadd.f32 %v3881_v31, %v7891_v26  ;;  %5362 = vmatpush2.bf16.msra.mxu0 %v7581_v19  ;;  %v7596_v26 = vld [vmem:[#allocation2 + $0x1430] ss:$28 sps:$4 sm:$0xff]   ;;  %v7628_v19 = vld [vmem:[#allocation2 + $0x14a8] ss:$28 sps:$4 sm:$0xff]  }
 0x291   : > { %5405 = vmatpush2.bf16.msra.mxu1 %v7584_v22  ;;  %v3883_v38 = vpop.f32.mrf.mxu0  ;;  %5363 = vmatprep.subr.bf16.mxu0 %v7589_v28  ;;  %v7629_v27 = vld [vmem:[#allocation2 + $0xf68] ss:$28 sps:$4 sm:$0xff]   ;;  %v7631_v31 = vld [vmem:[#allocation2 + $0x10f0] ss:$28 sps:$4 sm:$0xff]  }
 0x292   : > { %5406 = vmatprep.subr.bf16.mxu1 %v7592_v53  ;;  %v7972_v46 = vadd.f32 %v3924_v34, %v3882_v12  ;;  %v3884_v62 = vadd.f32 %v3883_v38, %v7893_v33  ;;  %v3926_v23 = vpop.f32.mrf.mxu1  ;;  %v7605_v33 = vld [vmem:[#allocation2 + $0x1040] ss:$28 sps:$4 sm:$0xff]   ;;  %v7630_v28 = vld [vmem:[#allocation2 + $0x12e8] ss:$28 sps:$4 sm:$0xff]   ;;  %v7632_v34 = vld [vmem:[#allocation2 + $0x1470] ss:$28 sps:$4 sm:$0xff]  }
 0x294   : > { %v7975_v57 = vadd.f32 %v3926_v23, %v3884_v62  ;;  %5364 = vmatpush2.bf16.msra.mxu0 %v7587_v36  ;;  %v7634_v62 = vld [vmem:[#allocation2 + $0x12b0] ss:$28 sps:$4 sm:$0xff]  }
 0x295   : > { %5407 = vmatpush2.bf16.msra.mxu1 %v7590_v37  ;;  %5365 = vmatprep.subr.bf16.mxu0 %v7595_v42 }
 0x296   : > { %5408 = vmatprep.subr.bf16.mxu1 %v7598_v17  ;;  %v7633_v17 = vld [vmem:[#allocation2 + $0xf30] ss:$28 sps:$4 sm:$0xff]  }
 0x298   : > { %5366 = vmatpush2.bf16.msra.mxu0 %v7593_v0 }
 0x299   : > { %5409 = vmatpush2.bf16.msra.mxu1 %v7596_v26  ;;  %5367 = vmatprep.subr.bf16.mxu0 %v7601_v1  ;;  %v7635_v26 = vld [vmem:[#allocation2 + $0x10b8] ss:$28 sps:$4 sm:$0xff]  }
 0x29a   : > { %5410 = vmatprep.subr.bf16.mxu1 %v7604_v2  ;;  %v7636_v1 = vld [vmem:[#allocation2 + $0x1438] ss:$28 sps:$4 sm:$0xff]  }
 0x29c   : > { %5368 = vmatpush2.bf16.msra.mxu0 %v7599_v6 }
 0x29d   : > { %5411 = vmatpush2.bf16.msra.mxu1 %v7602_v48  ;;  %5369 = vmatprep.subr.bf16.mxu0 %v7607_v49  ;;  %v7637_v48 = vld [vmem:[#allocation2 + $0xef8] ss:$28 sps:$4 sm:$0xff]   ;;  %v7639_v49 = vld [vmem:[#allocation2 + $0x1080] ss:$28 sps:$4 sm:$0xff]  }
 0x29e   : > { %5412 = vmatprep.subr.bf16.mxu1 %v7610_v50  ;;  %v7640_v50 = vld [vmem:[#allocation2 + $0x1400] ss:$28 sps:$4 sm:$0xff]  }
 0x2a0   : > { %5370 = vmatpush2.bf16.msra.mxu0 %v7605_v33 }
 0x2a1   : > { %5413 = vmatpush2.bf16.msra.mxu1 %v7608_v51  ;;  %5371 = vmatprep.subr.bf16.mxu0 %v7613_v4  ;;  %v7641_v51 = vld [vmem:[#allocation2 + $0xec0] ss:$28 sps:$4 sm:$0xff]  }
 0x2a2   : > { %5414 = vmatprep.subr.bf16.mxu1 %v7616_v54  ;;  %v7642_v4 = vld [vmem:[#allocation2 + $0x1240] ss:$28 sps:$4 sm:$0xff]   ;;  %v7643_v54 = vld [vmem:[#allocation2 + $0x1048] ss:$28 sps:$4 sm:$0xff]  }
 0x2a4   : > { %5372 = vmatpush2.bf16.msra.mxu0 %v7611_v55  ;;  %v7644_v55 = vld [vmem:[#allocation2 + $0x13c8] ss:$28 sps:$4 sm:$0xff]  }
 0x2a5   : > { %5415 = vmatpush2.bf16.msra.mxu1 %v7614_v59  ;;  %5373 = vmatprep.subr.bf16.mxu0 %v7619_v39  ;;  %v7646_v59 = vld [vmem:[#allocation2 + $0x1208] ss:$28 sps:$4 sm:$0xff]   ;;  %v7647_v39 = vld [vmem:[#allocation2 + $0x1010] ss:$28 sps:$4 sm:$0xff]  }
 0x2a6   : > { %5416 = vmatprep.subr.bf16.mxu1 %v7622_v3  ;;  %v7648_v3 = vld [vmem:[#allocation2 + $0x1390] ss:$28 sps:$4 sm:$0xff]  }
 0x2a8   : > { %5374 = vmatpush2.bf16.msra.mxu0 %v7617_v5  ;;  %v7649_v5 = vld [vmem:[#allocation2 + $0xe50] ss:$28 sps:$4 sm:$0xff]  }
 0x2a9   : > { %5417 = vmatpush2.bf16.msra.mxu1 %v7620_v21  ;;  %6613 = vmatprep.subr.bf16.mxu0 %v7623_v13  ;;  %v7650_v21 = vld [vmem:[#allocation2 + $0x11d0] ss:$28 sps:$4 sm:$0xff]   ;;  %v7651_v13 = vld [vmem:[#allocation2 + $0xfd8] ss:$28 sps:$4 sm:$0xff]  }
 0x2aa   : > { %6635 = vmatprep.subr.bf16.mxu1 %v7624_v45  ;;  %v7652_v45 = vld [vmem:[#allocation2 + $0x1358] ss:$28 sps:$4 sm:$0xff]  }
 0x2ab   : > { %v6585_v22 = vpop.f32.mrf.mxu0  ;;  %5376 = vmatmul.mubr.bf16.vlgmr.msra.gmra.mxu0 %v7938_v43 }
 0x2ac   : > { %v6607_v25 = vpop.f32.mrf.mxu1  ;;  %5419 = vmatmul.mubr.bf16.vlgmr.msra.gmra.mxu1 %v7941_v16  ;;  %6614 = vmatpush3.bf16.msra.mxu0 %v7625_v15  ;;  %v7653_v15 = vld [vmem:[#allocation2 + $0xe18] ss:$28 sps:$4 sm:$0xff]  }
 0x2ad   : > { %6636 = vmatpush3.bf16.msra.mxu1 %v7626_v47  ;;  %v6586_v53 = vpop.f32.mrf.mxu0  ;;  %6615 = vmatprep.subr.bf16.mxu0 %v7627_v18  ;;  %v7654_v47 = vld [vmem:[#allocation2 + $0x1198] ss:$28 sps:$4 sm:$0xff]  }
 0x2ae   : > { %v6608_v30 = vpop.f32.mrf.mxu1  ;;  %6637 = vmatprep.subr.bf16.mxu1 %v7628_v19  ;;  %v6587_v12 = vadd.f32 %v6586_v53, %v6585_v22  ;;  %5461 = vmatprep.mubr.bf16.mxu0 %v7916_v56 }
 0x2af   : > { %v6609_v36 = vadd.f32 %v6608_v30, %v6607_v25  ;;  %5502 = vmatprep.mubr.bf16.mxu1 %v7919_v58  ;;  %v6588_v37 = vpop.f32.mrf.mxu0 }
 0x2b0   : > { %v6610_v38 = vpop.f32.mrf.mxu1  ;;  %v3964_v42 = vadd.f32 %v6587_v12, %v7911_v24  ;;  %6616 = vmatpush3.bf16.msra.mxu0 %v7629_v27  ;;  %v7638_v24 = vld [vmem:[#allocation2 + $0x1278] ss:$28 sps:$4 sm:$0xff]  }
 0x2b1   : > { %6638 = vmatpush3.bf16.msra.mxu1 %v7630_v28  ;;  %v6589_v23 = vpop.f32.mrf.mxu0  ;;  %6617 = vmatprep.subr.bf16.mxu0 %v7631_v31 }
 0x2b2   : > { %v6611_v0 = vpop.f32.mrf.mxu1  ;;  %6639 = vmatprep.subr.bf16.mxu1 %v7632_v34  ;;  %v7982_v2 = vadd.f32 %v6609_v36, %v3964_v42  ;;  %v6590_v6 = vadd.f32 %v6589_v23, %v6588_v37 }
 0x2b3   : > { %v6612_v56 = vadd.f32 %v6611_v0, %v6610_v38 }
 0x2b4   : > { %v3967_v58 = vadd.f32 %v6590_v6, %v7913_v32  ;;  %6618 = vmatpush3.bf16.msra.mxu0 %v7633_v17  ;;  %v7645_v32 = vld [vmem:[#allocation2 + $0xe88] ss:$28 sps:$4 sm:$0xff]  }
 0x2b5   : > { %6640 = vmatpush3.bf16.msra.mxu1 %v7634_v62  ;;  %6619 = vmatprep.subr.bf16.mxu0 %v7635_v26 }
 0x2b6   : > { %6641 = vmatprep.subr.bf16.mxu1 %v7636_v1  ;;  %v7985_v33 = vadd.f32 %v6612_v56, %v3967_v58 }
 0x2b8   : > { %6620 = vmatpush3.bf16.msra.mxu0 %v7637_v48 }
 0x2b9   : > { %6642 = vmatpush3.bf16.msra.mxu1 %v7638_v24  ;;  %6621 = vmatprep.subr.bf16.mxu0 %v7639_v49 }
 0x2ba   : > { %6643 = vmatprep.subr.bf16.mxu1 %v7640_v50 }
 0x2bc   : > { %6622 = vmatpush3.bf16.msra.mxu0 %v7641_v51 }
 0x2bd   : > { %6644 = vmatpush3.bf16.msra.mxu1 %v7642_v4  ;;  %6623 = vmatprep.subr.bf16.mxu0 %v7643_v54 }
 0x2be   : > { %6645 = vmatprep.subr.bf16.mxu1 %v7644_v55 }
 0x2c0   : > { %6624 = vmatpush3.bf16.msra.mxu0 %v7645_v32 }
 0x2c1   : > { %6646 = vmatpush3.bf16.msra.mxu1 %v7646_v59  ;;  %6625 = vmatprep.subr.bf16.mxu0 %v7647_v39 }
 0x2c2   : > { %6647 = vmatprep.subr.bf16.mxu1 %v7648_v3 }
 0x2c4   : > { %6626 = vmatpush3.bf16.msra.mxu0 %v7649_v5 }
 0x2c5   : > { %6648 = vmatpush3.bf16.msra.mxu1 %v7650_v21  ;;  %6627 = vmatprep.subr.bf16.mxu0 %v7651_v13 }
 0x2c6   : > { %6649 = vmatprep.subr.bf16.mxu1 %v7652_v45 }
 0x2c8   : > { %6628 = vmatpush3.bf16.msra.mxu0 %v7653_v15 }
 0x2c9   : > { %6650 = vmatpush3.bf16.msra.mxu1 %v7654_v47 }
 0x2cb   : > { %5462 = vmatmul.mubr.bf16.vlgmr.msra.gmra.mxu0 %v7938_v43 }
 0x2cc   : > { %5503 = vmatmul.mubr.bf16.vlgmr.msra.gmra.mxu1 %v7941_v16 }
 0x2eb   : > { %v5205_v18 = vpop.f32.mrf.mxu0 }
 0x2ec   : > { %v5248_v19 = vpop.f32.mrf.mxu1 }
 0x2ed   : > { %v5249_v22 = vadd.f32 %v5248_v19, %v5205_v18  ;;  %v5207_v25 = vpop.f32.mrf.mxu0 }
 0x2ee   : > { %v5250_v27 = vpop.f32.mrf.mxu1 }
 0x2ef   : > { %v7990_v28 = vadd.f32 %v5249_v22, %v7926_v52  ;;  %v5251_v53 = vadd.f32 %v5250_v27, %v5207_v25  ;;  %v5209_v30 = vpop.f32.mrf.mxu0  ;;  %v2341_v52 = vadd.f32 %v7875_v61, %v7873_v60 }
 0x2f0   : > { %v5252_v31 = vpop.f32.mrf.mxu1 }
 0x2f1   : > { %v7993_v34 = vadd.f32 %v5251_v53, %v7929_v63  ;;  %v5253_v12 = vadd.f32 %v5252_v31, %v5209_v30  ;;  %v5211_v36 = vpop.f32.mrf.mxu0  ;;  %v3794_v42 = vadd.f32 %v7948_v40, %v2341_v52  ;;  %v2345_v63 = vadd.f32 %v7885_v20, %v7883_v8 }
 0x2f2   : > { %v5254_v37 = vpop.f32.mrf.mxu1  ;;  %v5691_v52 = vlaneseq }
 0x2f3   : > { %v7996_v43 = vadd.f32 %v5253_v12, %v7932_v11  ;;  %v5255_v16 = vadd.f32 %v5254_v37, %v5211_v36  ;;  %v3837_v11 = vadd.f32 %v7950_v41, %v3794_v42  ;;  %v3798_v1 = vadd.f32 %v7961_v9, %v2345_v63 }
 0x2f5   : > { %v7999_v38 = vadd.f32 %v5255_v16, %v7935_v14  ;;  %v3841_v8 = vadd.f32 %v7963_v10, %v3798_v1 }
 0x32b   : > { %v5291_v17 = vpop.f32.mrf.mxu0 }
 0x32c   : > { %v5334_v62 = vpop.f32.mrf.mxu1 }
 0x32d   : > { %v5335_v23 = vadd.f32 %v5334_v62, %v5291_v17  ;;  %v5293_v0 = vpop.f32.mrf.mxu0 }
 0x32e   : > { %v5336_v26 = vpop.f32.mrf.mxu1 }
 0x32f   : > { %v8009_v14 = vadd.f32 %v5335_v23, %v7952_v44  ;;  %v5337_v6 = vadd.f32 %v5336_v26, %v5293_v0  ;;  %v5295_v56 = vpop.f32.mrf.mxu0 }
 0x330   : > { %v5338_v60 = vpop.f32.mrf.mxu1 }
 0x331   : > { %v5339_v61 = vadd.f32 %v5338_v60, %v5295_v56  ;;  %v8011_v40 = vadd.f32 %v5337_v6, %v3837_v11  ;;  %v5297_v58 = vpop.f32.mrf.mxu0 }
 0x332   : > { %v5340_v48 = vpop.f32.mrf.mxu1 }
 0x333   : > { %v8015_v20 = vadd.f32 %v5339_v61, %v7955_v7  ;;  %v5341_v24 = vadd.f32 %v5340_v48, %v5297_v58  ;;  %5533 = vrot.lane.b32.xlu0 %v8011_v40, %s7735_s5 }
 0x335   : > { %v8019_v41 = vadd.f32 %v5341_v24, %v3841_v8 }
 0x337   : > { %5541 = vrot.lane.b32.xlu0 %v8019_v41, %s7735_s5 }
 0x36b   : > { %v5377_v44 = vpop.f32.mrf.mxu0 }
 0x36c   : > { %v5420_v9 = vpop.f32.mrf.mxu1 }
 0x36d   : > { %v5421_v49 = vadd.f32 %v5420_v9, %v5377_v44  ;;  %v5379_v50 = vpop.f32.mrf.mxu0  ;;  %v8054_v9 = vld [vmem:[#allocation4] sm:$0xf] }
 0x36e   : > { %v5422_v51 = vpop.f32.mrf.mxu1 }
 0x36f   : > { %v5515_v10 = vadd.f32 %v5421_v49, %v7966_v29  ;;  %v5423_v4 = vadd.f32 %v5422_v51, %v5379_v50  ;;  %v5381_v7 = vpop.f32.mrf.mxu0 }
 0x370   : > { %v5424_v54 = vpop.f32.mrf.mxu1 }
 0x371   : > { %v5425_v55 = vadd.f32 %v5424_v54, %v5381_v7  ;;  %5535 = vrot.lane.b32.xlu0 %v5515_v10, %s7735_s5  ;;  %v5516_v32 = vadd.f32 %v5423_v4, %v7969_v35  ;;  %v5383_v59 = vpop.f32.mrf.mxu0 }
 0x372   : > { %v5426_v39 = vpop.f32.mrf.mxu1 }
 0x373   : > { %v5427_v3 = vadd.f32 %v5426_v39, %v5383_v59  ;;  %5537 = vrot.lane.b32.xlu1 %v5516_v32, %s7735_s5  ;;  %v5522_v5 = vadd.f32 %v5425_v55, %v7972_v46 }
 0x375   : > { %v5523_v21 = vadd.f32 %v5427_v3, %v7975_v57 }
 0x377   : > { %5543 = vrot.lane.b32.xlu1 %v5522_v5, %s7735_s5  ;;  %5545 = vrot.lane.b32.xlu0 %v5523_v21, %s7735_s5 }
 0x38b   : > { %v6629_v29 = vpop.f32.mrf.mxu0 }
 0x38c   : > { %v6651_v13 = vpop.f32.mrf.mxu1 }
 0x38d   : > { %v6630_v45 = vpop.f32.mrf.mxu0 }
 0x38e   : > { %v6652_v15 = vpop.f32.mrf.mxu1  ;;  %v6631_v47 = vadd.f32 %v6630_v45, %v6629_v29 }
 0x38f   : > { %v6653_v18 = vadd.f32 %v6652_v15, %v6651_v13  ;;  %v6632_v35 = vpop.f32.mrf.mxu0 }
 0x390   : > { %v6654_v19 = vpop.f32.mrf.mxu1 }
 0x391   : > { %v5505_v22 = vadd.f32 %v6653_v18, %v6631_v47  ;;  %v6633_v25 = vpop.f32.mrf.mxu0 }
 0x392   : > { %v6655_v27 = vpop.f32.mrf.mxu1  ;;  %v6634_v53 = vadd.f32 %v6633_v25, %v6632_v35 }
 0x393   : > { %v6656_v30 = vadd.f32 %v6655_v27, %v6654_v19  ;;  %v5517_v46 = vadd.f32 %v5505_v22, %v7982_v2 }
 0x395   : > { %v5508_v57 = vadd.f32 %v6656_v30, %v6634_v53  ;;  %5539 = vrot.lane.b32.xlu1 %v5517_v46, %s7735_s5 }
 0x397   : > { %v5524_v31 = vadd.f32 %v5508_v57, %v7985_v33  ;;  %v8042_v33 = vshrl.u32 %v5691_v52, 7  ;;  %v5742_v57 = vld [vmem:[%s8078_s9] sm:$0xff] }
 0x399   : > { %5547 = vrot.lane.b32.xlu1 %v5524_v31, %s7735_s5  ;;  %v5693_v61 = vsub.s32 0, %v8042_v33  ;;  %v5697_v44 = vsub.s32 1, %v8042_v33 }
 0x39b   : > { %v5694_v55 = vrot.slane %v8054_v9, %v5693_v61  ;;  %v5698_v32 = vrot.slane %v8054_v9, %v5697_v44  ;;  %v5701_v61 = vsub.s32 2, %v8042_v33 }
 0x3a5   : > { %v5534_v12 = vpop.permute.xlu0 %5533 }
 0x3a9   : > { %v5542_v36 = vpop.permute.xlu0 %5541 }
 0x3e3   : > { %v5536_v37 = vpop.permute.xlu0 %5535 }
 0x3e4   : > { %v5550_v16 = vsel %vm5549_vm0, %v5534_v12, %v5536_v37 }
 0x3e5   : > { %v5564_v42 = vmax.f32 %v7990_v28, %v5550_v16  ;;  %v8037_v17 = vpop.permute.xlu1 %5537 }
 0x3e6   : > { %v5551_v2 = vsel %vm5549_vm0, %v5536_v37, %v8037_v17 }
 0x3e7   : > { %v5576_v62 = vrot.slane %v5564_v42, 1  ;;  %v5565_v63 = vmax.f32 %v7993_v34, %v5551_v2 }
 0x3e9   : > { %v5584_v23 = vmax.f32 %v5564_v42, %v5576_v62  ;;  %v5577_v0 = vrot.slane %v5565_v63, 1  ;;  %v5544_v26 = vpop.permute.xlu1 %5543  ;;  %v8044_v11 = vpop.permute.xlu0 %5545 }
 0x3ea   : > { %v5553_v1 = vsel %vm5549_vm0, %v5542_v36, %v5544_v26  ;;  %v5554_v28 = vsel %vm5549_vm0, %v5544_v26, %v8044_v11 }
 0x3eb   : > { %v5608_v6 = vrot.slane %v5584_v23, 1  ;;  %v5585_v56 = vmax.f32 %v5565_v63, %v5577_v0  ;;  %v5616_v60 = vrot.slane %v5584_v23, 2  ;;  %v5568_v34 = vmax.f32 %v7996_v43, %v5553_v1 }
 0x3ec   : > { %v5569_v58 = vmax.f32 %v7999_v38, %v5554_v28  ;;  %v5624_v54 = vrot.slane %v5584_v23, 3 }
 0x3ed   : > { %v5661_v48 = vsel %vm5660_vm1, %v5584_v23, %v5608_v6  ;;  %v5609_v8 = vrot.slane %v5585_v56, 1  ;;  %v5617_v24 = vrot.slane %v5585_v56, 2  ;;  %v5592_v49 = vrot.slane %v5568_v34, 1 }
 0x3ee   : > { %v5593_v50 = vrot.slane %v5569_v58, 1  ;;  %v5625_v51 = vrot.slane %v5585_v56, 3  ;;  %v5666_v43 = vsel %vm5665_vm2, %v5661_v48, %v5616_v60 }
 0x3ef   : > { %v5662_v10 = vsel %vm5660_vm1, %v5585_v56, %v5609_v8  ;;  %v5600_v4 = vmax.f32 %v5568_v34, %v5592_v49  ;;  %v5671_v21 = vsel %vm5670_vm3, %v5666_v43, %v5624_v54  ;;  %v5705_v34 = vsub.s32 3, %v8042_v33 }
 0x3f0   : > { %v5667_v38 = vsel %vm5665_vm2, %v5662_v10, %v5617_v24  ;;  %v5601_v7 = vmax.f32 %v5569_v58, %v5593_v50  ;;  %v5702_v43 = vrot.slane %v8054_v9, %v5701_v61 }
 0x3f1   : > { %v5672_v59 = vsel %vm5670_vm3, %v5667_v38, %v5625_v51  ;;  %v5636_v39 = vrot.slane %v5600_v4, 4  ;;  %v5644_v3 = vrot.slane %v5600_v4, 5  ;;  %v5652_v13 = vrot.slane %v5600_v4, 6 }
 0x3f2   : > { %v5637_v5 = vrot.slane %v5601_v7, 4  ;;  %v5645_v29 = vrot.slane %v5601_v7, 5  ;;  %v5653_v15 = vrot.slane %v5601_v7, 6  ;;  %v5706_v33 = vrot.slane %v8054_v9, %v5705_v34 }
 0x3f3   : > { %v5676_v45 = vsel %vm5675_vm4, %v5671_v21, %v5636_v39 }
 0x3f4   : > { %v5677_v47 = vsel %vm5675_vm4, %v5672_v59, %v5637_v5  ;;  %v5681_v18 = vsel %vm5680_vm5, %v5676_v45, %v5644_v3 }
 0x3f5   : > { %v5682_v35 = vsel %vm5680_vm5, %v5677_v47, %v5645_v29  ;;  %v5686_v19 = vsel %vm5685_vm6, %v5681_v18, %v5652_v13  ;;  %v5748_v13 = vld [vmem:[%s8078_s9 + $0x8] sm:$0xff] }
 0x3f6   : > { %v5687_v25 = vsel %vm5685_vm6, %v5682_v35, %v5653_v15  ;;  %v5711_v27 = vadd.f32 %v5694_v55, %v5686_v19 }
 0x3f7   : > { %v5712_v53 = vadd.f32 %v5698_v32, %v5687_v25 }
 0x3f8   : > { %v5715_v30 = vmax.f32 %v5711_v27, 0.0 }
 0x3f9   : > { %v5716_v46 = vmax.f32 %v5712_v53, 0.0 }
 0x3fb   : > { %v6523_v31 = vpack.c.bf16 %v5716_v46, %v5715_v30 }
 0x3fd   : > { %v5743_v12 = vsel %vm5741_vm12, %v6523_v31, %v5742_v57 }
 0x3fe   : > { %5744 = vst [vmem:[%s8078_s9] sm:$0xff] %v5743_v12 }
 0x407   : > { %v5540_v36 = vpop.permute.xlu1 %5539 }
 0x408   : > { %v5552_v37 = vsel %vm5549_vm0, %v8037_v17, %v5540_v36  ;;  %v5567_v16 = vmax.f32 %v8011_v40, %v5540_v36 }
 0x409   : > { %v5566_v52 = vmax.f32 %v8009_v14, %v5552_v37 }
 0x40a   : > { %v5579_v42 = vrot.slane %v5567_v16, 1 }
 0x40b   : > { %v5578_v2 = vrot.slane %v5566_v52, 1  ;;  %v5548_v62 = vpop.permute.xlu1 %5547 }
 0x40c   : > { %v5587_v63 = vmax.f32 %v5567_v16, %v5579_v42  ;;  %v5555_v23 = vsel %vm5549_vm0, %v8044_v11, %v5548_v62  ;;  %v5571_v0 = vmax.f32 %v8019_v41, %v5548_v62 }
 0x40d   : > { %v5586_v26 = vmax.f32 %v5566_v52, %v5578_v2  ;;  %v5570_v1 = vmax.f32 %v8015_v20, %v5555_v23 }
 0x40e   : > { %v5611_v28 = vrot.slane %v5587_v63, 1  ;;  %v5619_v6 = vrot.slane %v5587_v63, 2  ;;  %v5595_v56 = vrot.slane %v5571_v0, 1  ;;  %v5627_v20 = vrot.slane %v5587_v63, 3 }
 0x40f   : > { %v5610_v17 = vrot.slane %v5586_v26, 1  ;;  %v5618_v60 = vrot.slane %v5586_v26, 2  ;;  %v5594_v40 = vrot.slane %v5570_v1, 1  ;;  %v5626_v48 = vrot.slane %v5586_v26, 3 }
 0x410   : > { %v5664_v14 = vsel %vm5660_vm1, %v5587_v63, %v5611_v28  ;;  %v5603_v58 = vmax.f32 %v5571_v0, %v5595_v56 }
 0x411   : > { %v5663_v11 = vsel %vm5660_vm1, %v5586_v26, %v5610_v17  ;;  %v5669_v41 = vsel %vm5665_vm2, %v5664_v14, %v5619_v6  ;;  %v5602_v8 = vmax.f32 %v5570_v1, %v5594_v40 }
 0x412   : > { %v5668_v24 = vsel %vm5665_vm2, %v5663_v11, %v5618_v60  ;;  %v5639_v44 = vrot.slane %v5603_v58, 4  ;;  %v5647_v49 = vrot.slane %v5603_v58, 5  ;;  %v5674_v38 = vsel %vm5670_vm3, %v5669_v41, %v5627_v20 }
 0x413   : > { %v5638_v50 = vrot.slane %v5602_v8, 4  ;;  %v5646_v51 = vrot.slane %v5602_v8, 5  ;;  %v5673_v10 = vsel %vm5670_vm3, %v5668_v24, %v5626_v48  ;;  %v5654_v4 = vrot.slane %v5602_v8, 6 }
 0x414   : > { %v5655_v7 = vrot.slane %v5603_v58, 6  ;;  %v5679_v55 = vsel %vm5675_vm4, %v5674_v38, %v5639_v44 }
 0x415   : > { %v5678_v54 = vsel %vm5675_vm4, %v5673_v10, %v5638_v50  ;;  %v5684_v59 = vsel %vm5680_vm5, %v5679_v55, %v5647_v49 }
 0x416   : > { %v5683_v32 = vsel %vm5680_vm5, %v5678_v54, %v5646_v51  ;;  %v5689_v3 = vsel %vm5685_vm6, %v5684_v59, %v5655_v7 }
 0x417   : > { %v5688_v39 = vsel %vm5685_vm6, %v5683_v32, %v5654_v4  ;;  %v5714_v5 = vadd.f32 %v5706_v33, %v5689_v3 }
 0x418   : > { %v5713_v9 = vadd.f32 %v5702_v43, %v5688_v39 }
 0x419   : > { %v5718_v29 = vmax.f32 %v5714_v5, 0.0 }
 0x41a   : > { %v5717_v21 = vmax.f32 %v5713_v9, 0.0 }
 0x41c   : > { %v6524_v45 = vpack.c.bf16 %v5718_v29, %v5717_v21 }
 0x41e   : > { %v5749_v15 = vsel %vm5747_vm15, %v6524_v45, %v5748_v13 }
 0x41f   : > { %5750 = vst [vmem:[%s8078_s9 + $0x8] sm:$0xff] %v5749_v15 }
 0x420 PF: > { %s15_s12 = sadd.s32 1, %s7729_s12  }
 0x421   : > { %p12_p3 = scmp.ge.s32.totalorder %s15_s12, 4  }
 0x423   :  { %14 = sbr.rel (!%p12_p3) target bundleno = 2 (0x2), region = 73 }
 0x428   :  { %5772 = vsyncpa [#allocation3], 1 }
 0x429   :  { %5774 = vsyncpa [#allocation3 + $0x1], 1 }
 0x42a   :  { %5775 = vsyncpa [#allocation5], 1 }

</bundles_post_ra>
